<compile_context>
chip_gen: v7x
topology: tpu7x:2x2x1
jax: 0.10.0
libtpu: 0.0.40
codegen_flags: <defaults>
</compile_context>

<pallas_src>
import math
import functools

import jax
import jax.numpy as jnp
from jax.experimental import pallas as pl
from jax.experimental.pallas import tpu as pltpu

OUT_PAD = 128  # lane-dense padded output width


# ----------------------------- in-kernel helpers -----------------------------

def _layer_norm(x, w, b, eps=1e-5):
    mean = jnp.mean(x, axis=-1, keepdims=True)
    var = jnp.mean(jnp.square(x - mean), axis=-1, keepdims=True)
    return (x - mean) * jax.lax.rsqrt(var + eps) * w + b


def _softmax(s):
    s = s - jnp.max(s, axis=-1, keepdims=True)
    e = jnp.exp(s)
    return e * pl.reciprocal(jnp.sum(e, axis=-1, keepdims=True), approx=True)


# --------------------------------- fused kernel -------------------------------

def graph_transformer_kernel(
        x_ref,                            # (Bb, S, D_in)
        pose_ref,                         # (max_length, H)  = pos + emb_b
        emb_w_ref,                        # (D_in, H)
        wq_ref, bq_ref,                   # (L, nh, H, hd), (L, nh, 1, hd)  scale folded
        wk_ref, bk_ref,                   # (L, nh, H, hd), (L, nh, 1, hd)
        wv_ref, bv_ref,                   # (L, nh, H, hd), (L, nh, 1, hd)
        wo_ref, wo_b_ref,                 # (L, nh, hd, H), (L, 1, H)
        ln1_w_ref, ln1_b_ref,             # (L, 1, H) x2
        ff1_w_ref, ff1_b_ref,             # (L, H, H), (L, 1, H)
        ff2_w_ref, ff2_b_ref,             # (L, H, H), (L, 1, H)
        ln2_w_ref, ln2_b_ref,             # (L, 1, H) x2
        comp_w_ref, comp_b_ref,           # (H, OUT_PAD), (1, OUT_PAD)
        o_ref):                           # (Bb, S, OUT_PAD)
    L, nh, H, hd = wq_ref.shape
    Bb, S, D_in = x_ref.shape
    BS = Bb * S
    out_pad = comp_w_ref.shape[1]
    mdt = emb_w_ref.dtype                 # MXU operand dtype (f32 or bf16)

    def mm(a, w):                         # MXU matmul, always f32 accumulation
        return jnp.dot(a.astype(mdt), w.astype(mdt),
                       preferred_element_type=jnp.float32)

    # embedding + (positional encoding + embedding bias), all graphs at once
    h = mm(x_ref[...].reshape(BS, D_in), emb_w_ref[...])
    h = (h.reshape(Bb, S, H) + pose_ref[0:S, :]).reshape(BS, H)

    # encoder layers: post-norm, ReLU FFN, dropout == identity
    for l in range(L):                    # static unroll: full scheduler visibility
        attn = jnp.broadcast_to(wo_b_ref[l], (BS, H)).astype(jnp.float32)
        for n in range(nh):               # static unroll over heads; no lane slicing
            qn = mm(h, wq_ref[l, n]) + bq_ref[l, n]      # 1/sqrt(hd) pre-folded
            kn = mm(h, wk_ref[l, n]) + bk_ref[l, n]
            vn = mm(h, wv_ref[l, n]) + bv_ref[l, n]
            q3 = qn.reshape(Bb, S, hd)    # leading-dim split: layout-preserving
            k3 = kn.reshape(Bb, S, hd)
            v3 = vn.reshape(Bb, S, hd)
            s = jnp.einsum('bqd,bkd->bqk', q3.astype(mdt), k3.astype(mdt),
                           preferred_element_type=jnp.float32)   # (Bb, S, S)
            p = _softmax(s)                                       # f32
            c = jnp.einsum('bqk,bkd->bqd', p.astype(mdt), v3.astype(mdt),
                           preferred_element_type=jnp.float32)    # (Bb, S, hd)
            attn = attn + mm(c.reshape(BS, hd), wo_ref[l, n])     # per-head out_proj

        y = _layer_norm(h + attn, ln1_w_ref[l], ln1_b_ref[l])
        f = jnp.maximum(mm(y, ff1_w_ref[l]) + ff1_b_ref[l], 0.0)
        f = mm(f, ff2_w_ref[l]) + ff2_b_ref[l]
        h = _layer_norm(y + f, ln2_w_ref[l], ln2_b_ref[l])

    # final compress; zero-padded to 128 lanes -> dense (unmasked) final store
    out = mm(h, comp_w_ref[...]) + comp_b_ref[...]
    o_ref[...] = out.reshape(Bb, S, out_pad)


# ------------------------------- pallas wrapper --------------------------------

def _const_spec(arr):
    """Whole-array block, same block for every grid step (weights / pos table)."""
    nd = arr.ndim
    return pl.BlockSpec(arr.shape, lambda b, _n=nd: (0,) * _n)


@functools.partial(jax.jit,
                   static_argnames=("output_dim", "num_blocks", "return_padded"))
def graph_transformer_forward(x, params, output_dim, num_blocks=1,
                              return_padded=False):
    """x: (B, S, input_dim) f32 -> (B, S, output_dim) f32 (batched graphs).

    num_blocks=1 (default) runs the whole batch in a single fused grid step
    (best on v5e/v6e); num_blocks=2 shards the graphs across the two
    TensorCores on v7x.  return_padded=True skips the trailing output_dim
    slice and returns the 128-lane-padded output.
    """
    B, S, D_in = x.shape
    assert B % num_blocks == 0, "batch must be divisible by num_blocks"
    assert S <= params["pos_emb"].shape[0], "seq_len exceeds max_length"
    Bb = B // num_blocks
    out_pad = params["comp_w"].shape[1]

    weights = (params["pos_emb"], params["emb_w"],
               params["wq"], params["bq"],
               params["wk"], params["bk"],
               params["wv"], params["bv"],
               params["wo"], params["out_b"],
               params["ln1_w"], params["ln1_b"],
               params["ff1_w"], params["ff1_b"],
               params["ff2_w"], params["ff2_b"],
               params["ln2_w"], params["ln2_b"],
               params["comp_w"], params["comp_b"])

    # explicit scoped-VMEM budget: weights (double-buffered) + IO + headroom,
    # capped at 64 MiB so the same config stays safe on v7x's smaller VMEM.
    w_bytes = sum(int(w.size) * w.dtype.itemsize for w in weights)
    io_bytes = (int(x.size) * x.dtype.itemsize + B * S * out_pad * 4) // num_blocks
    vmem_limit = int(min(64 << 20, max(32 << 20, 2 * (w_bytes + io_bytes) + (8 << 20))))

    out = pl.pallas_call(
        graph_transformer_kernel,
        grid=(num_blocks,),
        out_shape=jax.ShapeDtypeStruct((B, S, out_pad), jnp.float32),
        in_specs=[pl.BlockSpec((Bb, S, D_in), lambda b: (b, 0, 0))]
                 + [_const_spec(w) for w in weights],
        out_specs=pl.BlockSpec((Bb, S, out_pad), lambda b: (b, 0, 0)),
        compiler_params=pltpu.CompilerParams(
            dimension_semantics=("parallel",),   # shards blocks over TCs on v7x
            vmem_limit_bytes=vmem_limit),
    )(x, *weights)

    if return_padded:
        return out
    return out[:, :, :output_dim]


def graph_transformer_forward_single(x, params, output_dim):
    """Matches the nn.Module forward signature: x is (seq_len, input_dim)."""
    return graph_transformer_forward(x[None], params, output_dim)[0]


# ------------------------------ parameter setup -------------------------------

def positional_encoding(d_model, max_length):
    position = jnp.arange(max_length, dtype=jnp.float32)[:, None]
    div_term = jnp.exp(jnp.arange(0, d_model, 2, dtype=jnp.float32)
                       * -(math.log(10000.0) / d_model))
    pe = jnp.zeros((max_length, d_model), jnp.float32)
    pe = pe.at[:, 0::2].set(jnp.sin(position * div_term))
    pe = pe.at[:, 1::2].set(jnp.cos(position * div_term))
    return pe


def _linear_init(key, fan_in, fan_out):
    """PyTorch nn.Linear-style init; returns pre-transposed (in,out) W, (1,out) b."""
    kw, kb = jax.random.split(key)
    bound = 1.0 / math.sqrt(fan_in)
    w = jax.random.uniform(kw, (fan_out, fan_in), jnp.float32, -bound, bound)
    b = jax.random.uniform(kb, (fan_out,), jnp.float32, -bound, bound)
    return w.T, b[None, :]


def init_raw_params(key, input_dim, hidden_dim, output_dim, num_layers, max_length):
    """Raw (PyTorch-layout-equivalent) parameters used by the JAX reference."""
    keys = jax.random.split(key, 2 + num_layers)
    emb_w, emb_b = _linear_init(keys[0], input_dim, hidden_dim)
    comp_w, comp_b = _linear_init(keys[1], hidden_dim, output_dim)
    per = {k: [] for k in ("in_w", "in_b", "out_w", "out_b",
                           "ff1_w", "ff1_b", "ff2_w", "ff2_b")}
    for l in range(num_layers):
        lk = jax.random.split(keys[2 + l], 4)
        in_w, in_b = _linear_init(lk[0], hidden_dim, 3 * hidden_dim)
        out_w, out_b = _linear_init(lk[1], hidden_dim, hidden_dim)
        # dim_feedforward == hidden_dim, exactly as the PyTorch module constructs it
        ff1_w, ff1_b = _linear_init(lk[2], hidden_dim, hidden_dim)
        ff2_w, ff2_b = _linear_init(lk[3], hidden_dim, hidden_dim)
        per["in_w"].append(in_w);   per["in_b"].append(in_b)
        per["out_w"].append(out_w); per["out_b"].append(out_b)
        per["ff1_w"].append(ff1_w); per["ff1_b"].append(ff1_b)
        per["ff2_w"].append(ff2_w); per["ff2_b"].append(ff2_b)
    raw = {k: jnp.stack(v, axis=0) for k, v in per.items()}
    L = num_layers
    raw.update(
        emb_w=emb_w, emb_b=emb_b, comp_w=comp_w, comp_b=comp_b,
        ln1_w=jnp.ones((L, 1, hidden_dim), jnp.float32),
        ln1_b=jnp.zeros((L, 1, hidden_dim), jnp.float32),
        ln2_w=jnp.ones((L, 1, hidden_dim), jnp.float32),
        ln2_b=jnp.zeros((L, 1, hidden_dim), jnp.float32),
        pos=positional_encoding(hidden_dim, max_length))
    return raw


def pack_params(raw, num_heads, out_pad=OUT_PAD):
    """Repack raw params into the kernel layout.

    - q/k/v weights split per head (leading untiled axes; no in-kernel lane slicing)
    - 1/sqrt(hd) folded into wq/bq
    - positional encoding + embedding bias pre-summed
    - compress weight/bias zero-padded to a 128-lane output
    """
    H = raw["emb_w"].shape[1]
    L = raw["in_w"].shape[0]
    hd = H // num_heads
    scale = 1.0 / math.sqrt(hd)

    def split(block_w, block_b, s):
        # block_w: (L, H, H) -> (L, nh, H, hd); block_b: (L, 1, H) -> (L, nh, 1, hd)
        w = block_w.reshape(L, H, num_heads, hd).transpose(0, 2, 1, 3) * s
        b = block_b.reshape(L, num_heads, 1, hd) * s
        return w, b

    in_w, in_b = raw["in_w"], raw["in_b"]
    wq, bq = split(in_w[:, :, 0 * H:1 * H], in_b[:, :, 0 * H:1 * H], scale)
    wk, bk = split(in_w[:, :, 1 * H:2 * H], in_b[:, :, 1 * H:2 * H], 1.0)
    wv, bv = split(in_w[:, :, 2 * H:3 * H], in_b[:, :, 2 * H:3 * H], 1.0)
    # out_proj stored per-head: wo[l, n, d, f] = W_out^T[l, n*hd + d, f]
    wo = raw["out_w"].reshape(L, num_heads, hd, H)

    out_dim = raw["comp_w"].shape[1]
    assert out_dim <= out_pad
    comp_w = jnp.pad(raw["comp_w"], ((0, 0), (0, out_pad - out_dim)))
    comp_b = jnp.pad(raw["comp_b"], ((0, 0), (0, out_pad - out_dim)))

    return dict(
        emb_w=raw["emb_w"], pos_emb=raw["pos"] + raw["emb_b"],
        wq=wq, bq=bq, wk=wk, bk=bk, wv=wv, bv=bv,
        wo=wo, out_b=raw["out_b"],
        ln1_w=raw["ln1_w"], ln1_b=raw["ln1_b"],
        ff1_w=raw["ff1_w"], ff1_b=raw["ff1_b"],
        ff2_w=raw["ff2_w"], ff2_b=raw["ff2_b"],
        ln2_w=raw["ln2_w"], ln2_b=raw["ln2_b"],
        comp_w=comp_w, comp_b=comp_b)


MATMUL_WEIGHTS = ("emb_w", "wq", "wk", "wv", "wo", "ff1_w", "ff2_w", "comp_w")


def cast_matmul_weights(params, dtype):
    """bf16 MXU operands help on v5e/v6e/v7x alike (full-rate bf16 MXU, half the
    weight DMA/VMEM); accumulation, LayerNorm and softmax stay f32."""
    out = dict(params)
    for k in MATMUL_WEIGHTS:
        out[k] = params[k].astype(dtype)
    return out


# ------------------------------ pure-JAX reference -----------------------------

def _layer_norm_ref(x, w, b, eps=1e-5):
    mu = jnp.mean(x, axis=-1, keepdims=True)
    var = jnp.mean((x - mu) ** 2, axis=-1, keepdims=True)
    return (x - mu) / jnp.sqrt(var + eps) * w + b


def reference_forward(x, raw, num_heads):
    """Mirrors nn.TransformerEncoder (post-norm, ReLU, dropout=0), per-head loop."""
    H = raw["emb_w"].shape[1]
    hd = H // num_heads
    h = x @ raw["emb_w"] + raw["emb_b"] + raw["pos"][:x.shape[0], :]
    for l in range(raw["in_w"].shape[0]):
        qkv = h @ raw["in_w"][l] + raw["in_b"][l]
        q, k, v = qkv[:, :H], qkv[:, H:2 * H], qkv[:, 2 * H:]
        heads = []
        for n in range(num_heads):
            sl = slice(n * hd, (n + 1) * hd)
            s = (q[:, sl] @ k[:, sl].T) / math.sqrt(hd)
            heads.append(jax.nn.softmax(s, axis=-1) @ v[:, sl])
        attn = jnp.concatenate(heads, axis=-1) @ raw["out_w"][l] + raw["out_b"][l]
        y = _layer_norm_ref(h + attn, raw["ln1_w"][l], raw["ln1_b"][l])
        f = jnp.maximum(y @ raw["ff1_w"][l] + raw["ff1_b"][l], 0.0)
        f = f @ raw["ff2_w"][l] + raw["ff2_b"][l]
        h = _layer_norm_ref(y + f, raw["ln2_w"][l], raw["ln2_b"][l])
    return h @ raw["comp_w"] + raw["comp_b"]


# ----------------------------------- main --------------------------------------

if __name__ == "__main__":
    input_dim, hidden_dim, output_dim = 16, 32, 8
    num_layers, num_heads, max_length = 2, 4, 16
    seq_len, batch = 8, 4          # dropout = 0.0 -> identity

    key = jax.random.PRNGKey(0)
    pkey, xkey = jax.random.split(key)
    raw = init_raw_params(pkey, input_dim, hidden_dim, output_dim,
                          num_layers, max_length)
    params = pack_params(raw, num_heads)
    xb = jax.random.normal(xkey, (batch, seq_len, input_dim), jnp.float32)

    ref_batched = jnp.stack([reference_forward(xb[i], raw, num_heads)
                             for i in range(batch)])

    # 1) single graph (matches the nn.Module forward signature: (S, input_dim))
    out_single = jax.block_until_ready(
        graph_transformer_forward_single(xb[0], params, output_dim))
    assert out_single.shape == (seq_len, output_dim)
    # tolerance covers the approx-reciprocal softmax denominator (EUP fast path)
    assert jnp.allclose(out_single, ref_batched[0], rtol=1e-2, atol=1e-2), \
        "single-graph mismatch vs reference"

    # 2) batched graphs, whole batch folded into ONE fused grid step
    out_b1 = jax.block_until_ready(
        graph_transformer_forward(xb, params, output_dim))
    assert out_b1.shape == (batch, seq_len, output_dim)
    assert jnp.allclose(out_b1, ref_batched, rtol=1e-2, atol=1e-2), \
        "batched (num_blocks=1) mismatch vs reference"

    # 3) v7x-style 2-block grid (one block per TensorCore); correct on any TPU
    out_b2 = jax.block_until_ready(
        graph_transformer_forward(xb, params, output_dim, num_blocks=2))
    assert jnp.allclose(out_b2, ref_batched, rtol=1e-2, atol=1e-2), \
        "batched (num_blocks=2) mismatch vs reference"

    # 4) bf16 MXU operands (v5e/v6e/v7x); f32 accumulation, LN, softmax
    params_bf16 = cast_matmul_weights(params, jnp.bfloat16)
    out_bf16 = jax.block_until_ready(
        graph_transformer_forward(xb, params_bf16, output_dim))
    assert jnp.allclose(out_bf16, ref_batched, rtol=5e-2, atol=5e-2), \
        "bf16 mismatch vs f32 reference"

    # 5) lane-padded output path (skips the trailing slice for fused consumers)
    out_padded = jax.block_until_ready(
        graph_transformer_forward(xb, params, output_dim, return_padded=True))
    assert out_padded.shape == (batch, seq_len, OUT_PAD)
    assert jnp.allclose(out_padded[:, :, :output_dim], ref_batched,
                        rtol=1e-2, atol=1e-2), "padded-output mismatch"

    print("KERNEL_OK")
</pallas_src>

<mosaic_0001>
module attributes {stable_mosaic.version = 11 : i64} {
  func.func @graph_transformer_kernel(%arg0: i32, %arg1: memref<1x8x16xf32, #tpu.memory_space<vmem>>, %arg2: memref<16x32xf32, #tpu.memory_space<vmem>>, %arg3: memref<16x32xf32, #tpu.memory_space<vmem>>, %arg4: memref<2x4x32x8xf32, #tpu.memory_space<vmem>>, %arg5: memref<2x4x1x8xf32, #tpu.memory_space<vmem>>, %arg6: memref<2x4x32x8xf32, #tpu.memory_space<vmem>>, %arg7: memref<2x4x1x8xf32, #tpu.memory_space<vmem>>, %arg8: memref<2x4x32x8xf32, #tpu.memory_space<vmem>>, %arg9: memref<2x4x1x8xf32, #tpu.memory_space<vmem>>, %arg10: memref<2x4x8x32xf32, #tpu.memory_space<vmem>>, %arg11: memref<2x1x32xf32, #tpu.memory_space<vmem>>, %arg12: memref<2x1x32xf32, #tpu.memory_space<vmem>>, %arg13: memref<2x1x32xf32, #tpu.memory_space<vmem>>, %arg14: memref<2x32x32xf32, #tpu.memory_space<vmem>>, %arg15: memref<2x1x32xf32, #tpu.memory_space<vmem>>, %arg16: memref<2x32x32xf32, #tpu.memory_space<vmem>>, %arg17: memref<2x1x32xf32, #tpu.memory_space<vmem>>, %arg18: memref<2x1x32xf32, #tpu.memory_space<vmem>>, %arg19: memref<2x1x32xf32, #tpu.memory_space<vmem>>, %arg20: memref<32x128xf32, #tpu.memory_space<vmem>>, %arg21: memref<1x128xf32, #tpu.memory_space<vmem>>, %arg22: memref<1x8x128xf32, #tpu.memory_space<vmem>>) attributes {dimension_semantics = [#tpu.dimension_semantics<parallel>], iteration_bounds = array<i64: 1>, scalar_prefetch = 0 : i64, scratch_operands = 0 : i64, tpu.core_type = #tpu.core_type<tc>, window_params = [{transform_indices = @transform_0, window_bounds = array<i64: 1, 8, 16>}, {pipeline_mode = #tpu.pipeline_mode<synchronous>, transform_indices = @transform_1, window_bounds = array<i64: 16, 32>}, {pipeline_mode = #tpu.pipeline_mode<synchronous>, transform_indices = @transform_2, window_bounds = array<i64: 16, 32>}, {pipeline_mode = #tpu.pipeline_mode<synchronous>, transform_indices = @transform_3, window_bounds = array<i64: 2, 4, 32, 8>}, {pipeline_mode = #tpu.pipeline_mode<synchronous>, transform_indices = @transform_4, window_bounds = array<i64: 2, 4, 1, 8>}, {pipeline_mode = #tpu.pipeline_mode<synchronous>, transform_indices = @transform_5, window_bounds = array<i64: 2, 4, 32, 8>}, {pipeline_mode = #tpu.pipeline_mode<synchronous>, transform_indices = @transform_6, window_bounds = array<i64: 2, 4, 1, 8>}, {pipeline_mode = #tpu.pipeline_mode<synchronous>, transform_indices = @transform_7, window_bounds = array<i64: 2, 4, 32, 8>}, {pipeline_mode = #tpu.pipeline_mode<synchronous>, transform_indices = @transform_8, window_bounds = array<i64: 2, 4, 1, 8>}, {pipeline_mode = #tpu.pipeline_mode<synchronous>, transform_indices = @transform_9, window_bounds = array<i64: 2, 4, 8, 32>}, {pipeline_mode = #tpu.pipeline_mode<synchronous>, transform_indices = @transform_10, window_bounds = array<i64: 2, 1, 32>}, {pipeline_mode = #tpu.pipeline_mode<synchronous>, transform_indices = @transform_11, window_bounds = array<i64: 2, 1, 32>}, {pipeline_mode = #tpu.pipeline_mode<synchronous>, transform_indices = @transform_12, window_bounds = array<i64: 2, 1, 32>}, {pipeline_mode = #tpu.pipeline_mode<synchronous>, transform_indices = @transform_13, window_bounds = array<i64: 2, 32, 32>}, {pipeline_mode = #tpu.pipeline_mode<synchronous>, transform_indices = @transform_14, window_bounds = array<i64: 2, 1, 32>}, {pipeline_mode = #tpu.pipeline_mode<synchronous>, transform_indices = @transform_15, window_bounds = array<i64: 2, 32, 32>}, {pipeline_mode = #tpu.pipeline_mode<synchronous>, transform_indices = @transform_16, window_bounds = array<i64: 2, 1, 32>}, {pipeline_mode = #tpu.pipeline_mode<synchronous>, transform_indices = @transform_17, window_bounds = array<i64: 2, 1, 32>}, {pipeline_mode = #tpu.pipeline_mode<synchronous>, transform_indices = @transform_18, window_bounds = array<i64: 2, 1, 32>}, {pipeline_mode = #tpu.pipeline_mode<synchronous>, transform_indices = @transform_19, window_bounds = array<i64: 32, 128>}, {pipeline_mode = #tpu.pipeline_mode<synchronous>, transform_indices = @transform_20, window_bounds = array<i64: 1, 128>}, {transform_indices = @transform_21, window_bounds = array<i64: 1, 8, 128>}]} {
    %c0 = arith.constant 0 : index
    %c0_0 = arith.constant 0 : index
    %c0_1 = arith.constant 0 : index
    %0 = vector.load %arg1[%c0, %c0_0, %c0_1] : memref<1x8x16xf32, #tpu.memory_space<vmem>>, vector<1x8x16xf32>
    %1 = vector.shape_cast %0 : vector<1x8x16xf32> to vector<8x16xf32>
    %c0_2 = arith.constant 0 : index
    %c0_3 = arith.constant 0 : index
    %2 = vector.load %arg3[%c0_2, %c0_3] : memref<16x32xf32, #tpu.memory_space<vmem>>, vector<16x32xf32>
    %cst = arith.constant dense<0.000000e+00> : vector<8x32xf32>
    %3 = tpu.matmul %1, %2, %cst {dimension_numbers = #tpu.dot_dimension_numbers<[1], [0], [0], [1], [0, 0, 1, 1], [], []>} : vector<8x16xf32>, vector<16x32xf32>, vector<8x32xf32> -> vector<8x32xf32>
    %4 = vector.shape_cast %3 : vector<8x32xf32> to vector<1x8x32xf32>
    %c0_4 = arith.constant 0 : index
    %c0_5 = arith.constant 0 : index
    %5 = vector.load %arg2[%c0_4, %c0_5] : memref<16x32xf32, #tpu.memory_space<vmem>>, vector<8x32xf32>
    %6 = vector.shape_cast %5 : vector<8x32xf32> to vector<1x8x32xf32>
    %7 = arith.addf %4, %6 : vector<1x8x32xf32>
    %8 = vector.shape_cast %7 : vector<1x8x32xf32> to vector<8x32xf32>
    %c0_6 = arith.constant 0 : index
    %c0_7 = arith.constant 0 : index
    %c0_8 = arith.constant 0 : index
    %9 = vector.load %arg11[%c0_6, %c0_7, %c0_8] : memref<2x1x32xf32, #tpu.memory_space<vmem>>, vector<1x1x32xf32>
    %10 = vector.shape_cast %9 : vector<1x1x32xf32> to vector<1x32xf32>
    %11 = vector.shape_cast %10 : vector<1x32xf32> to vector<1x32xf32>
    %12 = vector.broadcast %11 : vector<1x32xf32> to vector<8x32xf32>
    %c0_9 = arith.constant 0 : index
    %c0_10 = arith.constant 0 : index
    %c0_11 = arith.constant 0 : index
    %c0_12 = arith.constant 0 : index
    %13 = vector.load %arg4[%c0_9, %c0_10, %c0_11, %c0_12] : memref<2x4x32x8xf32, #tpu.memory_space<vmem>>, vector<1x1x32x8xf32>
    %14 = vector.shape_cast %13 : vector<1x1x32x8xf32> to vector<32x8xf32>
    %cst_13 = arith.constant dense<0.000000e+00> : vector<8x8xf32>
    %15 = tpu.matmul %8, %14, %cst_13 {dimension_numbers = #tpu.dot_dimension_numbers<[1], [0], [0], [1], [0, 0, 1, 1], [], []>} : vector<8x32xf32>, vector<32x8xf32>, vector<8x8xf32> -> vector<8x8xf32>
    %c0_14 = arith.constant 0 : index
    %c0_15 = arith.constant 0 : index
    %c0_16 = arith.constant 0 : index
    %c0_17 = arith.constant 0 : index
    %16 = vector.load %arg5[%c0_14, %c0_15, %c0_16, %c0_17] : memref<2x4x1x8xf32, #tpu.memory_space<vmem>>, vector<1x1x1x8xf32>
    %17 = vector.shape_cast %16 : vector<1x1x1x8xf32> to vector<1x8xf32>
    %18 = vector.broadcast %17 : vector<1x8xf32> to vector<8x8xf32>
    %19 = arith.addf %15, %18 : vector<8x8xf32>
    %c0_18 = arith.constant 0 : index
    %c0_19 = arith.constant 0 : index
    %c0_20 = arith.constant 0 : index
    %c0_21 = arith.constant 0 : index
    %20 = vector.load %arg6[%c0_18, %c0_19, %c0_20, %c0_21] : memref<2x4x32x8xf32, #tpu.memory_space<vmem>>, vector<1x1x32x8xf32>
    %21 = vector.shape_cast %20 : vector<1x1x32x8xf32> to vector<32x8xf32>
    %cst_22 = arith.constant dense<0.000000e+00> : vector<8x8xf32>
    %22 = tpu.matmul %8, %21, %cst_22 {dimension_numbers = #tpu.dot_dimension_numbers<[1], [0], [0], [1], [0, 0, 1, 1], [], []>} : vector<8x32xf32>, vector<32x8xf32>, vector<8x8xf32> -> vector<8x8xf32>
    %c0_23 = arith.constant 0 : index
    %c0_24 = arith.constant 0 : index
    %c0_25 = arith.constant 0 : index
    %c0_26 = arith.constant 0 : index
    %23 = vector.load %arg7[%c0_23, %c0_24, %c0_25, %c0_26] : memref<2x4x1x8xf32, #tpu.memory_space<vmem>>, vector<1x1x1x8xf32>
    %24 = vector.shape_cast %23 : vector<1x1x1x8xf32> to vector<1x8xf32>
    %25 = vector.broadcast %24 : vector<1x8xf32> to vector<8x8xf32>
    %26 = arith.addf %22, %25 : vector<8x8xf32>
    %c0_27 = arith.constant 0 : index
    %c0_28 = arith.constant 0 : index
    %c0_29 = arith.constant 0 : index
    %c0_30 = arith.constant 0 : index
    %27 = vector.load %arg8[%c0_27, %c0_28, %c0_29, %c0_30] : memref<2x4x32x8xf32, #tpu.memory_space<vmem>>, vector<1x1x32x8xf32>
    %28 = vector.shape_cast %27 : vector<1x1x32x8xf32> to vector<32x8xf32>
    %cst_31 = arith.constant dense<0.000000e+00> : vector<8x8xf32>
    %29 = tpu.matmul %8, %28, %cst_31 {dimension_numbers = #tpu.dot_dimension_numbers<[1], [0], [0], [1], [0, 0, 1, 1], [], []>} : vector<8x32xf32>, vector<32x8xf32>, vector<8x8xf32> -> vector<8x8xf32>
    %c0_32 = arith.constant 0 : index
    %c0_33 = arith.constant 0 : index
    %c0_34 = arith.constant 0 : index
    %c0_35 = arith.constant 0 : index
    %30 = vector.load %arg9[%c0_32, %c0_33, %c0_34, %c0_35] : memref<2x4x1x8xf32, #tpu.memory_space<vmem>>, vector<1x1x1x8xf32>
    %31 = vector.shape_cast %30 : vector<1x1x1x8xf32> to vector<1x8xf32>
    %32 = vector.broadcast %31 : vector<1x8xf32> to vector<8x8xf32>
    %33 = arith.addf %29, %32 : vector<8x8xf32>
    %34 = vector.shape_cast %19 : vector<8x8xf32> to vector<1x8x8xf32>
    %35 = vector.shape_cast %26 : vector<8x8xf32> to vector<1x8x8xf32>
    %36 = vector.shape_cast %33 : vector<8x8xf32> to vector<1x8x8xf32>
    "tpu.trace_start"() <{level = 10 : i32, message = "bqd,bkd->bqk"}> : () -> ()
    %cst_36 = arith.constant dense<0.000000e+00> : vector<1x8x8xf32>
    %37 = tpu.matmul %34, %35, %cst_36 {dimension_numbers = #tpu.dot_dimension_numbers<[2], [2], [1], [1], [0, 0, 0, 1, 1, 1], [0], [0]>} : vector<1x8x8xf32>, vector<1x8x8xf32>, vector<1x8x8xf32> -> vector<1x8x8xf32>
    "tpu.trace_stop"() : () -> ()
    %cst_37 = arith.constant dense<0xFF800000> : vector<1x8xf32>
    %38 = vector.multi_reduction <maximumf>, %37, %cst_37 [2] : vector<1x8x8xf32> to vector<1x8xf32>
    %39 = vector.shape_cast %38 : vector<1x8xf32> to vector<1x8x1xf32>
    %40 = vector.broadcast %39 : vector<1x8x1xf32> to vector<1x8x8xf32>
    %41 = arith.subf %37, %40 : vector<1x8x8xf32>
    %42 = math.exp %41 : vector<1x8x8xf32>
    %cst_38 = arith.constant dense<0.000000e+00> : vector<1x8xf32>
    %43 = vector.multi_reduction <add>, %42, %cst_38 [2] : vector<1x8x8xf32> to vector<1x8xf32>
    %44 = vector.shape_cast %43 : vector<1x8xf32> to vector<1x8x1xf32>
    %45 = tpu.reciprocal %44 {approx = true} : vector<1x8x1xf32> -> vector<1x8x1xf32>
    %46 = vector.broadcast %45 : vector<1x8x1xf32> to vector<1x8x8xf32>
    %47 = arith.mulf %42, %46 : vector<1x8x8xf32>
    "tpu.trace_start"() <{level = 10 : i32, message = "bqk,bkd->bqd"}> : () -> ()
    %cst_39 = arith.constant dense<0.000000e+00> : vector<1x8x8xf32>
    %48 = tpu.matmul %47, %36, %cst_39 {dimension_numbers = #tpu.dot_dimension_numbers<[2], [1], [1], [2], [0, 0, 0, 1, 1, 2], [0], [0]>} : vector<1x8x8xf32>, vector<1x8x8xf32>, vector<1x8x8xf32> -> vector<1x8x8xf32>
    "tpu.trace_stop"() : () -> ()
    %49 = vector.shape_cast %48 : vector<1x8x8xf32> to vector<8x8xf32>
    %c0_40 = arith.constant 0 : index
    %c0_41 = arith.constant 0 : index
    %c0_42 = arith.constant 0 : index
    %c0_43 = arith.constant 0 : index
    %50 = vector.load %arg10[%c0_40, %c0_41, %c0_42, %c0_43] : memref<2x4x8x32xf32, #tpu.memory_space<vmem>>, vector<1x1x8x32xf32>
    %51 = vector.shape_cast %50 : vector<1x1x8x32xf32> to vector<8x32xf32>
    %cst_44 = arith.constant dense<0.000000e+00> : vector<8x32xf32>
    %52 = tpu.matmul %49, %51, %cst_44 {dimension_numbers = #tpu.dot_dimension_numbers<[1], [0], [0], [1], [0, 0, 1, 1], [], []>} : vector<8x8xf32>, vector<8x32xf32>, vector<8x32xf32> -> vector<8x32xf32>
    %53 = arith.addf %12, %52 : vector<8x32xf32>
    %c0_45 = arith.constant 0 : index
    %c1 = arith.constant 1 : index
    %c0_46 = arith.constant 0 : index
    %c0_47 = arith.constant 0 : index
    %54 = vector.load %arg4[%c0_45, %c1, %c0_46, %c0_47] : memref<2x4x32x8xf32, #tpu.memory_space<vmem>>, vector<1x1x32x8xf32>
    %55 = vector.shape_cast %54 : vector<1x1x32x8xf32> to vector<32x8xf32>
    %cst_48 = arith.constant dense<0.000000e+00> : vector<8x8xf32>
    %56 = tpu.matmul %8, %55, %cst_48 {dimension_numbers = #tpu.dot_dimension_numbers<[1], [0], [0], [1], [0, 0, 1, 1], [], []>} : vector<8x32xf32>, vector<32x8xf32>, vector<8x8xf32> -> vector<8x8xf32>
    %c0_49 = arith.constant 0 : index
    %c1_50 = arith.constant 1 : index
    %c0_51 = arith.constant 0 : index
    %c0_52 = arith.constant 0 : index
    %57 = vector.load %arg5[%c0_49, %c1_50, %c0_51, %c0_52] : memref<2x4x1x8xf32, #tpu.memory_space<vmem>>, vector<1x1x1x8xf32>
    %58 = vector.shape_cast %57 : vector<1x1x1x8xf32> to vector<1x8xf32>
    %59 = vector.broadcast %58 : vector<1x8xf32> to vector<8x8xf32>
    %60 = arith.addf %56, %59 : vector<8x8xf32>
    %c0_53 = arith.constant 0 : index
    %c1_54 = arith.constant 1 : index
    %c0_55 = arith.constant 0 : index
    %c0_56 = arith.constant 0 : index
    %61 = vector.load %arg6[%c0_53, %c1_54, %c0_55, %c0_56] : memref<2x4x32x8xf32, #tpu.memory_space<vmem>>, vector<1x1x32x8xf32>
    %62 = vector.shape_cast %61 : vector<1x1x32x8xf32> to vector<32x8xf32>
    %cst_57 = arith.constant dense<0.000000e+00> : vector<8x8xf32>
    %63 = tpu.matmul %8, %62, %cst_57 {dimension_numbers = #tpu.dot_dimension_numbers<[1], [0], [0], [1], [0, 0, 1, 1], [], []>} : vector<8x32xf32>, vector<32x8xf32>, vector<8x8xf32> -> vector<8x8xf32>
    %c0_58 = arith.constant 0 : index
    %c1_59 = arith.constant 1 : index
    %c0_60 = arith.constant 0 : index
    %c0_61 = arith.constant 0 : index
    %64 = vector.load %arg7[%c0_58, %c1_59, %c0_60, %c0_61] : memref<2x4x1x8xf32, #tpu.memory_space<vmem>>, vector<1x1x1x8xf32>
    %65 = vector.shape_cast %64 : vector<1x1x1x8xf32> to vector<1x8xf32>
    %66 = vector.broadcast %65 : vector<1x8xf32> to vector<8x8xf32>
    %67 = arith.addf %63, %66 : vector<8x8xf32>
    %c0_62 = arith.constant 0 : index
    %c1_63 = arith.constant 1 : index
    %c0_64 = arith.constant 0 : index
    %c0_65 = arith.constant 0 : index
    %68 = vector.load %arg8[%c0_62, %c1_63, %c0_64, %c0_65] : memref<2x4x32x8xf32, #tpu.memory_space<vmem>>, vector<1x1x32x8xf32>
    %69 = vector.shape_cast %68 : vector<1x1x32x8xf32> to vector<32x8xf32>
    %cst_66 = arith.constant dense<0.000000e+00> : vector<8x8xf32>
    %70 = tpu.matmul %8, %69, %cst_66 {dimension_numbers = #tpu.dot_dimension_numbers<[1], [0], [0], [1], [0, 0, 1, 1], [], []>} : vector<8x32xf32>, vector<32x8xf32>, vector<8x8xf32> -> vector<8x8xf32>
    %c0_67 = arith.constant 0 : index
    %c1_68 = arith.constant 1 : index
    %c0_69 = arith.constant 0 : index
    %c0_70 = arith.constant 0 : index
    %71 = vector.load %arg9[%c0_67, %c1_68, %c0_69, %c0_70] : memref<2x4x1x8xf32, #tpu.memory_space<vmem>>, vector<1x1x1x8xf32>
    %72 = vector.shape_cast %71 : vector<1x1x1x8xf32> to vector<1x8xf32>
    %73 = vector.broadcast %72 : vector<1x8xf32> to vector<8x8xf32>
    %74 = arith.addf %70, %73 : vector<8x8xf32>
    %75 = vector.shape_cast %60 : vector<8x8xf32> to vector<1x8x8xf32>
    %76 = vector.shape_cast %67 : vector<8x8xf32> to vector<1x8x8xf32>
    %77 = vector.shape_cast %74 : vector<8x8xf32> to vector<1x8x8xf32>
    "tpu.trace_start"() <{level = 10 : i32, message = "bqd,bkd->bqk"}> : () -> ()
    %cst_71 = arith.constant dense<0.000000e+00> : vector<1x8x8xf32>
    %78 = tpu.matmul %75, %76, %cst_71 {dimension_numbers = #tpu.dot_dimension_numbers<[2], [2], [1], [1], [0, 0, 0, 1, 1, 1], [0], [0]>} : vector<1x8x8xf32>, vector<1x8x8xf32>, vector<1x8x8xf32> -> vector<1x8x8xf32>
    "tpu.trace_stop"() : () -> ()
    %cst_72 = arith.constant dense<0xFF800000> : vector<1x8xf32>
    %79 = vector.multi_reduction <maximumf>, %78, %cst_72 [2] : vector<1x8x8xf32> to vector<1x8xf32>
    %80 = vector.shape_cast %79 : vector<1x8xf32> to vector<1x8x1xf32>
    %81 = vector.broadcast %80 : vector<1x8x1xf32> to vector<1x8x8xf32>
    %82 = arith.subf %78, %81 : vector<1x8x8xf32>
    %83 = math.exp %82 : vector<1x8x8xf32>
    %cst_73 = arith.constant dense<0.000000e+00> : vector<1x8xf32>
    %84 = vector.multi_reduction <add>, %83, %cst_73 [2] : vector<1x8x8xf32> to vector<1x8xf32>
    %85 = vector.shape_cast %84 : vector<1x8xf32> to vector<1x8x1xf32>
    %86 = tpu.reciprocal %85 {approx = true} : vector<1x8x1xf32> -> vector<1x8x1xf32>
    %87 = vector.broadcast %86 : vector<1x8x1xf32> to vector<1x8x8xf32>
    %88 = arith.mulf %83, %87 : vector<1x8x8xf32>
    "tpu.trace_start"() <{level = 10 : i32, message = "bqk,bkd->bqd"}> : () -> ()
    %cst_74 = arith.constant dense<0.000000e+00> : vector<1x8x8xf32>
    %89 = tpu.matmul %88, %77, %cst_74 {dimension_numbers = #tpu.dot_dimension_numbers<[2], [1], [1], [2], [0, 0, 0, 1, 1, 2], [0], [0]>} : vector<1x8x8xf32>, vector<1x8x8xf32>, vector<1x8x8xf32> -> vector<1x8x8xf32>
    "tpu.trace_stop"() : () -> ()
    %90 = vector.shape_cast %89 : vector<1x8x8xf32> to vector<8x8xf32>
    %c0_75 = arith.constant 0 : index
    %c1_76 = arith.constant 1 : index
    %c0_77 = arith.constant 0 : index
    %c0_78 = arith.constant 0 : index
    %91 = vector.load %arg10[%c0_75, %c1_76, %c0_77, %c0_78] : memref<2x4x8x32xf32, #tpu.memory_space<vmem>>, vector<1x1x8x32xf32>
    %92 = vector.shape_cast %91 : vector<1x1x8x32xf32> to vector<8x32xf32>
    %cst_79 = arith.constant dense<0.000000e+00> : vector<8x32xf32>
    %93 = tpu.matmul %90, %92, %cst_79 {dimension_numbers = #tpu.dot_dimension_numbers<[1], [0], [0], [1], [0, 0, 1, 1], [], []>} : vector<8x8xf32>, vector<8x32xf32>, vector<8x32xf32> -> vector<8x32xf32>
    %94 = arith.addf %53, %93 : vector<8x32xf32>
    %c0_80 = arith.constant 0 : index
    %c2 = arith.constant 2 : index
    %c0_81 = arith.constant 0 : index
    %c0_82 = arith.constant 0 : index
    %95 = vector.load %arg4[%c0_80, %c2, %c0_81, %c0_82] : memref<2x4x32x8xf32, #tpu.memory_space<vmem>>, vector<1x1x32x8xf32>
    %96 = vector.shape_cast %95 : vector<1x1x32x8xf32> to vector<32x8xf32>
    %cst_83 = arith.constant dense<0.000000e+00> : vector<8x8xf32>
    %97 = tpu.matmul %8, %96, %cst_83 {dimension_numbers = #tpu.dot_dimension_numbers<[1], [0], [0], [1], [0, 0, 1, 1], [], []>} : vector<8x32xf32>, vector<32x8xf32>, vector<8x8xf32> -> vector<8x8xf32>
    %c0_84 = arith.constant 0 : index
    %c2_85 = arith.constant 2 : index
    %c0_86 = arith.constant 0 : index
    %c0_87 = arith.constant 0 : index
    %98 = vector.load %arg5[%c0_84, %c2_85, %c0_86, %c0_87] : memref<2x4x1x8xf32, #tpu.memory_space<vmem>>, vector<1x1x1x8xf32>
    %99 = vector.shape_cast %98 : vector<1x1x1x8xf32> to vector<1x8xf32>
    %100 = vector.broadcast %99 : vector<1x8xf32> to vector<8x8xf32>
    %101 = arith.addf %97, %100 : vector<8x8xf32>
    %c0_88 = arith.constant 0 : index
    %c2_89 = arith.constant 2 : index
    %c0_90 = arith.constant 0 : index
    %c0_91 = arith.constant 0 : index
    %102 = vector.load %arg6[%c0_88, %c2_89, %c0_90, %c0_91] : memref<2x4x32x8xf32, #tpu.memory_space<vmem>>, vector<1x1x32x8xf32>
    %103 = vector.shape_cast %102 : vector<1x1x32x8xf32> to vector<32x8xf32>
    %cst_92 = arith.constant dense<0.000000e+00> : vector<8x8xf32>
    %104 = tpu.matmul %8, %103, %cst_92 {dimension_numbers = #tpu.dot_dimension_numbers<[1], [0], [0], [1], [0, 0, 1, 1], [], []>} : vector<8x32xf32>, vector<32x8xf32>, vector<8x8xf32> -> vector<8x8xf32>
    %c0_93 = arith.constant 0 : index
    %c2_94 = arith.constant 2 : index
    %c0_95 = arith.constant 0 : index
    %c0_96 = arith.constant 0 : index
    %105 = vector.load %arg7[%c0_93, %c2_94, %c0_95, %c0_96] : memref<2x4x1x8xf32, #tpu.memory_space<vmem>>, vector<1x1x1x8xf32>
    %106 = vector.shape_cast %105 : vector<1x1x1x8xf32> to vector<1x8xf32>
    %107 = vector.broadcast %106 : vector<1x8xf32> to vector<8x8xf32>
    %108 = arith.addf %104, %107 : vector<8x8xf32>
    %c0_97 = arith.constant 0 : index
    %c2_98 = arith.constant 2 : index
    %c0_99 = arith.constant 0 : index
    %c0_100 = arith.constant 0 : index
    %109 = vector.load %arg8[%c0_97, %c2_98, %c0_99, %c0_100] : memref<2x4x32x8xf32, #tpu.memory_space<vmem>>, vector<1x1x32x8xf32>
    %110 = vector.shape_cast %109 : vector<1x1x32x8xf32> to vector<32x8xf32>
    %cst_101 = arith.constant dense<0.000000e+00> : vector<8x8xf32>
    %111 = tpu.matmul %8, %110, %cst_101 {dimension_numbers = #tpu.dot_dimension_numbers<[1], [0], [0], [1], [0, 0, 1, 1], [], []>} : vector<8x32xf32>, vector<32x8xf32>, vector<8x8xf32> -> vector<8x8xf32>
    %c0_102 = arith.constant 0 : index
    %c2_103 = arith.constant 2 : index
    %c0_104 = arith.constant 0 : index
    %c0_105 = arith.constant 0 : index
    %112 = vector.load %arg9[%c0_102, %c2_103, %c0_104, %c0_105] : memref<2x4x1x8xf32, #tpu.memory_space<vmem>>, vector<1x1x1x8xf32>
    %113 = vector.shape_cast %112 : vector<1x1x1x8xf32> to vector<1x8xf32>
    %114 = vector.broadcast %113 : vector<1x8xf32> to vector<8x8xf32>
    %115 = arith.addf %111, %114 : vector<8x8xf32>
    %116 = vector.shape_cast %101 : vector<8x8xf32> to vector<1x8x8xf32>
    %117 = vector.shape_cast %108 : vector<8x8xf32> to vector<1x8x8xf32>
    %118 = vector.shape_cast %115 : vector<8x8xf32> to vector<1x8x8xf32>
    "tpu.trace_start"() <{level = 10 : i32, message = "bqd,bkd->bqk"}> : () -> ()
    %cst_106 = arith.constant dense<0.000000e+00> : vector<1x8x8xf32>
    %119 = tpu.matmul %116, %117, %cst_106 {dimension_numbers = #tpu.dot_dimension_numbers<[2], [2], [1], [1], [0, 0, 0, 1, 1, 1], [0], [0]>} : vector<1x8x8xf32>, vector<1x8x8xf32>, vector<1x8x8xf32> -> vector<1x8x8xf32>
    "tpu.trace_stop"() : () -> ()
    %cst_107 = arith.constant dense<0xFF800000> : vector<1x8xf32>
    %120 = vector.multi_reduction <maximumf>, %119, %cst_107 [2] : vector<1x8x8xf32> to vector<1x8xf32>
    %121 = vector.shape_cast %120 : vector<1x8xf32> to vector<1x8x1xf32>
    %122 = vector.broadcast %121 : vector<1x8x1xf32> to vector<1x8x8xf32>
    %123 = arith.subf %119, %122 : vector<1x8x8xf32>
    %124 = math.exp %123 : vector<1x8x8xf32>
    %cst_108 = arith.constant dense<0.000000e+00> : vector<1x8xf32>
    %125 = vector.multi_reduction <add>, %124, %cst_108 [2] : vector<1x8x8xf32> to vector<1x8xf32>
    %126 = vector.shape_cast %125 : vector<1x8xf32> to vector<1x8x1xf32>
    %127 = tpu.reciprocal %126 {approx = true} : vector<1x8x1xf32> -> vector<1x8x1xf32>
    %128 = vector.broadcast %127 : vector<1x8x1xf32> to vector<1x8x8xf32>
    %129 = arith.mulf %124, %128 : vector<1x8x8xf32>
    "tpu.trace_start"() <{level = 10 : i32, message = "bqk,bkd->bqd"}> : () -> ()
    %cst_109 = arith.constant dense<0.000000e+00> : vector<1x8x8xf32>
    %130 = tpu.matmul %129, %118, %cst_109 {dimension_numbers = #tpu.dot_dimension_numbers<[2], [1], [1], [2], [0, 0, 0, 1, 1, 2], [0], [0]>} : vector<1x8x8xf32>, vector<1x8x8xf32>, vector<1x8x8xf32> -> vector<1x8x8xf32>
    "tpu.trace_stop"() : () -> ()
    %131 = vector.shape_cast %130 : vector<1x8x8xf32> to vector<8x8xf32>
    %c0_110 = arith.constant 0 : index
    %c2_111 = arith.constant 2 : index
    %c0_112 = arith.constant 0 : index
    %c0_113 = arith.constant 0 : index
    %132 = vector.load %arg10[%c0_110, %c2_111, %c0_112, %c0_113] : memref<2x4x8x32xf32, #tpu.memory_space<vmem>>, vector<1x1x8x32xf32>
    %133 = vector.shape_cast %132 : vector<1x1x8x32xf32> to vector<8x32xf32>
    %cst_114 = arith.constant dense<0.000000e+00> : vector<8x32xf32>
    %134 = tpu.matmul %131, %133, %cst_114 {dimension_numbers = #tpu.dot_dimension_numbers<[1], [0], [0], [1], [0, 0, 1, 1], [], []>} : vector<8x8xf32>, vector<8x32xf32>, vector<8x32xf32> -> vector<8x32xf32>
    %135 = arith.addf %94, %134 : vector<8x32xf32>
    %c0_115 = arith.constant 0 : index
    %c3 = arith.constant 3 : index
    %c0_116 = arith.constant 0 : index
    %c0_117 = arith.constant 0 : index
    %136 = vector.load %arg4[%c0_115, %c3, %c0_116, %c0_117] : memref<2x4x32x8xf32, #tpu.memory_space<vmem>>, vector<1x1x32x8xf32>
    %137 = vector.shape_cast %136 : vector<1x1x32x8xf32> to vector<32x8xf32>
    %cst_118 = arith.constant dense<0.000000e+00> : vector<8x8xf32>
    %138 = tpu.matmul %8, %137, %cst_118 {dimension_numbers = #tpu.dot_dimension_numbers<[1], [0], [0], [1], [0, 0, 1, 1], [], []>} : vector<8x32xf32>, vector<32x8xf32>, vector<8x8xf32> -> vector<8x8xf32>
    %c0_119 = arith.constant 0 : index
    %c3_120 = arith.constant 3 : index
    %c0_121 = arith.constant 0 : index
    %c0_122 = arith.constant 0 : index
    %139 = vector.load %arg5[%c0_119, %c3_120, %c0_121, %c0_122] : memref<2x4x1x8xf32, #tpu.memory_space<vmem>>, vector<1x1x1x8xf32>
    %140 = vector.shape_cast %139 : vector<1x1x1x8xf32> to vector<1x8xf32>
    %141 = vector.broadcast %140 : vector<1x8xf32> to vector<8x8xf32>
    %142 = arith.addf %138, %141 : vector<8x8xf32>
    %c0_123 = arith.constant 0 : index
    %c3_124 = arith.constant 3 : index
    %c0_125 = arith.constant 0 : index
    %c0_126 = arith.constant 0 : index
    %143 = vector.load %arg6[%c0_123, %c3_124, %c0_125, %c0_126] : memref<2x4x32x8xf32, #tpu.memory_space<vmem>>, vector<1x1x32x8xf32>
    %144 = vector.shape_cast %143 : vector<1x1x32x8xf32> to vector<32x8xf32>
    %cst_127 = arith.constant dense<0.000000e+00> : vector<8x8xf32>
    %145 = tpu.matmul %8, %144, %cst_127 {dimension_numbers = #tpu.dot_dimension_numbers<[1], [0], [0], [1], [0, 0, 1, 1], [], []>} : vector<8x32xf32>, vector<32x8xf32>, vector<8x8xf32> -> vector<8x8xf32>
    %c0_128 = arith.constant 0 : index
    %c3_129 = arith.constant 3 : index
    %c0_130 = arith.constant 0 : index
    %c0_131 = arith.constant 0 : index
    %146 = vector.load %arg7[%c0_128, %c3_129, %c0_130, %c0_131] : memref<2x4x1x8xf32, #tpu.memory_space<vmem>>, vector<1x1x1x8xf32>
    %147 = vector.shape_cast %146 : vector<1x1x1x8xf32> to vector<1x8xf32>
    %148 = vector.broadcast %147 : vector<1x8xf32> to vector<8x8xf32>
    %149 = arith.addf %145, %148 : vector<8x8xf32>
    %c0_132 = arith.constant 0 : index
    %c3_133 = arith.constant 3 : index
    %c0_134 = arith.constant 0 : index
    %c0_135 = arith.constant 0 : index
    %150 = vector.load %arg8[%c0_132, %c3_133, %c0_134, %c0_135] : memref<2x4x32x8xf32, #tpu.memory_space<vmem>>, vector<1x1x32x8xf32>
    %151 = vector.shape_cast %150 : vector<1x1x32x8xf32> to vector<32x8xf32>
    %cst_136 = arith.constant dense<0.000000e+00> : vector<8x8xf32>
    %152 = tpu.matmul %8, %151, %cst_136 {dimension_numbers = #tpu.dot_dimension_numbers<[1], [0], [0], [1], [0, 0, 1, 1], [], []>} : vector<8x32xf32>, vector<32x8xf32>, vector<8x8xf32> -> vector<8x8xf32>
    %c0_137 = arith.constant 0 : index
    %c3_138 = arith.constant 3 : index
    %c0_139 = arith.constant 0 : index
    %c0_140 = arith.constant 0 : index
    %153 = vector.load %arg9[%c0_137, %c3_138, %c0_139, %c0_140] : memref<2x4x1x8xf32, #tpu.memory_space<vmem>>, vector<1x1x1x8xf32>
    %154 = vector.shape_cast %153 : vector<1x1x1x8xf32> to vector<1x8xf32>
    %155 = vector.broadcast %154 : vector<1x8xf32> to vector<8x8xf32>
    %156 = arith.addf %152, %155 : vector<8x8xf32>
    %157 = vector.shape_cast %142 : vector<8x8xf32> to vector<1x8x8xf32>
    %158 = vector.shape_cast %149 : vector<8x8xf32> to vector<1x8x8xf32>
    %159 = vector.shape_cast %156 : vector<8x8xf32> to vector<1x8x8xf32>
    "tpu.trace_start"() <{level = 10 : i32, message = "bqd,bkd->bqk"}> : () -> ()
    %cst_141 = arith.constant dense<0.000000e+00> : vector<1x8x8xf32>
    %160 = tpu.matmul %157, %158, %cst_141 {dimension_numbers = #tpu.dot_dimension_numbers<[2], [2], [1], [1], [0, 0, 0, 1, 1, 1], [0], [0]>} : vector<1x8x8xf32>, vector<1x8x8xf32>, vector<1x8x8xf32> -> vector<1x8x8xf32>
    "tpu.trace_stop"() : () -> ()
    %cst_142 = arith.constant dense<0xFF800000> : vector<1x8xf32>
    %161 = vector.multi_reduction <maximumf>, %160, %cst_142 [2] : vector<1x8x8xf32> to vector<1x8xf32>
    %162 = vector.shape_cast %161 : vector<1x8xf32> to vector<1x8x1xf32>
    %163 = vector.broadcast %162 : vector<1x8x1xf32> to vector<1x8x8xf32>
    %164 = arith.subf %160, %163 : vector<1x8x8xf32>
    %165 = math.exp %164 : vector<1x8x8xf32>
    %cst_143 = arith.constant dense<0.000000e+00> : vector<1x8xf32>
    %166 = vector.multi_reduction <add>, %165, %cst_143 [2] : vector<1x8x8xf32> to vector<1x8xf32>
    %167 = vector.shape_cast %166 : vector<1x8xf32> to vector<1x8x1xf32>
    %168 = tpu.reciprocal %167 {approx = true} : vector<1x8x1xf32> -> vector<1x8x1xf32>
    %169 = vector.broadcast %168 : vector<1x8x1xf32> to vector<1x8x8xf32>
    %170 = arith.mulf %165, %169 : vector<1x8x8xf32>
    "tpu.trace_start"() <{level = 10 : i32, message = "bqk,bkd->bqd"}> : () -> ()
    %cst_144 = arith.constant dense<0.000000e+00> : vector<1x8x8xf32>
    %171 = tpu.matmul %170, %159, %cst_144 {dimension_numbers = #tpu.dot_dimension_numbers<[2], [1], [1], [2], [0, 0, 0, 1, 1, 2], [0], [0]>} : vector<1x8x8xf32>, vector<1x8x8xf32>, vector<1x8x8xf32> -> vector<1x8x8xf32>
    "tpu.trace_stop"() : () -> ()
    %172 = vector.shape_cast %171 : vector<1x8x8xf32> to vector<8x8xf32>
    %c0_145 = arith.constant 0 : index
    %c3_146 = arith.constant 3 : index
    %c0_147 = arith.constant 0 : index
    %c0_148 = arith.constant 0 : index
    %173 = vector.load %arg10[%c0_145, %c3_146, %c0_147, %c0_148] : memref<2x4x8x32xf32, #tpu.memory_space<vmem>>, vector<1x1x8x32xf32>
    %174 = vector.shape_cast %173 : vector<1x1x8x32xf32> to vector<8x32xf32>
    %cst_149 = arith.constant dense<0.000000e+00> : vector<8x32xf32>
    %175 = tpu.matmul %172, %174, %cst_149 {dimension_numbers = #tpu.dot_dimension_numbers<[1], [0], [0], [1], [0, 0, 1, 1], [], []>} : vector<8x8xf32>, vector<8x32xf32>, vector<8x32xf32> -> vector<8x32xf32>
    %176 = arith.addf %135, %175 : vector<8x32xf32>
    %177 = arith.addf %8, %176 : vector<8x32xf32>
    %c0_150 = arith.constant 0 : index
    %c0_151 = arith.constant 0 : index
    %c0_152 = arith.constant 0 : index
    %178 = vector.load %arg12[%c0_150, %c0_151, %c0_152] : memref<2x1x32xf32, #tpu.memory_space<vmem>>, vector<1x1x32xf32>
    %179 = vector.shape_cast %178 : vector<1x1x32xf32> to vector<1x32xf32>
    %c0_153 = arith.constant 0 : index
    %c0_154 = arith.constant 0 : index
    %c0_155 = arith.constant 0 : index
    %180 = vector.load %arg13[%c0_153, %c0_154, %c0_155] : memref<2x1x32xf32, #tpu.memory_space<vmem>>, vector<1x1x32xf32>
    %181 = vector.shape_cast %180 : vector<1x1x32xf32> to vector<1x32xf32>
    %cst_156 = arith.constant dense<0.000000e+00> : vector<8xf32>
    %182 = vector.multi_reduction <add>, %177, %cst_156 [1] : vector<8x32xf32> to vector<8xf32>
    %183 = vector.shape_cast %182 : vector<8xf32> to vector<8x1xf32>
    %cst_157 = arith.constant 3.200000e+01 : f32
    %184 = vector.broadcast %cst_157 : f32 to vector<8x1xf32>
    %185 = arith.divf %183, %184 : vector<8x1xf32>
    %186 = vector.broadcast %185 : vector<8x1xf32> to vector<8x32xf32>
    %187 = arith.subf %177, %186 : vector<8x32xf32>
    %188 = arith.mulf %187, %187 : vector<8x32xf32>
    %cst_158 = arith.constant dense<0.000000e+00> : vector<8xf32>
    %189 = vector.multi_reduction <add>, %188, %cst_158 [1] : vector<8x32xf32> to vector<8xf32>
    %190 = vector.shape_cast %189 : vector<8xf32> to vector<8x1xf32>
    %cst_159 = arith.constant 3.200000e+01 : f32
    %191 = vector.broadcast %cst_159 : f32 to vector<8x1xf32>
    %192 = arith.divf %190, %191 : vector<8x1xf32>
    %193 = vector.broadcast %185 : vector<8x1xf32> to vector<8x32xf32>
    %194 = arith.subf %177, %193 : vector<8x32xf32>
    %cst_160 = arith.constant 9.99999974E-6 : f32
    %195 = vector.broadcast %cst_160 : f32 to vector<8x1xf32>
    %196 = arith.addf %192, %195 : vector<8x1xf32>
    %197 = math.rsqrt %196 : vector<8x1xf32>
    %198 = vector.broadcast %197 : vector<8x1xf32> to vector<8x32xf32>
    %199 = arith.mulf %194, %198 : vector<8x32xf32>
    %200 = vector.broadcast %179 : vector<1x32xf32> to vector<8x32xf32>
    %201 = arith.mulf %199, %200 : vector<8x32xf32>
    %202 = vector.broadcast %181 : vector<1x32xf32> to vector<8x32xf32>
    %203 = arith.addf %201, %202 : vector<8x32xf32>
    %c0_161 = arith.constant 0 : index
    %c0_162 = arith.constant 0 : index
    %c0_163 = arith.constant 0 : index
    %204 = vector.load %arg14[%c0_161, %c0_162, %c0_163] : memref<2x32x32xf32, #tpu.memory_space<vmem>>, vector<1x32x32xf32>
    %205 = vector.shape_cast %204 : vector<1x32x32xf32> to vector<32x32xf32>
    %cst_164 = arith.constant dense<0.000000e+00> : vector<8x32xf32>
    %206 = tpu.matmul %203, %205, %cst_164 {dimension_numbers = #tpu.dot_dimension_numbers<[1], [0], [0], [1], [0, 0, 1, 1], [], []>} : vector<8x32xf32>, vector<32x32xf32>, vector<8x32xf32> -> vector<8x32xf32>
    %c0_165 = arith.constant 0 : index
    %c0_166 = arith.constant 0 : index
    %c0_167 = arith.constant 0 : index
    %207 = vector.load %arg15[%c0_165, %c0_166, %c0_167] : memref<2x1x32xf32, #tpu.memory_space<vmem>>, vector<1x1x32xf32>
    %208 = vector.shape_cast %207 : vector<1x1x32xf32> to vector<1x32xf32>
    %209 = vector.broadcast %208 : vector<1x32xf32> to vector<8x32xf32>
    %210 = arith.addf %206, %209 : vector<8x32xf32>
    %cst_168 = arith.constant 0.000000e+00 : f32
    %211 = vector.broadcast %cst_168 : f32 to vector<8x32xf32>
    %212 = arith.maximumf %210, %211 : vector<8x32xf32>
    %c0_169 = arith.constant 0 : index
    %c0_170 = arith.constant 0 : index
    %c0_171 = arith.constant 0 : index
    %213 = vector.load %arg16[%c0_169, %c0_170, %c0_171] : memref<2x32x32xf32, #tpu.memory_space<vmem>>, vector<1x32x32xf32>
    %214 = vector.shape_cast %213 : vector<1x32x32xf32> to vector<32x32xf32>
    %cst_172 = arith.constant dense<0.000000e+00> : vector<8x32xf32>
    %215 = tpu.matmul %212, %214, %cst_172 {dimension_numbers = #tpu.dot_dimension_numbers<[1], [0], [0], [1], [0, 0, 1, 1], [], []>} : vector<8x32xf32>, vector<32x32xf32>, vector<8x32xf32> -> vector<8x32xf32>
    %c0_173 = arith.constant 0 : index
    %c0_174 = arith.constant 0 : index
    %c0_175 = arith.constant 0 : index
    %216 = vector.load %arg17[%c0_173, %c0_174, %c0_175] : memref<2x1x32xf32, #tpu.memory_space<vmem>>, vector<1x1x32xf32>
    %217 = vector.shape_cast %216 : vector<1x1x32xf32> to vector<1x32xf32>
    %218 = vector.broadcast %217 : vector<1x32xf32> to vector<8x32xf32>
    %219 = arith.addf %215, %218 : vector<8x32xf32>
    %220 = arith.addf %203, %219 : vector<8x32xf32>
    %c0_176 = arith.constant 0 : index
    %c0_177 = arith.constant 0 : index
    %c0_178 = arith.constant 0 : index
    %221 = vector.load %arg18[%c0_176, %c0_177, %c0_178] : memref<2x1x32xf32, #tpu.memory_space<vmem>>, vector<1x1x32xf32>
    %222 = vector.shape_cast %221 : vector<1x1x32xf32> to vector<1x32xf32>
    %c0_179 = arith.constant 0 : index
    %c0_180 = arith.constant 0 : index
    %c0_181 = arith.constant 0 : index
    %223 = vector.load %arg19[%c0_179, %c0_180, %c0_181] : memref<2x1x32xf32, #tpu.memory_space<vmem>>, vector<1x1x32xf32>
    %224 = vector.shape_cast %223 : vector<1x1x32xf32> to vector<1x32xf32>
    %cst_182 = arith.constant dense<0.000000e+00> : vector<8xf32>
    %225 = vector.multi_reduction <add>, %220, %cst_182 [1] : vector<8x32xf32> to vector<8xf32>
    %226 = vector.shape_cast %225 : vector<8xf32> to vector<8x1xf32>
    %cst_183 = arith.constant 3.200000e+01 : f32
    %227 = vector.broadcast %cst_183 : f32 to vector<8x1xf32>
    %228 = arith.divf %226, %227 : vector<8x1xf32>
    %229 = vector.broadcast %228 : vector<8x1xf32> to vector<8x32xf32>
    %230 = arith.subf %220, %229 : vector<8x32xf32>
    %231 = arith.mulf %230, %230 : vector<8x32xf32>
    %cst_184 = arith.constant dense<0.000000e+00> : vector<8xf32>
    %232 = vector.multi_reduction <add>, %231, %cst_184 [1] : vector<8x32xf32> to vector<8xf32>
    %233 = vector.shape_cast %232 : vector<8xf32> to vector<8x1xf32>
    %cst_185 = arith.constant 3.200000e+01 : f32
    %234 = vector.broadcast %cst_185 : f32 to vector<8x1xf32>
    %235 = arith.divf %233, %234 : vector<8x1xf32>
    %236 = vector.broadcast %228 : vector<8x1xf32> to vector<8x32xf32>
    %237 = arith.subf %220, %236 : vector<8x32xf32>
    %cst_186 = arith.constant 9.99999974E-6 : f32
    %238 = vector.broadcast %cst_186 : f32 to vector<8x1xf32>
    %239 = arith.addf %235, %238 : vector<8x1xf32>
    %240 = math.rsqrt %239 : vector<8x1xf32>
    %241 = vector.broadcast %240 : vector<8x1xf32> to vector<8x32xf32>
    %242 = arith.mulf %237, %241 : vector<8x32xf32>
    %243 = vector.broadcast %222 : vector<1x32xf32> to vector<8x32xf32>
    %244 = arith.mulf %242, %243 : vector<8x32xf32>
    %245 = vector.broadcast %224 : vector<1x32xf32> to vector<8x32xf32>
    %246 = arith.addf %244, %245 : vector<8x32xf32>
    %c1_187 = arith.constant 1 : index
    %c0_188 = arith.constant 0 : index
    %c0_189 = arith.constant 0 : index
    %247 = vector.load %arg11[%c1_187, %c0_188, %c0_189] : memref<2x1x32xf32, #tpu.memory_space<vmem>>, vector<1x1x32xf32>
    %248 = vector.shape_cast %247 : vector<1x1x32xf32> to vector<1x32xf32>
    %249 = vector.shape_cast %248 : vector<1x32xf32> to vector<1x32xf32>
    %250 = vector.broadcast %249 : vector<1x32xf32> to vector<8x32xf32>
    %c1_190 = arith.constant 1 : index
    %c0_191 = arith.constant 0 : index
    %c0_192 = arith.constant 0 : index
    %c0_193 = arith.constant 0 : index
    %251 = vector.load %arg4[%c1_190, %c0_191, %c0_192, %c0_193] : memref<2x4x32x8xf32, #tpu.memory_space<vmem>>, vector<1x1x32x8xf32>
    %252 = vector.shape_cast %251 : vector<1x1x32x8xf32> to vector<32x8xf32>
    %cst_194 = arith.constant dense<0.000000e+00> : vector<8x8xf32>
    %253 = tpu.matmul %246, %252, %cst_194 {dimension_numbers = #tpu.dot_dimension_numbers<[1], [0], [0], [1], [0, 0, 1, 1], [], []>} : vector<8x32xf32>, vector<32x8xf32>, vector<8x8xf32> -> vector<8x8xf32>
    %c1_195 = arith.constant 1 : index
    %c0_196 = arith.constant 0 : index
    %c0_197 = arith.constant 0 : index
    %c0_198 = arith.constant 0 : index
    %254 = vector.load %arg5[%c1_195, %c0_196, %c0_197, %c0_198] : memref<2x4x1x8xf32, #tpu.memory_space<vmem>>, vector<1x1x1x8xf32>
    %255 = vector.shape_cast %254 : vector<1x1x1x8xf32> to vector<1x8xf32>
    %256 = vector.broadcast %255 : vector<1x8xf32> to vector<8x8xf32>
    %257 = arith.addf %253, %256 : vector<8x8xf32>
    %c1_199 = arith.constant 1 : index
    %c0_200 = arith.constant 0 : index
    %c0_201 = arith.constant 0 : index
    %c0_202 = arith.constant 0 : index
    %258 = vector.load %arg6[%c1_199, %c0_200, %c0_201, %c0_202] : memref<2x4x32x8xf32, #tpu.memory_space<vmem>>, vector<1x1x32x8xf32>
    %259 = vector.shape_cast %258 : vector<1x1x32x8xf32> to vector<32x8xf32>
    %cst_203 = arith.constant dense<0.000000e+00> : vector<8x8xf32>
    %260 = tpu.matmul %246, %259, %cst_203 {dimension_numbers = #tpu.dot_dimension_numbers<[1], [0], [0], [1], [0, 0, 1, 1], [], []>} : vector<8x32xf32>, vector<32x8xf32>, vector<8x8xf32> -> vector<8x8xf32>
    %c1_204 = arith.constant 1 : index
    %c0_205 = arith.constant 0 : index
    %c0_206 = arith.constant 0 : index
    %c0_207 = arith.constant 0 : index
    %261 = vector.load %arg7[%c1_204, %c0_205, %c0_206, %c0_207] : memref<2x4x1x8xf32, #tpu.memory_space<vmem>>, vector<1x1x1x8xf32>
    %262 = vector.shape_cast %261 : vector<1x1x1x8xf32> to vector<1x8xf32>
    %263 = vector.broadcast %262 : vector<1x8xf32> to vector<8x8xf32>
    %264 = arith.addf %260, %263 : vector<8x8xf32>
    %c1_208 = arith.constant 1 : index
    %c0_209 = arith.constant 0 : index
    %c0_210 = arith.constant 0 : index
    %c0_211 = arith.constant 0 : index
    %265 = vector.load %arg8[%c1_208, %c0_209, %c0_210, %c0_211] : memref<2x4x32x8xf32, #tpu.memory_space<vmem>>, vector<1x1x32x8xf32>
    %266 = vector.shape_cast %265 : vector<1x1x32x8xf32> to vector<32x8xf32>
    %cst_212 = arith.constant dense<0.000000e+00> : vector<8x8xf32>
    %267 = tpu.matmul %246, %266, %cst_212 {dimension_numbers = #tpu.dot_dimension_numbers<[1], [0], [0], [1], [0, 0, 1, 1], [], []>} : vector<8x32xf32>, vector<32x8xf32>, vector<8x8xf32> -> vector<8x8xf32>
    %c1_213 = arith.constant 1 : index
    %c0_214 = arith.constant 0 : index
    %c0_215 = arith.constant 0 : index
    %c0_216 = arith.constant 0 : index
    %268 = vector.load %arg9[%c1_213, %c0_214, %c0_215, %c0_216] : memref<2x4x1x8xf32, #tpu.memory_space<vmem>>, vector<1x1x1x8xf32>
    %269 = vector.shape_cast %268 : vector<1x1x1x8xf32> to vector<1x8xf32>
    %270 = vector.broadcast %269 : vector<1x8xf32> to vector<8x8xf32>
    %271 = arith.addf %267, %270 : vector<8x8xf32>
    %272 = vector.shape_cast %257 : vector<8x8xf32> to vector<1x8x8xf32>
    %273 = vector.shape_cast %264 : vector<8x8xf32> to vector<1x8x8xf32>
    %274 = vector.shape_cast %271 : vector<8x8xf32> to vector<1x8x8xf32>
    "tpu.trace_start"() <{level = 10 : i32, message = "bqd,bkd->bqk"}> : () -> ()
    %cst_217 = arith.constant dense<0.000000e+00> : vector<1x8x8xf32>
    %275 = tpu.matmul %272, %273, %cst_217 {dimension_numbers = #tpu.dot_dimension_numbers<[2], [2], [1], [1], [0, 0, 0, 1, 1, 1], [0], [0]>} : vector<1x8x8xf32>, vector<1x8x8xf32>, vector<1x8x8xf32> -> vector<1x8x8xf32>
    "tpu.trace_stop"() : () -> ()
    %cst_218 = arith.constant dense<0xFF800000> : vector<1x8xf32>
    %276 = vector.multi_reduction <maximumf>, %275, %cst_218 [2] : vector<1x8x8xf32> to vector<1x8xf32>
    %277 = vector.shape_cast %276 : vector<1x8xf32> to vector<1x8x1xf32>
    %278 = vector.broadcast %277 : vector<1x8x1xf32> to vector<1x8x8xf32>
    %279 = arith.subf %275, %278 : vector<1x8x8xf32>
    %280 = math.exp %279 : vector<1x8x8xf32>
    %cst_219 = arith.constant dense<0.000000e+00> : vector<1x8xf32>
    %281 = vector.multi_reduction <add>, %280, %cst_219 [2] : vector<1x8x8xf32> to vector<1x8xf32>
    %282 = vector.shape_cast %281 : vector<1x8xf32> to vector<1x8x1xf32>
    %283 = tpu.reciprocal %282 {approx = true} : vector<1x8x1xf32> -> vector<1x8x1xf32>
    %284 = vector.broadcast %283 : vector<1x8x1xf32> to vector<1x8x8xf32>
    %285 = arith.mulf %280, %284 : vector<1x8x8xf32>
    "tpu.trace_start"() <{level = 10 : i32, message = "bqk,bkd->bqd"}> : () -> ()
    %cst_220 = arith.constant dense<0.000000e+00> : vector<1x8x8xf32>
    %286 = tpu.matmul %285, %274, %cst_220 {dimension_numbers = #tpu.dot_dimension_numbers<[2], [1], [1], [2], [0, 0, 0, 1, 1, 2], [0], [0]>} : vector<1x8x8xf32>, vector<1x8x8xf32>, vector<1x8x8xf32> -> vector<1x8x8xf32>
    "tpu.trace_stop"() : () -> ()
    %287 = vector.shape_cast %286 : vector<1x8x8xf32> to vector<8x8xf32>
    %c1_221 = arith.constant 1 : index
    %c0_222 = arith.constant 0 : index
    %c0_223 = arith.constant 0 : index
    %c0_224 = arith.constant 0 : index
    %288 = vector.load %arg10[%c1_221, %c0_222, %c0_223, %c0_224] : memref<2x4x8x32xf32, #tpu.memory_space<vmem>>, vector<1x1x8x32xf32>
    %289 = vector.shape_cast %288 : vector<1x1x8x32xf32> to vector<8x32xf32>
    %cst_225 = arith.constant dense<0.000000e+00> : vector<8x32xf32>
    %290 = tpu.matmul %287, %289, %cst_225 {dimension_numbers = #tpu.dot_dimension_numbers<[1], [0], [0], [1], [0, 0, 1, 1], [], []>} : vector<8x8xf32>, vector<8x32xf32>, vector<8x32xf32> -> vector<8x32xf32>
    %291 = arith.addf %250, %290 : vector<8x32xf32>
    %c1_226 = arith.constant 1 : index
    %c1_227 = arith.constant 1 : index
    %c0_228 = arith.constant 0 : index
    %c0_229 = arith.constant 0 : index
    %292 = vector.load %arg4[%c1_226, %c1_227, %c0_228, %c0_229] : memref<2x4x32x8xf32, #tpu.memory_space<vmem>>, vector<1x1x32x8xf32>
    %293 = vector.shape_cast %292 : vector<1x1x32x8xf32> to vector<32x8xf32>
    %cst_230 = arith.constant dense<0.000000e+00> : vector<8x8xf32>
    %294 = tpu.matmul %246, %293, %cst_230 {dimension_numbers = #tpu.dot_dimension_numbers<[1], [0], [0], [1], [0, 0, 1, 1], [], []>} : vector<8x32xf32>, vector<32x8xf32>, vector<8x8xf32> -> vector<8x8xf32>
    %c1_231 = arith.constant 1 : index
    %c1_232 = arith.constant 1 : index
    %c0_233 = arith.constant 0 : index
    %c0_234 = arith.constant 0 : index
    %295 = vector.load %arg5[%c1_231, %c1_232, %c0_233, %c0_234] : memref<2x4x1x8xf32, #tpu.memory_space<vmem>>, vector<1x1x1x8xf32>
    %296 = vector.shape_cast %295 : vector<1x1x1x8xf32> to vector<1x8xf32>
    %297 = vector.broadcast %296 : vector<1x8xf32> to vector<8x8xf32>
    %298 = arith.addf %294, %297 : vector<8x8xf32>
    %c1_235 = arith.constant 1 : index
    %c1_236 = arith.constant 1 : index
    %c0_237 = arith.constant 0 : index
    %c0_238 = arith.constant 0 : index
    %299 = vector.load %arg6[%c1_235, %c1_236, %c0_237, %c0_238] : memref<2x4x32x8xf32, #tpu.memory_space<vmem>>, vector<1x1x32x8xf32>
    %300 = vector.shape_cast %299 : vector<1x1x32x8xf32> to vector<32x8xf32>
    %cst_239 = arith.constant dense<0.000000e+00> : vector<8x8xf32>
    %301 = tpu.matmul %246, %300, %cst_239 {dimension_numbers = #tpu.dot_dimension_numbers<[1], [0], [0], [1], [0, 0, 1, 1], [], []>} : vector<8x32xf32>, vector<32x8xf32>, vector<8x8xf32> -> vector<8x8xf32>
    %c1_240 = arith.constant 1 : index
    %c1_241 = arith.constant 1 : index
    %c0_242 = arith.constant 0 : index
    %c0_243 = arith.constant 0 : index
    %302 = vector.load %arg7[%c1_240, %c1_241, %c0_242, %c0_243] : memref<2x4x1x8xf32, #tpu.memory_space<vmem>>, vector<1x1x1x8xf32>
    %303 = vector.shape_cast %302 : vector<1x1x1x8xf32> to vector<1x8xf32>
    %304 = vector.broadcast %303 : vector<1x8xf32> to vector<8x8xf32>
    %305 = arith.addf %301, %304 : vector<8x8xf32>
    %c1_244 = arith.constant 1 : index
    %c1_245 = arith.constant 1 : index
    %c0_246 = arith.constant 0 : index
    %c0_247 = arith.constant 0 : index
    %306 = vector.load %arg8[%c1_244, %c1_245, %c0_246, %c0_247] : memref<2x4x32x8xf32, #tpu.memory_space<vmem>>, vector<1x1x32x8xf32>
    %307 = vector.shape_cast %306 : vector<1x1x32x8xf32> to vector<32x8xf32>
    %cst_248 = arith.constant dense<0.000000e+00> : vector<8x8xf32>
    %308 = tpu.matmul %246, %307, %cst_248 {dimension_numbers = #tpu.dot_dimension_numbers<[1], [0], [0], [1], [0, 0, 1, 1], [], []>} : vector<8x32xf32>, vector<32x8xf32>, vector<8x8xf32> -> vector<8x8xf32>
    %c1_249 = arith.constant 1 : index
    %c1_250 = arith.constant 1 : index
    %c0_251 = arith.constant 0 : index
    %c0_252 = arith.constant 0 : index
    %309 = vector.load %arg9[%c1_249, %c1_250, %c0_251, %c0_252] : memref<2x4x1x8xf32, #tpu.memory_space<vmem>>, vector<1x1x1x8xf32>
    %310 = vector.shape_cast %309 : vector<1x1x1x8xf32> to vector<1x8xf32>
    %311 = vector.broadcast %310 : vector<1x8xf32> to vector<8x8xf32>
    %312 = arith.addf %308, %311 : vector<8x8xf32>
    %313 = vector.shape_cast %298 : vector<8x8xf32> to vector<1x8x8xf32>
    %314 = vector.shape_cast %305 : vector<8x8xf32> to vector<1x8x8xf32>
    %315 = vector.shape_cast %312 : vector<8x8xf32> to vector<1x8x8xf32>
    "tpu.trace_start"() <{level = 10 : i32, message = "bqd,bkd->bqk"}> : () -> ()
    %cst_253 = arith.constant dense<0.000000e+00> : vector<1x8x8xf32>
    %316 = tpu.matmul %313, %314, %cst_253 {dimension_numbers = #tpu.dot_dimension_numbers<[2], [2], [1], [1], [0, 0, 0, 1, 1, 1], [0], [0]>} : vector<1x8x8xf32>, vector<1x8x8xf32>, vector<1x8x8xf32> -> vector<1x8x8xf32>
    "tpu.trace_stop"() : () -> ()
    %cst_254 = arith.constant dense<0xFF800000> : vector<1x8xf32>
    %317 = vector.multi_reduction <maximumf>, %316, %cst_254 [2] : vector<1x8x8xf32> to vector<1x8xf32>
    %318 = vector.shape_cast %317 : vector<1x8xf32> to vector<1x8x1xf32>
    %319 = vector.broadcast %318 : vector<1x8x1xf32> to vector<1x8x8xf32>
    %320 = arith.subf %316, %319 : vector<1x8x8xf32>
    %321 = math.exp %320 : vector<1x8x8xf32>
    %cst_255 = arith.constant dense<0.000000e+00> : vector<1x8xf32>
    %322 = vector.multi_reduction <add>, %321, %cst_255 [2] : vector<1x8x8xf32> to vector<1x8xf32>
    %323 = vector.shape_cast %322 : vector<1x8xf32> to vector<1x8x1xf32>
    %324 = tpu.reciprocal %323 {approx = true} : vector<1x8x1xf32> -> vector<1x8x1xf32>
    %325 = vector.broadcast %324 : vector<1x8x1xf32> to vector<1x8x8xf32>
    %326 = arith.mulf %321, %325 : vector<1x8x8xf32>
    "tpu.trace_start"() <{level = 10 : i32, message = "bqk,bkd->bqd"}> : () -> ()
    %cst_256 = arith.constant dense<0.000000e+00> : vector<1x8x8xf32>
    %327 = tpu.matmul %326, %315, %cst_256 {dimension_numbers = #tpu.dot_dimension_numbers<[2], [1], [1], [2], [0, 0, 0, 1, 1, 2], [0], [0]>} : vector<1x8x8xf32>, vector<1x8x8xf32>, vector<1x8x8xf32> -> vector<1x8x8xf32>
    "tpu.trace_stop"() : () -> ()
    %328 = vector.shape_cast %327 : vector<1x8x8xf32> to vector<8x8xf32>
    %c1_257 = arith.constant 1 : index
    %c1_258 = arith.constant 1 : index
    %c0_259 = arith.constant 0 : index
    %c0_260 = arith.constant 0 : index
    %329 = vector.load %arg10[%c1_257, %c1_258, %c0_259, %c0_260] : memref<2x4x8x32xf32, #tpu.memory_space<vmem>>, vector<1x1x8x32xf32>
    %330 = vector.shape_cast %329 : vector<1x1x8x32xf32> to vector<8x32xf32>
    %cst_261 = arith.constant dense<0.000000e+00> : vector<8x32xf32>
    %331 = tpu.matmul %328, %330, %cst_261 {dimension_numbers = #tpu.dot_dimension_numbers<[1], [0], [0], [1], [0, 0, 1, 1], [], []>} : vector<8x8xf32>, vector<8x32xf32>, vector<8x32xf32> -> vector<8x32xf32>
    %332 = arith.addf %291, %331 : vector<8x32xf32>
    %c1_262 = arith.constant 1 : index
    %c2_263 = arith.constant 2 : index
    %c0_264 = arith.constant 0 : index
    %c0_265 = arith.constant 0 : index
    %333 = vector.load %arg4[%c1_262, %c2_263, %c0_264, %c0_265] : memref<2x4x32x8xf32, #tpu.memory_space<vmem>>, vector<1x1x32x8xf32>
    %334 = vector.shape_cast %333 : vector<1x1x32x8xf32> to vector<32x8xf32>
    %cst_266 = arith.constant dense<0.000000e+00> : vector<8x8xf32>
    %335 = tpu.matmul %246, %334, %cst_266 {dimension_numbers = #tpu.dot_dimension_numbers<[1], [0], [0], [1], [0, 0, 1, 1], [], []>} : vector<8x32xf32>, vector<32x8xf32>, vector<8x8xf32> -> vector<8x8xf32>
    %c1_267 = arith.constant 1 : index
    %c2_268 = arith.constant 2 : index
    %c0_269 = arith.constant 0 : index
    %c0_270 = arith.constant 0 : index
    %336 = vector.load %arg5[%c1_267, %c2_268, %c0_269, %c0_270] : memref<2x4x1x8xf32, #tpu.memory_space<vmem>>, vector<1x1x1x8xf32>
    %337 = vector.shape_cast %336 : vector<1x1x1x8xf32> to vector<1x8xf32>
    %338 = vector.broadcast %337 : vector<1x8xf32> to vector<8x8xf32>
    %339 = arith.addf %335, %338 : vector<8x8xf32>
    %c1_271 = arith.constant 1 : index
    %c2_272 = arith.constant 2 : index
    %c0_273 = arith.constant 0 : index
    %c0_274 = arith.constant 0 : index
    %340 = vector.load %arg6[%c1_271, %c2_272, %c0_273, %c0_274] : memref<2x4x32x8xf32, #tpu.memory_space<vmem>>, vector<1x1x32x8xf32>
    %341 = vector.shape_cast %340 : vector<1x1x32x8xf32> to vector<32x8xf32>
    %cst_275 = arith.constant dense<0.000000e+00> : vector<8x8xf32>
    %342 = tpu.matmul %246, %341, %cst_275 {dimension_numbers = #tpu.dot_dimension_numbers<[1], [0], [0], [1], [0, 0, 1, 1], [], []>} : vector<8x32xf32>, vector<32x8xf32>, vector<8x8xf32> -> vector<8x8xf32>
    %c1_276 = arith.constant 1 : index
    %c2_277 = arith.constant 2 : index
    %c0_278 = arith.constant 0 : index
    %c0_279 = arith.constant 0 : index
    %343 = vector.load %arg7[%c1_276, %c2_277, %c0_278, %c0_279] : memref<2x4x1x8xf32, #tpu.memory_space<vmem>>, vector<1x1x1x8xf32>
    %344 = vector.shape_cast %343 : vector<1x1x1x8xf32> to vector<1x8xf32>
    %345 = vector.broadcast %344 : vector<1x8xf32> to vector<8x8xf32>
    %346 = arith.addf %342, %345 : vector<8x8xf32>
    %c1_280 = arith.constant 1 : index
    %c2_281 = arith.constant 2 : index
    %c0_282 = arith.constant 0 : index
    %c0_283 = arith.constant 0 : index
    %347 = vector.load %arg8[%c1_280, %c2_281, %c0_282, %c0_283] : memref<2x4x32x8xf32, #tpu.memory_space<vmem>>, vector<1x1x32x8xf32>
    %348 = vector.shape_cast %347 : vector<1x1x32x8xf32> to vector<32x8xf32>
    %cst_284 = arith.constant dense<0.000000e+00> : vector<8x8xf32>
    %349 = tpu.matmul %246, %348, %cst_284 {dimension_numbers = #tpu.dot_dimension_numbers<[1], [0], [0], [1], [0, 0, 1, 1], [], []>} : vector<8x32xf32>, vector<32x8xf32>, vector<8x8xf32> -> vector<8x8xf32>
    %c1_285 = arith.constant 1 : index
    %c2_286 = arith.constant 2 : index
    %c0_287 = arith.constant 0 : index
    %c0_288 = arith.constant 0 : index
    %350 = vector.load %arg9[%c1_285, %c2_286, %c0_287, %c0_288] : memref<2x4x1x8xf32, #tpu.memory_space<vmem>>, vector<1x1x1x8xf32>
    %351 = vector.shape_cast %350 : vector<1x1x1x8xf32> to vector<1x8xf32>
    %352 = vector.broadcast %351 : vector<1x8xf32> to vector<8x8xf32>
    %353 = arith.addf %349, %352 : vector<8x8xf32>
    %354 = vector.shape_cast %339 : vector<8x8xf32> to vector<1x8x8xf32>
    %355 = vector.shape_cast %346 : vector<8x8xf32> to vector<1x8x8xf32>
    %356 = vector.shape_cast %353 : vector<8x8xf32> to vector<1x8x8xf32>
    "tpu.trace_start"() <{level = 10 : i32, message = "bqd,bkd->bqk"}> : () -> ()
    %cst_289 = arith.constant dense<0.000000e+00> : vector<1x8x8xf32>
    %357 = tpu.matmul %354, %355, %cst_289 {dimension_numbers = #tpu.dot_dimension_numbers<[2], [2], [1], [1], [0, 0, 0, 1, 1, 1], [0], [0]>} : vector<1x8x8xf32>, vector<1x8x8xf32>, vector<1x8x8xf32> -> vector<1x8x8xf32>
    "tpu.trace_stop"() : () -> ()
    %cst_290 = arith.constant dense<0xFF800000> : vector<1x8xf32>
    %358 = vector.multi_reduction <maximumf>, %357, %cst_290 [2] : vector<1x8x8xf32> to vector<1x8xf32>
    %359 = vector.shape_cast %358 : vector<1x8xf32> to vector<1x8x1xf32>
    %360 = vector.broadcast %359 : vector<1x8x1xf32> to vector<1x8x8xf32>
    %361 = arith.subf %357, %360 : vector<1x8x8xf32>
    %362 = math.exp %361 : vector<1x8x8xf32>
    %cst_291 = arith.constant dense<0.000000e+00> : vector<1x8xf32>
    %363 = vector.multi_reduction <add>, %362, %cst_291 [2] : vector<1x8x8xf32> to vector<1x8xf32>
    %364 = vector.shape_cast %363 : vector<1x8xf32> to vector<1x8x1xf32>
    %365 = tpu.reciprocal %364 {approx = true} : vector<1x8x1xf32> -> vector<1x8x1xf32>
    %366 = vector.broadcast %365 : vector<1x8x1xf32> to vector<1x8x8xf32>
    %367 = arith.mulf %362, %366 : vector<1x8x8xf32>
    "tpu.trace_start"() <{level = 10 : i32, message = "bqk,bkd->bqd"}> : () -> ()
    %cst_292 = arith.constant dense<0.000000e+00> : vector<1x8x8xf32>
    %368 = tpu.matmul %367, %356, %cst_292 {dimension_numbers = #tpu.dot_dimension_numbers<[2], [1], [1], [2], [0, 0, 0, 1, 1, 2], [0], [0]>} : vector<1x8x8xf32>, vector<1x8x8xf32>, vector<1x8x8xf32> -> vector<1x8x8xf32>
    "tpu.trace_stop"() : () -> ()
    %369 = vector.shape_cast %368 : vector<1x8x8xf32> to vector<8x8xf32>
    %c1_293 = arith.constant 1 : index
    %c2_294 = arith.constant 2 : index
    %c0_295 = arith.constant 0 : index
    %c0_296 = arith.constant 0 : index
    %370 = vector.load %arg10[%c1_293, %c2_294, %c0_295, %c0_296] : memref<2x4x8x32xf32, #tpu.memory_space<vmem>>, vector<1x1x8x32xf32>
    %371 = vector.shape_cast %370 : vector<1x1x8x32xf32> to vector<8x32xf32>
    %cst_297 = arith.constant dense<0.000000e+00> : vector<8x32xf32>
    %372 = tpu.matmul %369, %371, %cst_297 {dimension_numbers = #tpu.dot_dimension_numbers<[1], [0], [0], [1], [0, 0, 1, 1], [], []>} : vector<8x8xf32>, vector<8x32xf32>, vector<8x32xf32> -> vector<8x32xf32>
    %373 = arith.addf %332, %372 : vector<8x32xf32>
    %c1_298 = arith.constant 1 : index
    %c3_299 = arith.constant 3 : index
    %c0_300 = arith.constant 0 : index
    %c0_301 = arith.constant 0 : index
    %374 = vector.load %arg4[%c1_298, %c3_299, %c0_300, %c0_301] : memref<2x4x32x8xf32, #tpu.memory_space<vmem>>, vector<1x1x32x8xf32>
    %375 = vector.shape_cast %374 : vector<1x1x32x8xf32> to vector<32x8xf32>
    %cst_302 = arith.constant dense<0.000000e+00> : vector<8x8xf32>
    %376 = tpu.matmul %246, %375, %cst_302 {dimension_numbers = #tpu.dot_dimension_numbers<[1], [0], [0], [1], [0, 0, 1, 1], [], []>} : vector<8x32xf32>, vector<32x8xf32>, vector<8x8xf32> -> vector<8x8xf32>
    %c1_303 = arith.constant 1 : index
    %c3_304 = arith.constant 3 : index
    %c0_305 = arith.constant 0 : index
    %c0_306 = arith.constant 0 : index
    %377 = vector.load %arg5[%c1_303, %c3_304, %c0_305, %c0_306] : memref<2x4x1x8xf32, #tpu.memory_space<vmem>>, vector<1x1x1x8xf32>
    %378 = vector.shape_cast %377 : vector<1x1x1x8xf32> to vector<1x8xf32>
    %379 = vector.broadcast %378 : vector<1x8xf32> to vector<8x8xf32>
    %380 = arith.addf %376, %379 : vector<8x8xf32>
    %c1_307 = arith.constant 1 : index
    %c3_308 = arith.constant 3 : index
    %c0_309 = arith.constant 0 : index
    %c0_310 = arith.constant 0 : index
    %381 = vector.load %arg6[%c1_307, %c3_308, %c0_309, %c0_310] : memref<2x4x32x8xf32, #tpu.memory_space<vmem>>, vector<1x1x32x8xf32>
    %382 = vector.shape_cast %381 : vector<1x1x32x8xf32> to vector<32x8xf32>
    %cst_311 = arith.constant dense<0.000000e+00> : vector<8x8xf32>
    %383 = tpu.matmul %246, %382, %cst_311 {dimension_numbers = #tpu.dot_dimension_numbers<[1], [0], [0], [1], [0, 0, 1, 1], [], []>} : vector<8x32xf32>, vector<32x8xf32>, vector<8x8xf32> -> vector<8x8xf32>
    %c1_312 = arith.constant 1 : index
    %c3_313 = arith.constant 3 : index
    %c0_314 = arith.constant 0 : index
    %c0_315 = arith.constant 0 : index
    %384 = vector.load %arg7[%c1_312, %c3_313, %c0_314, %c0_315] : memref<2x4x1x8xf32, #tpu.memory_space<vmem>>, vector<1x1x1x8xf32>
    %385 = vector.shape_cast %384 : vector<1x1x1x8xf32> to vector<1x8xf32>
    %386 = vector.broadcast %385 : vector<1x8xf32> to vector<8x8xf32>
    %387 = arith.addf %383, %386 : vector<8x8xf32>
    %c1_316 = arith.constant 1 : index
    %c3_317 = arith.constant 3 : index
    %c0_318 = arith.constant 0 : index
    %c0_319 = arith.constant 0 : index
    %388 = vector.load %arg8[%c1_316, %c3_317, %c0_318, %c0_319] : memref<2x4x32x8xf32, #tpu.memory_space<vmem>>, vector<1x1x32x8xf32>
    %389 = vector.shape_cast %388 : vector<1x1x32x8xf32> to vector<32x8xf32>
    %cst_320 = arith.constant dense<0.000000e+00> : vector<8x8xf32>
    %390 = tpu.matmul %246, %389, %cst_320 {dimension_numbers = #tpu.dot_dimension_numbers<[1], [0], [0], [1], [0, 0, 1, 1], [], []>} : vector<8x32xf32>, vector<32x8xf32>, vector<8x8xf32> -> vector<8x8xf32>
    %c1_321 = arith.constant 1 : index
    %c3_322 = arith.constant 3 : index
    %c0_323 = arith.constant 0 : index
    %c0_324 = arith.constant 0 : index
    %391 = vector.load %arg9[%c1_321, %c3_322, %c0_323, %c0_324] : memref<2x4x1x8xf32, #tpu.memory_space<vmem>>, vector<1x1x1x8xf32>
    %392 = vector.shape_cast %391 : vector<1x1x1x8xf32> to vector<1x8xf32>
    %393 = vector.broadcast %392 : vector<1x8xf32> to vector<8x8xf32>
    %394 = arith.addf %390, %393 : vector<8x8xf32>
    %395 = vector.shape_cast %380 : vector<8x8xf32> to vector<1x8x8xf32>
    %396 = vector.shape_cast %387 : vector<8x8xf32> to vector<1x8x8xf32>
    %397 = vector.shape_cast %394 : vector<8x8xf32> to vector<1x8x8xf32>
    "tpu.trace_start"() <{level = 10 : i32, message = "bqd,bkd->bqk"}> : () -> ()
    %cst_325 = arith.constant dense<0.000000e+00> : vector<1x8x8xf32>
    %398 = tpu.matmul %395, %396, %cst_325 {dimension_numbers = #tpu.dot_dimension_numbers<[2], [2], [1], [1], [0, 0, 0, 1, 1, 1], [0], [0]>} : vector<1x8x8xf32>, vector<1x8x8xf32>, vector<1x8x8xf32> -> vector<1x8x8xf32>
    "tpu.trace_stop"() : () -> ()
    %cst_326 = arith.constant dense<0xFF800000> : vector<1x8xf32>
    %399 = vector.multi_reduction <maximumf>, %398, %cst_326 [2] : vector<1x8x8xf32> to vector<1x8xf32>
    %400 = vector.shape_cast %399 : vector<1x8xf32> to vector<1x8x1xf32>
    %401 = vector.broadcast %400 : vector<1x8x1xf32> to vector<1x8x8xf32>
    %402 = arith.subf %398, %401 : vector<1x8x8xf32>
    %403 = math.exp %402 : vector<1x8x8xf32>
    %cst_327 = arith.constant dense<0.000000e+00> : vector<1x8xf32>
    %404 = vector.multi_reduction <add>, %403, %cst_327 [2] : vector<1x8x8xf32> to vector<1x8xf32>
    %405 = vector.shape_cast %404 : vector<1x8xf32> to vector<1x8x1xf32>
    %406 = tpu.reciprocal %405 {approx = true} : vector<1x8x1xf32> -> vector<1x8x1xf32>
    %407 = vector.broadcast %406 : vector<1x8x1xf32> to vector<1x8x8xf32>
    %408 = arith.mulf %403, %407 : vector<1x8x8xf32>
    "tpu.trace_start"() <{level = 10 : i32, message = "bqk,bkd->bqd"}> : () -> ()
    %cst_328 = arith.constant dense<0.000000e+00> : vector<1x8x8xf32>
    %409 = tpu.matmul %408, %397, %cst_328 {dimension_numbers = #tpu.dot_dimension_numbers<[2], [1], [1], [2], [0, 0, 0, 1, 1, 2], [0], [0]>} : vector<1x8x8xf32>, vector<1x8x8xf32>, vector<1x8x8xf32> -> vector<1x8x8xf32>
    "tpu.trace_stop"() : () -> ()
    %410 = vector.shape_cast %409 : vector<1x8x8xf32> to vector<8x8xf32>
    %c1_329 = arith.constant 1 : index
    %c3_330 = arith.constant 3 : index
    %c0_331 = arith.constant 0 : index
    %c0_332 = arith.constant 0 : index
    %411 = vector.load %arg10[%c1_329, %c3_330, %c0_331, %c0_332] : memref<2x4x8x32xf32, #tpu.memory_space<vmem>>, vector<1x1x8x32xf32>
    %412 = vector.shape_cast %411 : vector<1x1x8x32xf32> to vector<8x32xf32>
    %cst_333 = arith.constant dense<0.000000e+00> : vector<8x32xf32>
    %413 = tpu.matmul %410, %412, %cst_333 {dimension_numbers = #tpu.dot_dimension_numbers<[1], [0], [0], [1], [0, 0, 1, 1], [], []>} : vector<8x8xf32>, vector<8x32xf32>, vector<8x32xf32> -> vector<8x32xf32>
    %414 = arith.addf %373, %413 : vector<8x32xf32>
    %415 = arith.addf %246, %414 : vector<8x32xf32>
    %c1_334 = arith.constant 1 : index
    %c0_335 = arith.constant 0 : index
    %c0_336 = arith.constant 0 : index
    %416 = vector.load %arg12[%c1_334, %c0_335, %c0_336] : memref<2x1x32xf32, #tpu.memory_space<vmem>>, vector<1x1x32xf32>
    %417 = vector.shape_cast %416 : vector<1x1x32xf32> to vector<1x32xf32>
    %c1_337 = arith.constant 1 : index
    %c0_338 = arith.constant 0 : index
    %c0_339 = arith.constant 0 : index
    %418 = vector.load %arg13[%c1_337, %c0_338, %c0_339] : memref<2x1x32xf32, #tpu.memory_space<vmem>>, vector<1x1x32xf32>
    %419 = vector.shape_cast %418 : vector<1x1x32xf32> to vector<1x32xf32>
    %cst_340 = arith.constant dense<0.000000e+00> : vector<8xf32>
    %420 = vector.multi_reduction <add>, %415, %cst_340 [1] : vector<8x32xf32> to vector<8xf32>
    %421 = vector.shape_cast %420 : vector<8xf32> to vector<8x1xf32>
    %cst_341 = arith.constant 3.200000e+01 : f32
    %422 = vector.broadcast %cst_341 : f32 to vector<8x1xf32>
    %423 = arith.divf %421, %422 : vector<8x1xf32>
    %424 = vector.broadcast %423 : vector<8x1xf32> to vector<8x32xf32>
    %425 = arith.subf %415, %424 : vector<8x32xf32>
    %426 = arith.mulf %425, %425 : vector<8x32xf32>
    %cst_342 = arith.constant dense<0.000000e+00> : vector<8xf32>
    %427 = vector.multi_reduction <add>, %426, %cst_342 [1] : vector<8x32xf32> to vector<8xf32>
    %428 = vector.shape_cast %427 : vector<8xf32> to vector<8x1xf32>
    %cst_343 = arith.constant 3.200000e+01 : f32
    %429 = vector.broadcast %cst_343 : f32 to vector<8x1xf32>
    %430 = arith.divf %428, %429 : vector<8x1xf32>
    %431 = vector.broadcast %423 : vector<8x1xf32> to vector<8x32xf32>
    %432 = arith.subf %415, %431 : vector<8x32xf32>
    %cst_344 = arith.constant 9.99999974E-6 : f32
    %433 = vector.broadcast %cst_344 : f32 to vector<8x1xf32>
    %434 = arith.addf %430, %433 : vector<8x1xf32>
    %435 = math.rsqrt %434 : vector<8x1xf32>
    %436 = vector.broadcast %435 : vector<8x1xf32> to vector<8x32xf32>
    %437 = arith.mulf %432, %436 : vector<8x32xf32>
    %438 = vector.broadcast %417 : vector<1x32xf32> to vector<8x32xf32>
    %439 = arith.mulf %437, %438 : vector<8x32xf32>
    %440 = vector.broadcast %419 : vector<1x32xf32> to vector<8x32xf32>
    %441 = arith.addf %439, %440 : vector<8x32xf32>
    %c1_345 = arith.constant 1 : index
    %c0_346 = arith.constant 0 : index
    %c0_347 = arith.constant 0 : index
    %442 = vector.load %arg14[%c1_345, %c0_346, %c0_347] : memref<2x32x32xf32, #tpu.memory_space<vmem>>, vector<1x32x32xf32>
    %443 = vector.shape_cast %442 : vector<1x32x32xf32> to vector<32x32xf32>
    %cst_348 = arith.constant dense<0.000000e+00> : vector<8x32xf32>
    %444 = tpu.matmul %441, %443, %cst_348 {dimension_numbers = #tpu.dot_dimension_numbers<[1], [0], [0], [1], [0, 0, 1, 1], [], []>} : vector<8x32xf32>, vector<32x32xf32>, vector<8x32xf32> -> vector<8x32xf32>
    %c1_349 = arith.constant 1 : index
    %c0_350 = arith.constant 0 : index
    %c0_351 = arith.constant 0 : index
    %445 = vector.load %arg15[%c1_349, %c0_350, %c0_351] : memref<2x1x32xf32, #tpu.memory_space<vmem>>, vector<1x1x32xf32>
    %446 = vector.shape_cast %445 : vector<1x1x32xf32> to vector<1x32xf32>
    %447 = vector.broadcast %446 : vector<1x32xf32> to vector<8x32xf32>
    %448 = arith.addf %444, %447 : vector<8x32xf32>
    %cst_352 = arith.constant 0.000000e+00 : f32
    %449 = vector.broadcast %cst_352 : f32 to vector<8x32xf32>
    %450 = arith.maximumf %448, %449 : vector<8x32xf32>
    %c1_353 = arith.constant 1 : index
    %c0_354 = arith.constant 0 : index
    %c0_355 = arith.constant 0 : index
    %451 = vector.load %arg16[%c1_353, %c0_354, %c0_355] : memref<2x32x32xf32, #tpu.memory_space<vmem>>, vector<1x32x32xf32>
    %452 = vector.shape_cast %451 : vector<1x32x32xf32> to vector<32x32xf32>
    %cst_356 = arith.constant dense<0.000000e+00> : vector<8x32xf32>
    %453 = tpu.matmul %450, %452, %cst_356 {dimension_numbers = #tpu.dot_dimension_numbers<[1], [0], [0], [1], [0, 0, 1, 1], [], []>} : vector<8x32xf32>, vector<32x32xf32>, vector<8x32xf32> -> vector<8x32xf32>
    %c1_357 = arith.constant 1 : index
    %c0_358 = arith.constant 0 : index
    %c0_359 = arith.constant 0 : index
    %454 = vector.load %arg17[%c1_357, %c0_358, %c0_359] : memref<2x1x32xf32, #tpu.memory_space<vmem>>, vector<1x1x32xf32>
    %455 = vector.shape_cast %454 : vector<1x1x32xf32> to vector<1x32xf32>
    %456 = vector.broadcast %455 : vector<1x32xf32> to vector<8x32xf32>
    %457 = arith.addf %453, %456 : vector<8x32xf32>
    %458 = arith.addf %441, %457 : vector<8x32xf32>
    %c1_360 = arith.constant 1 : index
    %c0_361 = arith.constant 0 : index
    %c0_362 = arith.constant 0 : index
    %459 = vector.load %arg18[%c1_360, %c0_361, %c0_362] : memref<2x1x32xf32, #tpu.memory_space<vmem>>, vector<1x1x32xf32>
    %460 = vector.shape_cast %459 : vector<1x1x32xf32> to vector<1x32xf32>
    %c1_363 = arith.constant 1 : index
    %c0_364 = arith.constant 0 : index
    %c0_365 = arith.constant 0 : index
    %461 = vector.load %arg19[%c1_363, %c0_364, %c0_365] : memref<2x1x32xf32, #tpu.memory_space<vmem>>, vector<1x1x32xf32>
    %462 = vector.shape_cast %461 : vector<1x1x32xf32> to vector<1x32xf32>
    %cst_366 = arith.constant dense<0.000000e+00> : vector<8xf32>
    %463 = vector.multi_reduction <add>, %458, %cst_366 [1] : vector<8x32xf32> to vector<8xf32>
    %464 = vector.shape_cast %463 : vector<8xf32> to vector<8x1xf32>
    %cst_367 = arith.constant 3.200000e+01 : f32
    %465 = vector.broadcast %cst_367 : f32 to vector<8x1xf32>
    %466 = arith.divf %464, %465 : vector<8x1xf32>
    %467 = vector.broadcast %466 : vector<8x1xf32> to vector<8x32xf32>
    %468 = arith.subf %458, %467 : vector<8x32xf32>
    %469 = arith.mulf %468, %468 : vector<8x32xf32>
    %cst_368 = arith.constant dense<0.000000e+00> : vector<8xf32>
    %470 = vector.multi_reduction <add>, %469, %cst_368 [1] : vector<8x32xf32> to vector<8xf32>
    %471 = vector.shape_cast %470 : vector<8xf32> to vector<8x1xf32>
    %cst_369 = arith.constant 3.200000e+01 : f32
    %472 = vector.broadcast %cst_369 : f32 to vector<8x1xf32>
    %473 = arith.divf %471, %472 : vector<8x1xf32>
    %474 = vector.broadcast %466 : vector<8x1xf32> to vector<8x32xf32>
    %475 = arith.subf %458, %474 : vector<8x32xf32>
    %cst_370 = arith.constant 9.99999974E-6 : f32
    %476 = vector.broadcast %cst_370 : f32 to vector<8x1xf32>
    %477 = arith.addf %473, %476 : vector<8x1xf32>
    %478 = math.rsqrt %477 : vector<8x1xf32>
    %479 = vector.broadcast %478 : vector<8x1xf32> to vector<8x32xf32>
    %480 = arith.mulf %475, %479 : vector<8x32xf32>
    %481 = vector.broadcast %460 : vector<1x32xf32> to vector<8x32xf32>
    %482 = arith.mulf %480, %481 : vector<8x32xf32>
    %483 = vector.broadcast %462 : vector<1x32xf32> to vector<8x32xf32>
    %484 = arith.addf %482, %483 : vector<8x32xf32>
    %c0_371 = arith.constant 0 : index
    %c0_372 = arith.constant 0 : index
    %485 = vector.load %arg20[%c0_371, %c0_372] : memref<32x128xf32, #tpu.memory_space<vmem>>, vector<32x128xf32>
    %cst_373 = arith.constant dense<0.000000e+00> : vector<8x128xf32>
    %486 = tpu.matmul %484, %485, %cst_373 {dimension_numbers = #tpu.dot_dimension_numbers<[1], [0], [0], [1], [0, 0, 1, 1], [], []>} : vector<8x32xf32>, vector<32x128xf32>, vector<8x128xf32> -> vector<8x128xf32>
    %c0_374 = arith.constant 0 : index
    %c0_375 = arith.constant 0 : index
    %487 = vector.load %arg21[%c0_374, %c0_375] : memref<1x128xf32, #tpu.memory_space<vmem>>, vector<1x128xf32>
    %488 = vector.broadcast %487 : vector<1x128xf32> to vector<8x128xf32>
    %489 = arith.addf %486, %488 : vector<8x128xf32>
    %490 = vector.shape_cast %489 : vector<8x128xf32> to vector<1x8x128xf32>
    %c0_376 = arith.constant 0 : index
    %c0_377 = arith.constant 0 : index
    %c0_378 = arith.constant 0 : index
    %491 = vector.load %arg22[%c0_376, %c0_377, %c0_378] : memref<1x8x128xf32, #tpu.memory_space<vmem>>, vector<1x8x128xf32>
    tpu.vector_store %arg22[%c0_376, %c0_377, %c0_378], %490 {strides = array<i32>} : memref<1x8x128xf32, #tpu.memory_space<vmem>>, vector<1x8x128xf32>,
    return
  }
  func.func @transform_0(%arg0: i32) -> (i32, i32, i32) {
    %c0_i32 = arith.constant 0 : i32
    %c0_i32_0 = arith.constant 0 : i32
    %c0_i32_1 = arith.constant 0 : i32
    return %arg0, %c0_i32, %c0_i32_0 : i32, i32, i32
  }
  func.func @transform_1(%arg0: i32) -> (i32, i32) {
    %c0_i32 = arith.constant 0 : i32
    %c0_i32_0 = arith.constant 0 : i32
    %c0_i32_1 = arith.constant 0 : i32
    return %c0_i32, %c0_i32_0 : i32, i32
  }
  func.func @transform_2(%arg0: i32) -> (i32, i32) {
    %c0_i32 = arith.constant 0 : i32
    %c0_i32_0 = arith.constant 0 : i32
    %c0_i32_1 = arith.constant 0 : i32
    return %c0_i32, %c0_i32_0 : i32, i32
  }
  func.func @transform_3(%arg0: i32) -> (i32, i32, i32, i32) {
    %c0_i32 = arith.constant 0 : i32
    %c0_i32_0 = arith.constant 0 : i32
    %c0_i32_1 = arith.constant 0 : i32
    %c0_i32_2 = arith.constant 0 : i32
    %c0_i32_3 = arith.constant 0 : i32
    return %c0_i32, %c0_i32_0, %c0_i32_1, %c0_i32_2 : i32, i32, i32, i32
  }
  func.func @transform_4(%arg0: i32) -> (i32, i32, i32, i32) {
    %c0_i32 = arith.constant 0 : i32
    %c0_i32_0 = arith.constant 0 : i32
    %c0_i32_1 = arith.constant 0 : i32
    %c0_i32_2 = arith.constant 0 : i32
    %c0_i32_3 = arith.constant 0 : i32
    return %c0_i32, %c0_i32_0, %c0_i32_1, %c0_i32_2 : i32, i32, i32, i32
  }
  func.func @transform_5(%arg0: i32) -> (i32, i32, i32, i32) {
    %c0_i32 = arith.constant 0 : i32
    %c0_i32_0 = arith.constant 0 : i32
    %c0_i32_1 = arith.constant 0 : i32
    %c0_i32_2 = arith.constant 0 : i32
    %c0_i32_3 = arith.constant 0 : i32
    return %c0_i32, %c0_i32_0, %c0_i32_1, %c0_i32_2 : i32, i32, i32, i32
  }
  func.func @transform_6(%arg0: i32) -> (i32, i32, i32, i32) {
    %c0_i32 = arith.constant 0 : i32
    %c0_i32_0 = arith.constant 0 : i32
    %c0_i32_1 = arith.constant 0 : i32
    %c0_i32_2 = arith.constant 0 : i32
    %c0_i32_3 = arith.constant 0 : i32
    return %c0_i32, %c0_i32_0, %c0_i32_1, %c0_i32_2 : i32, i32, i32, i32
  }
  func.func @transform_7(%arg0: i32) -> (i32, i32, i32, i32) {
    %c0_i32 = arith.constant 0 : i32
    %c0_i32_0 = arith.constant 0 : i32
    %c0_i32_1 = arith.constant 0 : i32
    %c0_i32_2 = arith.constant 0 : i32
    %c0_i32_3 = arith.constant 0 : i32
    return %c0_i32, %c0_i32_0, %c0_i32_1, %c0_i32_2 : i32, i32, i32, i32
  }
  func.func @transform_8(%arg0: i32) -> (i32, i32, i32, i32) {
    %c0_i32 = arith.constant 0 : i32
    %c0_i32_0 = arith.constant 0 : i32
    %c0_i32_1 = arith.constant 0 : i32
    %c0_i32_2 = arith.constant 0 : i32
    %c0_i32_3 = arith.constant 0 : i32
    return %c0_i32, %c0_i32_0, %c0_i32_1, %c0_i32_2 : i32, i32, i32, i32
  }
  func.func @transform_9(%arg0: i32) -> (i32, i32, i32, i32) {
    %c0_i32 = arith.constant 0 : i32
    %c0_i32_0 = arith.constant 0 : i32
    %c0_i32_1 = arith.constant 0 : i32
    %c0_i32_2 = arith.constant 0 : i32
    %c0_i32_3 = arith.constant 0 : i32
    return %c0_i32, %c0_i32_0, %c0_i32_1, %c0_i32_2 : i32, i32, i32, i32
  }
  func.func @transform_10(%arg0: i32) -> (i32, i32, i32) {
    %c0_i32 = arith.constant 0 : i32
    %c0_i32_0 = arith.constant 0 : i32
    %c0_i32_1 = arith.constant 0 : i32
    %c0_i32_2 = arith.constant 0 : i32
    return %c0_i32, %c0_i32_0, %c0_i32_1 : i32, i32, i32
  }
  func.func @transform_11(%arg0: i32) -> (i32, i32, i32) {
    %c0_i32 = arith.constant 0 : i32
    %c0_i32_0 = arith.constant 0 : i32
    %c0_i32_1 = arith.constant 0 : i32
    %c0_i32_2 = arith.constant 0 : i32
    return %c0_i32, %c0_i32_0, %c0_i32_1 : i32, i32, i32
  }
  func.func @transform_12(%arg0: i32) -> (i32, i32, i32) {
    %c0_i32 = arith.constant 0 : i32
    %c0_i32_0 = arith.constant 0 : i32
    %c0_i32_1 = arith.constant 0 : i32
    %c0_i32_2 = arith.constant 0 : i32
    return %c0_i32, %c0_i32_0, %c0_i32_1 : i32, i32, i32
  }
  func.func @transform_13(%arg0: i32) -> (i32, i32, i32) {
    %c0_i32 = arith.constant 0 : i32
    %c0_i32_0 = arith.constant 0 : i32
    %c0_i32_1 = arith.constant 0 : i32
    %c0_i32_2 = arith.constant 0 : i32
    return %c0_i32, %c0_i32_0, %c0_i32_1 : i32, i32, i32
  }
  func.func @transform_14(%arg0: i32) -> (i32, i32, i32) {
    %c0_i32 = arith.constant 0 : i32
    %c0_i32_0 = arith.constant 0 : i32
    %c0_i32_1 = arith.constant 0 : i32
    %c0_i32_2 = arith.constant 0 : i32
    return %c0_i32, %c0_i32_0, %c0_i32_1 : i32, i32, i32
  }
  func.func @transform_15(%arg0: i32) -> (i32, i32, i32) {
    %c0_i32 = arith.constant 0 : i32
    %c0_i32_0 = arith.constant 0 : i32
    %c0_i32_1 = arith.constant 0 : i32
    %c0_i32_2 = arith.constant 0 : i32
    return %c0_i32, %c0_i32_0, %c0_i32_1 : i32, i32, i32
  }
  func.func @transform_16(%arg0: i32) -> (i32, i32, i32) {
    %c0_i32 = arith.constant 0 : i32
    %c0_i32_0 = arith.constant 0 : i32
    %c0_i32_1 = arith.constant 0 : i32
    %c0_i32_2 = arith.constant 0 : i32
    return %c0_i32, %c0_i32_0, %c0_i32_1 : i32, i32, i32
  }
  func.func @transform_17(%arg0: i32) -> (i32, i32, i32) {
    %c0_i32 = arith.constant 0 : i32
    %c0_i32_0 = arith.constant 0 : i32
    %c0_i32_1 = arith.constant 0 : i32
    %c0_i32_2 = arith.constant 0 : i32
    return %c0_i32, %c0_i32_0, %c0_i32_1 : i32, i32, i32
  }
  func.func @transform_18(%arg0: i32) -> (i32, i32, i32) {
    %c0_i32 = arith.constant 0 : i32
    %c0_i32_0 = arith.constant 0 : i32
    %c0_i32_1 = arith.constant 0 : i32
    %c0_i32_2 = arith.constant 0 : i32
    return %c0_i32, %c0_i32_0, %c0_i32_1 : i32, i32, i32
  }
  func.func @transform_19(%arg0: i32) -> (i32, i32) {
    %c0_i32 = arith.constant 0 : i32
    %c0_i32_0 = arith.constant 0 : i32
    %c0_i32_1 = arith.constant 0 : i32
    return %c0_i32, %c0_i32_0 : i32, i32
  }
  func.func @transform_20(%arg0: i32) -> (i32, i32) {
    %c0_i32 = arith.constant 0 : i32
    %c0_i32_0 = arith.constant 0 : i32
    %c0_i32_1 = arith.constant 0 : i32
    return %c0_i32, %c0_i32_0 : i32, i32
  }
  func.func @transform_21(%arg0: i32) -> (i32, i32, i32) {
    %c0_i32 = arith.constant 0 : i32
    %c0_i32_0 = arith.constant 0 : i32
    %c0_i32_1 = arith.constant 0 : i32
    return %arg0, %c0_i32, %c0_i32_0 : i32, i32, i32
  }
}

</mosaic_0001>

<bundles_post_ra>
// kernel: graph_transformer_forward.1
= control target key start
LH: loop header
LB: loop body
LE: loop exit
PB: predicated region body
PF: predicated region fallthrough
CT: control target
= control target key end

     0   :  { %s6670_s0 = inlined_call_operand.vmem [shape: f32[1,8,16], index: 0, kind: input, shape index: {}]   ;;  %s6671_s1 = inlined_call_operand.vmem [shape: f32[16,32], index: 1, kind: input, shape index: {}]   ;;  %s6672_s2 = inlined_call_operand.vmem [shape: f32[16,32], index: 2, kind: input, shape index: {}]   ;;  %s6673_s3 = inlined_call_operand.vmem [shape: f32[2,4,32,8], index: 3, kind: input, shape index: {}]   ;;  %s6674_s4 = inlined_call_operand.vmem [shape: f32[2,4,1,8], index: 4, kind: input, shape index: {}]   ;;  %s6675_s5 = inlined_call_operand.vmem [shape: f32[2,4,32,8], index: 5, kind: input, shape index: {}]   ;;  %s6676_s6 = inlined_call_operand.vmem [shape: f32[2,4,1,8], index: 6, kind: input, shape index: {}]   ;;  %s6677_s7 = inlined_call_operand.vmem [shape: f32[2,4,32,8], index: 7, kind: input, shape index: {}]   ;;  %s6678_s8 = inlined_call_operand.vmem [shape: f32[2,4,1,8], index: 8, kind: input, shape index: {}]   ;;  %s6679_s9 = inlined_call_operand.vmem [shape: f32[2,4,8,32], index: 9, kind: input, shape index: {}]   ;;  %s6680_s10 = inlined_call_operand.vmem [shape: f32[2,1,32], index: 10, kind: input, shape index: {}]   ;;  %s6681_s11 = inlined_call_operand.vmem [shape: f32[2,1,32], index: 11, kind: input, shape index: {}]   ;;  %s6682_s12 = inlined_call_operand.vmem [shape: f32[2,1,32], index: 12, kind: input, shape index: {}]   ;;  %s6683_s13 = inlined_call_operand.vmem [shape: f32[2,32,32], index: 13, kind: input, shape index: {}]   ;;  %s6684_s14 = inlined_call_operand.vmem [shape: f32[2,1,32], index: 14, kind: input, shape index: {}]   ;;  %s6685_s15 = inlined_call_operand.vmem [shape: f32[2,32,32], index: 15, kind: input, shape index: {}]   ;;  %s6686_s16 = inlined_call_operand.vmem [shape: f32[2,1,32], index: 16, kind: input, shape index: {}]   ;;  %s6687_s17 = inlined_call_operand.vmem [shape: f32[2,1,32], index: 17, kind: input, shape index: {}]   ;;  %s6688_s18 = inlined_call_operand.vmem [shape: f32[2,1,32], index: 18, kind: input, shape index: {}]   ;;  %s6689_s19 = inlined_call_operand.vmem [shape: f32[32,128], index: 19, kind: input, shape index: {}]   ;;  %s6690_s20 = inlined_call_operand.vmem [shape: f32[1,128], index: 20, kind: input, shape index: {}]   ;;  %s6691_s21 = inlined_call_operand.hbm [shape: f32[1,8,128], index: 21, kind: output, shape index: {}]  }
   0x1   :  { %6696 = sst [smem:[#allocation5_spill]] %s6670_s0 }
   0x2   :  { %6697 = sst [smem:[#allocation6_spill]] %s6671_s1 }
   0x3   :  { %6698 = sst [smem:[#allocation7_spill]] %s6672_s2 }
   0x4   :  { %6699 = sst [smem:[#allocation8_spill]] %s6673_s3 }
   0x5   :  { %6700 = sst [smem:[#allocation9_spill]] %s6674_s4 }
   0x6   :  { %6701 = sst [smem:[#allocation10_spill]] %s6675_s5 }
   0x7   :  { %s6702_s26 = sld [smem:[#allocation7_spill]]  ;;  %v5725_v2 = vmov 0.0|0.0   ;;  %vm5726_vm0 = vmmov 0   ;;  %v5727_v4 = vmov 0.0   ;;  %s6703_s0 = sld [smem:[#allocation8_spill]]  ;;  %vm72_vm1 = vcmask 130048  }
   0x8   :  { %5480 = vmatprep.subr.bf16.mxu0 %v5725_v2  ;;  %5038 = vmatprep.mubr.msk.f32.mxu0 %vm5726_vm0, %v5727_v4  ;;  %s6704_s23 = sld [smem:[#allocation10_spill]]  ;;  %s6705_s29 = sld [smem:[#allocation5_spill]] }
   0x9   :  { %5483 = vmatprep.subr.bf16.mxu1 %v5725_v2  ;;  %5049 = vmatprep.mubr.msk.f32.mxu1 %vm5726_vm0, %v5727_v4 }
   0xd   :  { %v70_v0 = vld [vmem:[%s6702_s26] sm:$0xff]  ;;  %v71_v1 = vld [vmem:[%s6702_s26 + $0x8] sm:$0xff]  ;;  %v157_v10 = vld [vmem:[%s6703_s0 + $0x10] sm:$0xff] }
   0xe   :  { %v5481_v3 = vpack.c.bf16 %v71_v1, %v70_v0  ;;  %v155_v5 = vld [vmem:[%s6703_s0] sm:$0xff]  ;;  %v156_v6 = vld [vmem:[%s6703_s0 + $0x8] sm:$0xff]  ;;  %v158_v11 = vld [vmem:[%s6703_s0 + $0x18] sm:$0xff] }
   0xf   :  { %v240_v7 = vld [vmem:[%s6704_s23] sm:$0xff]  ;;  %v5484_v8 = vpack.c.bf16 %v156_v6, %v155_v5  ;;  %v241_v9 = vld [vmem:[%s6704_s23 + $0x8] sm:$0xff] }
  0x10   :  { %5482 = vmatpush3.bf16.msra.mxu0 %v5481_v3  ;;  %v69_v12 = vld [vmem:[%s6705_s29] sm:$0xff]  ;;  %v5490_v13 = vpack.c.bf16 %v241_v9, %v240_v7 }
  0x11   :  { %26 = vsyncpa [#allocation3], 0  ;;  %5485 = vmatpush3.bf16.msra.mxu1 %v5484_v8  ;;  %5489 = vmatprep.subr.bf16.mxu0 %v5725_v2  ;;  %v5487_v14 = vpack.c.bf16 %v158_v11, %v157_v10  ;;  %v242_v15 = vld [vmem:[%s6704_s23 + $0x10] sm:$0xff]  ;;  %v243_v16 = vld [vmem:[%s6704_s23 + $0x18] sm:$0xff]  ;;  %s6706_s3 = sld [smem:[#allocation6_spill]]  ;;  %vm166_vm2 = vcmask 261120  }
  0x12   :  { %5486 = vmatprep.subr.bf16.mxu1 %v5725_v2  ;;  %v5493_v17 = vpack.c.bf16 %v243_v16, %v242_v15  ;;  %v321_v18 = vld [vmem:[%s6677_s7] sm:$0xff]  ;;  %v322_v19 = vld [vmem:[%s6677_s7 + $0x8] sm:$0xff]  ;;  %v323_v25 = vld [vmem:[%s6677_s7 + $0x10] sm:$0xff]  ;;  %vm402_vm3 = vcmask 64512   ;;  %s6707_s2 = sld [smem:[#allocation9_spill]]  ;;  %s5728_s30 = smov [#allocation2]  }
  0x13   :  { %5039 = vmatmul.mubr.msk.f32.vlgmr.msra.gmra.mrb[0].mxu0 %vm72_vm1, %v69_v12  ;;  %v5496_v22 = vpack.c.bf16 %v322_v19, %v321_v18  ;;  %v324_v26 = vld [vmem:[%s6677_s7 + $0x18] sm:$0xff]  ;;  %v4614_v28 = vld [vmem:[%s6676_s6] ss:$0 sm:$0xff]  ;;  %v4623_v51 = vld [vmem:[%s6703_s0 + $0x28] sm:$0xff] }
  0x14   :  { %5491 = vmatpush3.bf16.msra.mxu0 %v5490_v13  ;;  %5060 = vmatprep.mubr.msk.f32.mxu0 %vm5726_vm0, %v5727_v4  ;;  %v5499_v27 = vpack.c.bf16 %v324_v26, %v323_v25  ;;  %v4616_v36 = vld [vmem:[%s6678_s8] ss:$0 sm:$0xff]  ;;  %v4624_v55 = vld [vmem:[%s6703_s0 + $0x30] sm:$0xff]  ;;  %v4625_v56 = vld [vmem:[%s6703_s0 + $0x38] sm:$0xff] }
  0x15   :  { %5488 = vmatpush3.bf16.msra.mxu1 %v5487_v14  ;;  %5492 = vmatprep.subr.bf16.mxu0 %v5725_v2  ;;  %v563_v48 = vld [vmem:[%s6679_s9] sm:$0xff]  ;;  %v5505_v57 = vpack.c.bf16 %v4625_v56, %v4624_v55  ;;  %v4637_v59 = vld [vmem:[%s6677_s7 + $0x28] sm:$0xff]  ;;  %v4638_v61 = vld [vmem:[%s6677_s7 + $0x30] sm:$0xff] }
  0x16   :  { %5495 = vmatprep.subr.bf16.mxu1 %v5725_v2  ;;  %v4622_v50 = vld [vmem:[%s6703_s0 + $0x20] sm:$0xff]  ;;  %v4639_v62 = vld [vmem:[%s6677_s7 + $0x38] sm:$0xff]  ;;  %v4630_v1 = vld [vmem:[%s6704_s23 + $0x28] sm:$0xff] }
  0x17   :  { %v146_v20 = vld [vmem:[%s6706_s3] sm:$0xff]  ;;  %v5502_v53 = vpack.c.bf16 %v4623_v51, %v4622_v50  ;;  %v5517_v63 = vpack.c.bf16 %v4639_v62, %v4638_v61  ;;  %v4631_v5 = vld [vmem:[%s6704_s23 + $0x30] sm:$0xff]  ;;  %v4632_v6 = vld [vmem:[%s6704_s23 + $0x38] sm:$0xff] }
  0x18   :  { %5494 = vmatpush3.bf16.msra.mxu0 %v5493_v17  ;;  %v4612_v31 = vld [vmem:[%s6707_s2] ss:$0 sm:$0xff]  ;;  %v5511_v9 = vpack.c.bf16 %v4632_v6, %v4631_v5  ;;  %v4634_v16 = vld [vmem:[%s6676_s6 + $0x1] ss:$0 sm:$0xff]  ;;  %v4656_v50 = vld [vmem:[%s6704_s23 + $0x48] sm:$0xff] }
  0x19   :  { %5074 = vmatprep.subr.mxu0 %v5727_v4  ;;  %v4636_v58 = vld [vmem:[%s6677_s7 + $0x20] sm:$0xff] }
  0x1a   :  { %v5514_v60 = vpack.c.bf16 %v4637_v59, %v4636_v58  ;;  %v4629_v0 = vld [vmem:[%s6704_s23 + $0x20] sm:$0xff] }
  0x1b   :  { %v5508_v3 = vpack.c.bf16 %v4630_v1, %v4629_v0  ;;  %v4627_v18 = vld [vmem:[%s6707_s2 + $0x1] ss:$0 sm:$0xff]  ;;  %v4611_v61 = vld [vmem:[%s6680_s10] ss:$0 sm:$0xff]  ;;  %v4653_v6 = vld [vmem:[%s6707_s2 + $0x2] ss:$0 sm:$0xff] }
  0xe6   :  { %v142_v21 = vpop.f32.mrb[0].mxu0 }
  0xe7   :  { %v5894_v23 = vadd.f32 %v146_v20, %v142_v21  ;;  %v5040_v24 = vpop.f32.mrb[1].mxu0  ;;  %v4641_v21 = vld [vmem:[%s6678_s8 + $0x1] ss:$0 sm:$0xff] }
  0xe9   :  { %5050 = vmatmul.mubr.msk.f32.vlgmr.msra.gmra.mrb[0].mxu1 %vm166_vm2, %v5894_v23  ;;  %5061 = vmatmul.mubr.msk.f32.vlgmr.msra.gmra.mrb[2].mxu0 %vm166_vm2, %v5894_v23 }
  0xea   :  { %5497 = vmatpush3.bf16.msra.mxu1 %v5496_v22  ;;  %5071 = vmatprep.mubr.msk.f32.mxu1 %vm5726_vm0, %v5727_v4 }
  0xeb   :  { %5498 = vmatprep.subr.bf16.mxu1 %v5725_v2  ;;  %5076 = vmatprep.mubr.msk.f32.mxu0 %vm5726_vm0, %v5727_v4 }
  0xee   :  { %5500 = vmatpush3.bf16.msra.mxu1 %v5499_v27 }
  0xef   :  { %5084 = vmatprep.subr.mxu1 %v5727_v4 }
  0xf1   :  { %5072 = vmatmul.mubr.msk.f32.vlgmr.msra.gmra.mrb[2].mxu1 %vm166_vm2, %v5894_v23 }
  0xf2   :  { %5086 = vmatprep.mubr.msk.f32.mxu1 %vm5726_vm0, %v5727_v4  ;;  %5085 = vmatpush3.msra.mxu1 %v563_v48 }
  0xf3   :  { %5507 = vmatprep.subr.bf16.mxu1 %v5725_v2 }
 0x1bc   :  { %v236_v29 = vpop.f32.mrb[0].mxu1  ;;  %v317_v30 = vpop.f32.mrb[2].mxu0 }
 0x1bd   :  { %v318_v32 = vadd.f32 %v4614_v28, %v317_v30  ;;  %v5051_v33 = vpop.f32.mrb[1].mxu1  ;;  %v5062_v34 = vpop.f32.mrb[3].mxu0  ;;  %v237_v35 = vadd.f32 %v4612_v31, %v236_v29 }
 0x1be   :  { %v4646_v33 = vld [vmem:[%s6679_s9 + $0x8] sm:$0xff] }
 0x1bf   :  { %5075 = vmatpush3.xpose.msk.msra.mxu0 %vm402_vm3, %v318_v32 }
 0x1c0   :  { %5079 = vmatprep.subr.mxu0 %v5727_v4 }
 0x1c2   :  { %5077 = vmatmul.mubr.msk.f32.vlgmr.msra.gmra.mrb[4].mxu0 %vm402_vm3, %v237_v35  ;;  %v4648_v35 = vld [vmem:[%s6703_s0 + $0x40] sm:$0xff] }
 0x1c3   :  { %5081 = vmatprep.mubr.msk.f32.mxu0 %vm5726_vm0, %v5727_v4 }
 0x1c4   :  { %v398_v37 = vpop.f32.mrb[2].mxu1 }
 0x1c5   :  { %v399_v38 = vadd.f32 %v4616_v36, %v398_v37  ;;  %v5073_v39 = vpop.f32.mrb[3].mxu1  ;;  %v4649_v36 = vld [vmem:[%s6703_s0 + $0x48] sm:$0xff] }
 0x1c7   :  { %5080 = vmatpush3.msra.mxu0 %v399_v38  ;;  %v5520_v38 = vpack.c.bf16 %v4649_v36, %v4648_v35  ;;  %v4691_v35 = vld [vmem:[%s6677_s7 + $0x78] sm:$0xff] }
 0x1c8   :  { %5501 = vmatprep.subr.bf16.mxu0 %v5725_v2 }
 0x295   :  { %v475_v40 = vpop.f32.mrb[4].mxu0 }
 0x296   :  { %v5078_v41 = vpop.f32.mrb[5].mxu0  ;;  %v479_v42 = vsel %vm402_vm3, %v475_v40, -inf }
 0x297   :  { %480 = vmax.xlane.f32.xlu0 %v479_v42  ;;  %v4651_v41 = vld [vmem:[%s6703_s0 + $0x58] sm:$0xff] }
 0x324   :  { %v481_v43 = vpop.xlane.xlu0 %480 }
 0x325   :  { %v482_v44 = vsub.f32 %v475_v40, %v481_v43  ;;  %v4650_v40 = vld [vmem:[%s6703_s0 + $0x50] sm:$0xff]  ;;  %v4662_v43 = vld [vmem:[%s6677_s7 + $0x40] sm:$0xff] }
 0x326   :  { %v5523_v42 = vpack.c.bf16 %v4651_v41, %v4650_v40  ;;  %v4683_v40 = vld [vmem:[%s6704_s23 + $0x70] sm:$0xff]  ;;  %v4684_v41 = vld [vmem:[%s6704_s23 + $0x78] sm:$0xff] }
 0x327   :  { %v483_v45 = vmul.f32 1.442695, %v482_v44  ;;  %v4663_v44 = vld [vmem:[%s6677_s7 + $0x48] sm:$0xff] }
 0x329   :  { %5661 = vpow2.f32 %v483_v45  ;;  %v5532_v45 = vpack.c.bf16 %v4663_v44, %v4662_v43  ;;  %v5547_v44 = vpack.c.bf16 %v4684_v41, %v4683_v40  ;;  %v2211_v40 = vld [vmem:[%s6685_s15 + $0x10] sm:$0xff]  ;;  %v2212_v41 = vld [vmem:[%s6685_s15 + $0x18] sm:$0xff] }
 0x333   :  { %v5662_v46 = vpop.eup %5661 }
 0x334   :  { %v485_v47 = vsel %vm402_vm3, %v5662_v46, 0.0 }
 0x335   :  { %486 = vadd.xlane.f32.xlu0 %v485_v47  ;;  %v4665_v47 = vld [vmem:[%s6677_s7 + $0x58] sm:$0xff] }
 0x3c2   :  { %v487_v49 = vpop.xlane.xlu0 %486 }
 0x3c3   :  { %5663 = vrcp.f32 %v487_v49  ;;  %v4655_v49 = vld [vmem:[%s6704_s23 + $0x40] sm:$0xff] }
 0x3c4   :  { %v5526_v51 = vpack.c.bf16 %v4656_v50, %v4655_v49 }
 0x3cd   :  { %v5664_v52 = vpop.eup %5663 }
 0x3ce   :  { %v489_v54 = vmul.f32 %v5664_v52, %v5662_v46  ;;  %v4664_v46 = vld [vmem:[%s6677_s7 + $0x50] sm:$0xff] }
 0x3cf   :  { %v5535_v48 = vpack.c.bf16 %v4665_v47, %v4664_v46  ;;  %v4657_v52 = vld [vmem:[%s6704_s23 + $0x50] sm:$0xff] }
 0x3d0   :  { %5082 = vmatmul.mubr.msk.f32.vlgmr.msra.gmra.mrb[6].mxu0 %vm402_vm3, %v489_v54 }
 0x3d1   :  { %5503 = vmatpush3.bf16.msra.mxu0 %v5502_v53  ;;  %5097 = vmatprep.mubr.msk.f32.mxu0 %vm5726_vm0, %v5727_v4  ;;  %v4658_v53 = vld [vmem:[%s6704_s23 + $0x58] sm:$0xff] }
 0x3d2   :  { %5504 = vmatprep.subr.bf16.mxu0 %v5725_v2  ;;  %v5529_v56 = vpack.c.bf16 %v4658_v53, %v4657_v52  ;;  %v4686_v52 = vld [vmem:[%s6676_s6 + $0x3] ss:$0 sm:$0xff] }
 0x3d5   :  { %5506 = vmatpush3.bf16.msra.mxu0 %v5505_v57 }
 0x3d6   :  { %5513 = vmatprep.subr.bf16.mxu0 %v5725_v2 }
 0x3d8   :  { %5098 = vmatmul.mubr.msk.f32.vlgmr.msra.gmra.mrb[8].mxu0 %vm166_vm2, %v5894_v23 }
 0x3d9   :  { %5515 = vmatpush3.bf16.msra.mxu0 %v5514_v60  ;;  %5119 = vmatprep.mubr.msk.f32.mxu0 %vm5726_vm0, %v5727_v4 }
 0x3da   :  { %5516 = vmatprep.subr.bf16.mxu0 %v5725_v2 }
 0x3dd   :  { %5518 = vmatpush3.bf16.msra.mxu0 %v5517_v63 }
 0x3de   :  { %5132 = vmatprep.subr.mxu0 %v5727_v4 }
 0x3e0   :  { %5120 = vmatmul.mubr.msk.f32.vlgmr.msra.gmra.mrb[10].mxu0 %vm166_vm2, %v5894_v23 }
 0x3e1   :  { %5134 = vmatprep.mubr.msk.f32.mxu0 %vm5726_vm0, %v5727_v4  ;;  %5133 = vmatpush3.msra.mxu0 %v4646_v33 }
 0x3e2   :  { %5525 = vmatprep.subr.bf16.mxu0 %v5725_v2 }
 0x4a3   :  { %v559_v7 = vpop.f32.mrb[6].mxu0 }
 0x4a4   :  { %v5083_v8 = vpop.f32.mrb[7].mxu0  ;;  %5087 = vmatmul.mubr.msk.f32.vlgmr.msra.gmra.mrb[4].mxu1 %vm402_vm3, %v559_v7 }
 0x4a5   :  { %5509 = vmatpush3.bf16.msra.mxu1 %v5508_v3  ;;  %5108 = vmatprep.mubr.msk.f32.mxu1 %vm5726_vm0, %v5727_v4  ;;  %v4660_v3 = vld [vmem:[%s6676_s6 + $0x2] ss:$0 sm:$0xff] }
 0x4a6   :  { %5510 = vmatprep.subr.bf16.mxu1 %v5725_v2 }
 0x4a9   :  { %5512 = vmatpush3.bf16.msra.mxu1 %v5511_v9  ;;  %v4667_v9 = vld [vmem:[%s6678_s8 + $0x2] ss:$0 sm:$0xff] }
 0x4aa   :  { %5122 = vmatprep.subr.mxu1 %v5727_v4 }
 0x4ab   :  { %v717_v10 = vpop.f32.mrb[8].mxu0 }
 0x4ac   :  { %v5099_v11 = vpop.f32.mrb[9].mxu0  ;;  %5109 = vmatmul.mubr.msk.f32.vlgmr.msra.gmra.mrb[6].mxu1 %vm166_vm2, %v5894_v23  ;;  %v718_v22 = vadd.f32 %v4627_v18, %v717_v10 }
 0x4ad   :  { %5124 = vmatprep.mubr.msk.f32.mxu1 %vm5726_vm0, %v5727_v4 }
 0x4b3   :  { %v883_v12 = vpop.f32.mrb[10].mxu0 }
 0x4b4   :  { %v5121_v13 = vpop.f32.mrb[11].mxu0  ;;  %v884_v24 = vadd.f32 %v4641_v21, %v883_v12 }
 0x577   :  { %v5997_v14 = vpop.f32.mrb[4].mxu1 }
 0x578   :  { %v5088_v15 = vpop.f32.mrb[5].mxu1  ;;  %v637_v62 = vadd.f32 %v4611_v61, %v5997_v14 }
 0x57f   :  { %v800_v17 = vpop.f32.mrb[6].mxu1 }
 0x580   :  { %v801_v19 = vadd.f32 %v4634_v16, %v800_v17  ;;  %v5110_v20 = vpop.f32.mrb[7].mxu1 }
 0x581   :  { %v4672_v20 = vld [vmem:[%s6679_s9 + $0x10] sm:$0xff] }
 0x582   :  { %5123 = vmatpush3.xpose.msk.msra.mxu1 %vm402_vm3, %v801_v19 }
 0x583   :  { %5127 = vmatprep.subr.mxu1 %v5727_v4 }
 0x585   :  { %5125 = vmatmul.mubr.msk.f32.vlgmr.msra.gmra.mrb[8].mxu1 %vm402_vm3, %v718_v22  ;;  %v4674_v22 = vld [vmem:[%s6703_s0 + $0x60] sm:$0xff] }
 0x586   :  { %5128 = vmatpush3.msra.mxu1 %v884_v24  ;;  %5129 = vmatprep.mubr.msk.f32.mxu1 %vm5726_vm0, %v5727_v4  ;;  %v4675_v24 = vld [vmem:[%s6703_s0 + $0x68] sm:$0xff] }
 0x587   :  { %5519 = vmatprep.subr.bf16.mxu1 %v5725_v2 }
 0x658   :  { %v959_v25 = vpop.f32.mrb[8].mxu1 }
 0x659   :  { %v5126_v26 = vpop.f32.mrb[9].mxu1  ;;  %v963_v27 = vsel %vm402_vm3, %v959_v25, -inf }
 0x65a   :  { %964 = vmax.xlane.f32.xlu1 %v963_v27  ;;  %v5538_v26 = vpack.c.bf16 %v4675_v24, %v4674_v22  ;;  %v2124_v22 = vld [vmem:[%s6683_s13] sm:$0xff]  ;;  %v2125_v24 = vld [vmem:[%s6683_s13 + $0x8] sm:$0xff] }
 0x6e7   :  { %v965_v28 = vpop.xlane.xlu1 %964 }
 0x6e8   :  { %v966_v29 = vsub.f32 %v959_v25, %v965_v28  ;;  %v4676_v28 = vld [vmem:[%s6703_s0 + $0x70] sm:$0xff] }
 0x6ea   :  { %v967_v30 = vmul.f32 1.442695, %v966_v29  ;;  %v4677_v29 = vld [vmem:[%s6703_s0 + $0x78] sm:$0xff] }
 0x6ec   :  { %5665 = vpow2.f32 %v967_v30  ;;  %v5541_v30 = vpack.c.bf16 %v4677_v29, %v4676_v28  ;;  %v2209_v28 = vld [vmem:[%s6685_s15] sm:$0xff]  ;;  %v2210_v29 = vld [vmem:[%s6685_s15 + $0x8] sm:$0xff] }
 0x6f6   :  { %v5666_v31 = vpop.eup %5665 }
 0x6f7   :  { %v969_v32 = vsel %vm402_vm3, %v5666_v31, 0.0 }
 0x6f8   :  { %970 = vadd.xlane.f32.xlu1 %v969_v32  ;;  %v4689_v32 = vld [vmem:[%s6677_s7 + $0x68] sm:$0xff] }
 0x785   :  { %v971_v34 = vpop.xlane.xlu1 %970 }
 0x786   :  { %5667 = vrcp.f32 %v971_v34  ;;  %v4690_v34 = vld [vmem:[%s6677_s7 + $0x70] sm:$0xff] }
 0x787   :  { %v5553_v36 = vpack.c.bf16 %v4691_v35, %v4690_v34  ;;  %v4700_v35 = vld [vmem:[%s6681_s11] ss:$0 sm:$0xff] }
 0x790   :  { %v5668_v37 = vpop.eup %5667 }
 0x791   :  { %v973_v39 = vmul.f32 %v5668_v37, %v5666_v31  ;;  %v4688_v31 = vld [vmem:[%s6677_s7 + $0x60] sm:$0xff] }
 0x792   :  { %v5550_v33 = vpack.c.bf16 %v4689_v32, %v4688_v31  ;;  %v4681_v37 = vld [vmem:[%s6704_s23 + $0x60] sm:$0xff] }
 0x793   :  { %5130 = vmatmul.mubr.msk.f32.vlgmr.msra.gmra.mrb[10].mxu1 %vm402_vm3, %v973_v39 }
 0x794   :  { %5521 = vmatpush3.bf16.msra.mxu1 %v5520_v38  ;;  %5145 = vmatprep.mubr.msk.f32.mxu1 %vm5726_vm0, %v5727_v4  ;;  %v4682_v38 = vld [vmem:[%s6704_s23 + $0x68] sm:$0xff] }
 0x795   :  { %5522 = vmatprep.subr.bf16.mxu1 %v5725_v2  ;;  %v5544_v39 = vpack.c.bf16 %v4682_v38, %v4681_v37  ;;  %v4701_v37 = vld [vmem:[%s6682_s12] ss:$0 sm:$0xff] }
 0x798   :  { %5524 = vmatpush3.bf16.msra.mxu1 %v5523_v42 }
 0x799   :  { %5531 = vmatprep.subr.bf16.mxu1 %v5725_v2 }
 0x79b   :  { %5146 = vmatmul.mubr.msk.f32.vlgmr.msra.gmra.mrb[12].mxu1 %vm166_vm2, %v5894_v23 }
 0x79c   :  { %5533 = vmatpush3.bf16.msra.mxu1 %v5532_v45  ;;  %5167 = vmatprep.mubr.msk.f32.mxu1 %vm5726_vm0, %v5727_v4 }
 0x79d   :  { %5534 = vmatprep.subr.bf16.mxu1 %v5725_v2 }
 0x7a0   :  { %5536 = vmatpush3.bf16.msra.mxu1 %v5535_v48 }
 0x7a1   :  { %5180 = vmatprep.subr.mxu1 %v5727_v4 }
 0x7a3   :  { %5168 = vmatmul.mubr.msk.f32.vlgmr.msra.gmra.mrb[14].mxu1 %vm166_vm2, %v5894_v23 }
 0x7a4   :  { %5182 = vmatprep.mubr.msk.f32.mxu1 %vm5726_vm0, %v5727_v4  ;;  %5181 = vmatpush3.msra.mxu1 %v4672_v20 }
 0x7a5   :  { %5543 = vmatprep.subr.bf16.mxu1 %v5725_v2 }
 0x866   :  { %v1043_v54 = vpop.f32.mrb[10].mxu1 }
 0x867   :  { %v5131_v55 = vpop.f32.mrb[11].mxu1  ;;  %5135 = vmatmul.mubr.msk.f32.vlgmr.msra.gmra.mrb[12].mxu0 %vm402_vm3, %v1043_v54  ;;  %v4679_v54 = vld [vmem:[%s6707_s2 + $0x3] ss:$0 sm:$0xff] }
 0x868   :  { %5527 = vmatpush3.bf16.msra.mxu0 %v5526_v51  ;;  %5156 = vmatprep.mubr.msk.f32.mxu0 %vm5726_vm0, %v5727_v4 }
 0x869   :  { %5528 = vmatprep.subr.bf16.mxu0 %v5725_v2 }
 0x86c   :  { %5530 = vmatpush3.bf16.msra.mxu0 %v5529_v56 }
 0x86d   :  { %5170 = vmatprep.subr.mxu0 %v5727_v4 }
 0x86e   :  { %v1202_v57 = vpop.f32.mrb[12].mxu1 }
 0x86f   :  { %v5147_v58 = vpop.f32.mrb[13].mxu1  ;;  %5157 = vmatmul.mubr.msk.f32.vlgmr.msra.gmra.mrb[14].mxu0 %vm166_vm2, %v5894_v23  ;;  %v1203_v10 = vadd.f32 %v4653_v6, %v1202_v57  ;;  %v4693_v57 = vld [vmem:[%s6678_s8 + $0x3] ss:$0 sm:$0xff]  ;;  %v4698_v6 = vld [vmem:[%s6679_s9 + $0x18] sm:$0xff] }
 0x870   :  { %5172 = vmatprep.mubr.msk.f32.mxu0 %vm5726_vm0, %v5727_v4 }
 0x876   :  { %v1368_v59 = vpop.f32.mrb[14].mxu1 }
 0x877   :  { %v5169_v60 = vpop.f32.mrb[15].mxu1  ;;  %v1369_v11 = vadd.f32 %v4667_v9, %v1368_v59 }
 0x93a   :  { %v1118_v63 = vpop.f32.mrb[12].mxu0 }
 0x93b   :  { %v6084_v0 = vadd.f32 %v1118_v63, %v637_v62  ;;  %v5136_v1 = vpop.f32.mrb[13].mxu0 }
 0x942   :  { %v1285_v5 = vpop.f32.mrb[14].mxu0 }
 0x943   :  { %v1286_v7 = vadd.f32 %v4660_v3, %v1285_v5  ;;  %v5158_v8 = vpop.f32.mrb[15].mxu0 }
 0x945   :  { %5171 = vmatpush3.xpose.msk.msra.mxu0 %vm402_vm3, %v1286_v7 }
 0x946   :  { %5175 = vmatprep.subr.mxu0 %v5727_v4 }
 0x948   :  { %5173 = vmatmul.mubr.msk.f32.vlgmr.msra.gmra.mrb[16].mxu0 %vm402_vm3, %v1203_v10 }
 0x949   :  { %5176 = vmatpush3.msra.mxu0 %v1369_v11  ;;  %5177 = vmatprep.mubr.msk.f32.mxu0 %vm5726_vm0, %v5727_v4 }
 0x94a   :  { %5537 = vmatprep.subr.bf16.mxu0 %v5725_v2 }
 0xa1b   :  { %v1444_v12 = vpop.f32.mrb[16].mxu0 }
 0xa1c   :  { %v5174_v13 = vpop.f32.mrb[17].mxu0  ;;  %v1448_v14 = vsel %vm402_vm3, %v1444_v12, -inf }
 0xa1d   :  { %1449 = vmax.xlane.f32.xlu0 %v1448_v14 }
 0xaaa   :  { %v1450_v15 = vpop.xlane.xlu0 %1449 }
 0xaab   :  { %v1451_v16 = vsub.f32 %v1444_v12, %v1450_v15 }
 0xaad   :  { %v1452_v17 = vmul.f32 1.442695, %v1451_v16 }
 0xaaf   :  { %5669 = vpow2.f32 %v1452_v17 }
 0xab9   :  { %v5670_v18 = vpop.eup %5669 }
 0xaba   :  { %v1454_v19 = vsel %vm402_vm3, %v5670_v18, 0.0 }
 0xabb   :  { %1455 = vadd.xlane.f32.xlu1 %v1454_v19 }
 0xb48   :  { %v1456_v21 = vpop.xlane.xlu1 %1455 }
 0xb49   :  { %5671 = vrcp.f32 %v1456_v21 }
 0xb53   :  { %v5672_v25 = vpop.eup %5671 }
 0xb54   :  { %v1458_v27 = vmul.f32 %v5672_v25, %v5670_v18  ;;  %v5556_v25 = vpack.c.bf16 %v2125_v24, %v2124_v22  ;;  %v4727_v22 = vld [vmem:[%s6677_s7 + $0x98] sm:$0xff] }
 0xb56   :  { %5178 = vmatmul.mubr.msk.f32.vlgmr.msra.gmra.mrb[18].mxu0 %vm402_vm3, %v1458_v27 }
 0xb57   :  { %5539 = vmatpush3.bf16.msra.mxu0 %v5538_v26  ;;  %5193 = vmatprep.mubr.msk.f32.mxu0 %vm5726_vm0, %v5727_v4  ;;  %v2127_v26 = vld [vmem:[%s6683_s13 + $0x18] sm:$0xff] }
 0xb58   :  { %5540 = vmatprep.subr.bf16.mxu0 %v5725_v2 }
 0xb5b   :  { %5542 = vmatpush3.bf16.msra.mxu0 %v5541_v30  ;;  %v5562_v30 = vpack.c.bf16 %v2210_v29, %v2209_v28 }
 0xb5c   :  { %5549 = vmatprep.subr.bf16.mxu0 %v5725_v2 }
 0xb5e   :  { %5194 = vmatmul.mubr.msk.f32.vlgmr.msra.gmra.mrb[20].mxu0 %vm166_vm2, %v5894_v23 }
 0xb5f   :  { %5551 = vmatpush3.bf16.msra.mxu0 %v5550_v33  ;;  %5215 = vmatprep.mubr.msk.f32.mxu0 %vm5726_vm0, %v5727_v4 }
 0xb60   :  { %5552 = vmatprep.subr.bf16.mxu0 %v5725_v2 }
 0xb63   :  { %5554 = vmatpush3.bf16.msra.mxu0 %v5553_v36 }
 0xb64   :  { %5228 = vmatprep.subr.mxu0 %v5727_v4 }
 0xb66   :  { %5216 = vmatmul.mubr.msk.f32.vlgmr.msra.gmra.mrb[22].mxu0 %vm166_vm2, %v5894_v23 }
 0xb67   :  { %5230 = vmatprep.mubr.msk.f32.mxu0 %vm5726_vm0, %v5727_v4  ;;  %5229 = vmatpush3.msra.mxu0 %v4698_v6  ;;  %v4719_v6 = vld [vmem:[%s6704_s23 + $0x90] sm:$0xff] }
 0xb68   :  { %5561 = vmatprep.subr.bf16.mxu0 %v5725_v2 }
 0xc29   :  { %v1528_v42 = vpop.f32.mrb[18].mxu0 }
 0xc2a   :  { %v5179_v43 = vpop.f32.mrb[19].mxu0  ;;  %5183 = vmatmul.mubr.msk.f32.vlgmr.msra.gmra.mrb[16].mxu1 %vm402_vm3, %v1528_v42  ;;  %v5565_v42 = vpack.c.bf16 %v2212_v41, %v2211_v40 }
 0xc2b   :  { %5545 = vmatpush3.bf16.msra.mxu1 %v5544_v39  ;;  %5204 = vmatprep.mubr.msk.f32.mxu1 %vm5726_vm0, %v5727_v4  ;;  %v4702_v43 = vld [vmem:[%s6684_s14] ss:$0 sm:$0xff] }
 0xc2c   :  { %5546 = vmatprep.subr.bf16.mxu1 %v5725_v2 }
 0xc2f   :  { %5548 = vmatpush3.bf16.msra.mxu1 %v5547_v44 }
 0xc30   :  { %5218 = vmatprep.subr.mxu1 %v5727_v4 }
 0xc31   :  { %v1687_v45 = vpop.f32.mrb[20].mxu0 }
 0xc32   :  { %v5195_v46 = vpop.f32.mrb[21].mxu0  ;;  %5205 = vmatmul.mubr.msk.f32.vlgmr.msra.gmra.mrb[18].mxu1 %vm166_vm2, %v5894_v23  ;;  %v1688_v58 = vadd.f32 %v4679_v54, %v1687_v45 }
 0xc33   :  { %5220 = vmatprep.mubr.msk.f32.mxu1 %vm5726_vm0, %v5727_v4 }
 0xc39   :  { %v1853_v47 = vpop.f32.mrb[22].mxu0 }
 0xc3a   :  { %v5217_v48 = vpop.f32.mrb[23].mxu0  ;;  %v1854_v59 = vadd.f32 %v4693_v57, %v1853_v47 }
 0xc3b   :  { %v4704_v48 = vld [vmem:[%s6686_s16] ss:$0 sm:$0xff] }
 0xcfd   :  { %v1603_v49 = vpop.f32.mrb[16].mxu1 }
 0xcfe   :  { %v1607_v50 = vadd.f32 %v1603_v49, %v6084_v0  ;;  %v5184_v51 = vpop.f32.mrb[17].mxu1 }
 0xd05   :  { %v1770_v53 = vpop.f32.mrb[18].mxu1 }
 0xd06   :  { %v1771_v55 = vadd.f32 %v4686_v52, %v1770_v53  ;;  %v5206_v56 = vpop.f32.mrb[19].mxu1 }
 0xd08   :  { %5219 = vmatpush3.xpose.msk.msra.mxu1 %vm402_vm3, %v1771_v55 }
 0xd09   :  { %5223 = vmatprep.subr.mxu1 %v5727_v4 }
 0xd0b   :  { %5221 = vmatmul.mubr.msk.f32.vlgmr.msra.gmra.mrb[20].mxu1 %vm402_vm3, %v1688_v58 }
 0xd0c   :  { %5224 = vmatpush3.msra.mxu1 %v1854_v59  ;;  %5225 = vmatprep.mubr.msk.f32.mxu1 %vm5726_vm0, %v5727_v4  ;;  %v4710_v59 = vld [vmem:[%s6703_s0 + $0x80] sm:$0xff] }
 0xd0d   :  { %5555 = vmatprep.subr.bf16.mxu1 %v5725_v2 }
 0xdde   :  { %v1929_v60 = vpop.f32.mrb[20].mxu1 }
 0xddf   :  { %v5222_v61 = vpop.f32.mrb[21].mxu1  ;;  %v1933_v62 = vsel %vm402_vm3, %v1929_v60, -inf }
 0xde0   :  { %1934 = vmax.xlane.f32.xlu0 %v1933_v62  ;;  %v4717_v62 = vld [vmem:[%s6704_s23 + $0x80] sm:$0xff] }
 0xe6d   :  { %v1935_v63 = vpop.xlane.xlu0 %1934 }
 0xe6e   :  { %v1936_v0 = vsub.f32 %v1929_v60, %v1935_v63  ;;  %v4711_v60 = vld [vmem:[%s6703_s0 + $0x88] sm:$0xff] }
 0xe6f   :  { %v5568_v61 = vpack.c.bf16 %v4711_v60, %v4710_v59  ;;  %v4718_v63 = vld [vmem:[%s6704_s23 + $0x88] sm:$0xff]  ;;  %v4743_v60 = vld [vmem:[%s6704_s23 + $0xa0] sm:$0xff] }
 0xe70   :  { %v1937_v1 = vmul.f32 1.442695, %v1936_v0  ;;  %v5574_v0 = vpack.c.bf16 %v4718_v63, %v4717_v62  ;;  %v4745_v63 = vld [vmem:[%s6704_s23 + $0xb0] sm:$0xff] }
 0xe72   :  { %5673 = vpow2.f32 %v1937_v1  ;;  %v4712_v1 = vld [vmem:[%s6703_s0 + $0x90] sm:$0xff] }
 0xe7c   :  { %v5674_v3 = vpop.eup %5673 }
 0xe7d   :  { %v1939_v5 = vsel %vm402_vm3, %v5674_v3, 0.0 }
 0xe7e   :  { %1940 = vadd.xlane.f32.xlu1 %v1939_v5 }
 0xf0b   :  { %v1941_v7 = vpop.xlane.xlu1 %1940 }
 0xf0c   :  { %5675 = vrcp.f32 %v1941_v7  ;;  %v4720_v7 = vld [vmem:[%s6704_s23 + $0x98] sm:$0xff] }
 0xf16   :  { %v5676_v8 = vpop.eup %5675 }
 0xf17   :  { %v1943_v9 = vmul.f32 %v5676_v8, %v5674_v3  ;;  %v4713_v3 = vld [vmem:[%s6703_s0 + $0x98] sm:$0xff]  ;;  %v5577_v8 = vpack.c.bf16 %v4720_v7, %v4719_v6 }
 0xf18   :  { %v5571_v5 = vpack.c.bf16 %v4713_v3, %v4712_v1 }
 0xf19   :  { %5226 = vmatmul.mubr.msk.f32.vlgmr.msra.gmra.mrb[22].mxu1 %vm402_vm3, %v1943_v9 }
 0xf1a   :  { %5241 = vmatprep.mubr.msk.f32.mxu1 %vm5726_vm0, %v5727_v4  ;;  %5557 = vmatpush3.bf16.msra.mxu1 %v5556_v25  ;;  %v4722_v25 = vld [vmem:[%s6676_s6 + $0x4] ss:$0 sm:$0xff] }
 0xf1b   :  { %5558 = vmatprep.subr.bf16.mxu1 %v5725_v2 }
 0xfec   :  { %v2013_v10 = vpop.f32.mrb[22].mxu1 }
 0xfed   :  { %v5227_v11 = vpop.f32.mrb[23].mxu1  ;;  %5231 = vmatmul.mubr.msk.f32.vlgmr.msra.gmra.mrb[24].mxu0 %vm402_vm3, %v2013_v10 }
 0xfee   :  { %5252 = vmatprep.mubr.msk.f32.mxu0 %vm5726_vm0, %v5727_v4  ;;  %5563 = vmatpush3.bf16.msra.mxu0 %v5562_v30 }
 0xfef   :  { %5564 = vmatprep.subr.bf16.mxu0 %v5725_v2 }
 0xff2   :  { %5566 = vmatpush3.bf16.msra.mxu0 %v5565_v42 }
 0xff3   :  { %5573 = vmatprep.subr.bf16.mxu0 %v5725_v2 }
0x10c0   :  { %v2088_v12 = vpop.f32.mrb[24].mxu0 }
0x10c1   :  { %v2092_v13 = vadd.f32 %v2088_v12, %v1607_v50  ;;  %v5232_v14 = vpop.f32.mrb[25].mxu0 }
0x10c3   :  { %v2093_v15 = vadd.f32 %v2092_v13, %v5894_v23  ;;  %v2126_v23 = vld [vmem:[%s6683_s13 + $0x10] sm:$0xff]  ;;  %v4706_v13 = vld [vmem:[%s6687_s17] ss:$0 sm:$0xff] }
0x10c4   :  { %v5559_v27 = vpack.c.bf16 %v2127_v26, %v2126_v23 }
0x10c5   :  { %v2096_v16 = vsel %vm166_vm2, %v2093_v15, 0.0 }
0x10c6   :  { %2097 = vadd.xlane.f32.xlu0 %v2096_v16  ;;  %5560 = vmatpush3.bf16.msra.mxu1 %v5559_v27  ;;  %v4725_v16 = vld [vmem:[%s6677_s7 + $0x88] sm:$0xff]  ;;  %v4715_v27 = vld [vmem:[%s6707_s2 + $0x4] ss:$0 sm:$0xff] }
0x10c7   :  { %5567 = vmatprep.subr.bf16.mxu1 %v5725_v2 }
0x1153   :  { %v2098_v17 = vpop.xlane.xlu0 %2097 }
0x1154   :  { %v2100_v18 = vmul.f32 0.03125, %v2098_v17  ;;  %v4707_v17 = vld [vmem:[%s6688_s18] ss:$0 sm:$0xff] }
0x1156   :  { %v2101_v19 = vsub.f32 %v2093_v15, %v2100_v18  ;;  %v4724_v15 = vld [vmem:[%s6677_s7 + $0x80] sm:$0xff] }
0x1158   :  { %v2102_v20 = vmul.f32 %v2101_v19, %v2101_v19 }
0x115a   :  { %v2103_v21 = vsel %vm166_vm2, %v2102_v20, 0.0 }
0x115b   :  { %2104 = vadd.xlane.f32.xlu1 %v2103_v21  ;;  %v4726_v21 = vld [vmem:[%s6677_s7 + $0x90] sm:$0xff] }
0x115c   :  { %v5583_v24 = vpack.c.bf16 %v4727_v22, %v4726_v21 }
0x11e8   :  { %v2105_v31 = vpop.xlane.xlu1 %2104 }
0x11e9   :  { %v2106_v32 = vmul.f32 0.03125, %v2105_v31 }
0x11eb   :  { %v2107_v33 = vadd.f32 1e-05, %v2106_v32  ;;  %v4729_v32 = vld [vmem:[%s6678_s8 + $0x4] ss:$0 sm:$0xff] }
0x11ed   :  { %5677 = vrsqrt.f32 %v2107_v33 }
0x11f7   :  { %v5678_v34 = vpop.eup %5677 }
0x11f8   :  { %v2109_v36 = vmul.f32 %v5678_v34, %v2101_v19  ;;  %v5580_v19 = vpack.c.bf16 %v4725_v16, %v4724_v15 }
0x11fa   :  { %v2116_v38 = vmul.f32 %v4700_v35, %v2109_v36 }
0x11fc   :  { %v2123_v39 = vadd.f32 %v4701_v37, %v2116_v38 }
0x11fe   :  { %5242 = vmatmul.mubr.msk.f32.vlgmr.msra.gmra.mrb[24].mxu1 %vm166_vm2, %v2123_v39 }
0x11ff   :  { %5263 = vmatprep.mubr.msk.f32.mxu1 %vm5726_vm0, %v5727_v4  ;;  %5569 = vmatpush3.bf16.msra.mxu1 %v5568_v61  ;;  %v4744_v61 = vld [vmem:[%s6704_s23 + $0xa8] sm:$0xff] }
0x1200   :  { %5570 = vmatprep.subr.bf16.mxu1 %v5725_v2  ;;  %v5592_v62 = vpack.c.bf16 %v4744_v61, %v4743_v60 }
0x1203   :  { %5572 = vmatpush3.bf16.msra.mxu1 %v5571_v5 }
0x1204   :  { %5579 = vmatprep.subr.bf16.mxu1 %v5725_v2 }
0x12d1   :  { %v2204_v44 = vpop.f32.mrb[24].mxu1 }
0x12d2   :  { %v2205_v45 = vadd.f32 %v4702_v43, %v2204_v44  ;;  %v5243_v46 = vpop.f32.mrb[25].mxu1  ;;  %v4734_v44 = vld [vmem:[%s6679_s9 + $0x20] sm:$0xff] }
0x12d3   :  { %v4736_v46 = vld [vmem:[%s6703_s0 + $0xa0] sm:$0xff] }
0x12d4   :  { %v2208_v47 = vmax.f32 %v2205_v45, 0.0 }
0x12d6   :  { %5253 = vmatmul.mubr.msk.f32.vlgmr.msra.gmra.mrb[26].mxu0 %vm166_vm2, %v2208_v47  ;;  %v4737_v47 = vld [vmem:[%s6703_s0 + $0xa8] sm:$0xff] }
0x12d7   :  { %5274 = vmatprep.mubr.msk.f32.mxu0 %vm5726_vm0, %v5727_v4  ;;  %5575 = vmatpush3.bf16.msra.mxu0 %v5574_v0  ;;  %v4746_v0 = vld [vmem:[%s6704_s23 + $0xb8] sm:$0xff] }
0x12d8   :  { %5576 = vmatprep.subr.bf16.mxu0 %v5725_v2  ;;  %v5595_v5 = vpack.c.bf16 %v4746_v0, %v4745_v63  ;;  %v4767_v0 = vld [vmem:[%s6707_s2 + $0x6] ss:$0 sm:$0xff] }
0x12db   :  { %5578 = vmatpush3.bf16.msra.mxu0 %v5577_v8 }
0x12dc   :  { %5288 = vmatprep.subr.mxu0 %v5727_v4 }
0x13a9   :  { %v2289_v49 = vpop.f32.mrb[26].mxu0 }
0x13aa   :  { %v2290_v50 = vadd.f32 %v4704_v48, %v2289_v49  ;;  %v5254_v51 = vpop.f32.mrb[27].mxu0  ;;  %v5586_v49 = vpack.c.bf16 %v4737_v47, %v4736_v46  ;;  %v4770_v46 = vld [vmem:[%s6704_s23 + $0xc8] sm:$0xff] }
0x13ab   :  { %v4738_v51 = vld [vmem:[%s6703_s0 + $0xb0] sm:$0xff] }
0x13ac   :  { %v2293_v52 = vadd.f32 %v2290_v50, %v2123_v39 }
0x13ae   :  { %v2296_v53 = vsel %vm166_vm2, %v2293_v52, 0.0 }
0x13af   :  { %2297 = vadd.xlane.f32.xlu0 %v2296_v53 }
0x143c   :  { %v2298_v54 = vpop.xlane.xlu0 %2297 }
0x143d   :  { %v2299_v55 = vmul.f32 0.03125, %v2298_v54  ;;  %v4750_v54 = vld [vmem:[%s6677_s7 + $0xa0] sm:$0xff] }
0x143f   :  { %v2300_v56 = vsub.f32 %v2293_v52, %v2299_v55  ;;  %v4739_v52 = vld [vmem:[%s6703_s0 + $0xb8] sm:$0xff]  ;;  %v4751_v55 = vld [vmem:[%s6677_s7 + $0xa8] sm:$0xff] }
0x1440   :  { %v5589_v53 = vpack.c.bf16 %v4739_v52, %v4738_v51 }
0x1441   :  { %v2301_v57 = vmul.f32 %v2300_v56, %v2300_v56 }
0x1443   :  { %v2302_v58 = vsel %vm166_vm2, %v2301_v57, 0.0  ;;  %v4752_v57 = vld [vmem:[%s6677_s7 + $0xb0] sm:$0xff] }
0x1444   :  { %2303 = vadd.xlane.f32.xlu1 %v2302_v58  ;;  %v4753_v58 = vld [vmem:[%s6677_s7 + $0xb8] sm:$0xff] }
0x1445   :  { %v5601_v59 = vpack.c.bf16 %v4753_v58, %v4752_v57  ;;  %v4709_v57 = vld [vmem:[%s6680_s10 + $0x1] ss:$0 sm:$0xff] }
0x14d1   :  { %v2304_v9 = vpop.xlane.xlu1 %2303 }
0x14d2   :  { %v2305_v10 = vmul.f32 0.03125, %v2304_v9 }
0x14d4   :  { %v2306_v11 = vadd.f32 1e-05, %v2305_v10 }
0x14d6   :  { %5679 = vrsqrt.f32 %v2306_v11 }
0x14e0   :  { %v5680_v12 = vpop.eup %5679 }
0x14e1   :  { %v2308_v14 = vmul.f32 %v5680_v12, %v2300_v56  ;;  %v5598_v56 = vpack.c.bf16 %v4751_v55, %v4750_v54  ;;  %v4748_v12 = vld [vmem:[%s6676_s6 + $0x5] ss:$0 sm:$0xff] }
0x14e3   :  { %v2315_v18 = vmul.f32 %v4706_v13, %v2308_v14  ;;  %v4741_v14 = vld [vmem:[%s6707_s2 + $0x5] ss:$0 sm:$0xff] }
0x14e5   :  { %v6286_v20 = vadd.f32 %v4707_v17, %v2315_v18  ;;  %v4755_v17 = vld [vmem:[%s6678_s8 + $0x5] ss:$0 sm:$0xff] }
0x14e7   :  { %5264 = vmatmul.mubr.msk.f32.vlgmr.msra.gmra.mrb[26].mxu1 %vm166_vm2, %v6286_v20  ;;  %5275 = vmatmul.mubr.msk.f32.vlgmr.msra.gmra.mrb[28].mxu0 %vm166_vm2, %v6286_v20 }
0x14e8   :  { %5581 = vmatpush3.bf16.msra.mxu1 %v5580_v19  ;;  %5285 = vmatprep.mubr.msk.f32.mxu1 %vm5726_vm0, %v5727_v4 }
0x14e9   :  { %5582 = vmatprep.subr.bf16.mxu1 %v5725_v2  ;;  %5290 = vmatprep.mubr.msk.f32.mxu0 %vm5726_vm0, %v5727_v4 }
0x14ec   :  { %5584 = vmatpush3.bf16.msra.mxu1 %v5583_v24 }
0x14ed   :  { %5298 = vmatprep.subr.mxu1 %v5727_v4 }
0x14ef   :  { %5286 = vmatmul.mubr.msk.f32.vlgmr.msra.gmra.mrb[28].mxu1 %vm166_vm2, %v6286_v20 }
0x14f0   :  { %5300 = vmatprep.mubr.msk.f32.mxu1 %vm5726_vm0, %v5727_v4  ;;  %5299 = vmatpush3.msra.mxu1 %v4734_v44 }
0x14f1   :  { %5591 = vmatprep.subr.bf16.mxu1 %v5725_v2 }
0x15ba   :  { %v2413_v23 = vpop.f32.mrb[26].mxu1  ;;  %v2496_v26 = vpop.f32.mrb[28].mxu0 }
0x15bb   :  { %v2497_v28 = vadd.f32 %v4722_v25, %v2496_v26  ;;  %v5265_v29 = vpop.f32.mrb[27].mxu1  ;;  %v5276_v30 = vpop.f32.mrb[29].mxu0  ;;  %v2414_v31 = vadd.f32 %v4715_v27, %v2413_v23 }
0x15bc   :  { %v4760_v29 = vld [vmem:[%s6679_s9 + $0x28] sm:$0xff] }
0x15bd   :  { %5289 = vmatpush3.xpose.msk.msra.mxu0 %vm402_vm3, %v2497_v28 }
0x15be   :  { %5293 = vmatprep.subr.mxu0 %v5727_v4 }
0x15c0   :  { %5291 = vmatmul.mubr.msk.f32.vlgmr.msra.gmra.mrb[30].mxu0 %vm402_vm3, %v2414_v31  ;;  %v4762_v31 = vld [vmem:[%s6703_s0 + $0xc0] sm:$0xff] }
0x15c1   :  { %5295 = vmatprep.mubr.msk.f32.mxu0 %vm5726_vm0, %v5727_v4 }
0x15c2   :  { %v2579_v33 = vpop.f32.mrb[28].mxu1 }
0x15c3   :  { %v2580_v34 = vadd.f32 %v4729_v32, %v2579_v33  ;;  %v5287_v35 = vpop.f32.mrb[29].mxu1  ;;  %v4763_v32 = vld [vmem:[%s6703_s0 + $0xc8] sm:$0xff] }
0x15c5   :  { %5294 = vmatpush3.msra.mxu0 %v2580_v34  ;;  %v5604_v34 = vpack.c.bf16 %v4763_v32, %v4762_v31  ;;  %v4805_v31 = vld [vmem:[%s6677_s7 + $0xf8] sm:$0xff] }
0x15c6   :  { %5585 = vmatprep.subr.bf16.mxu0 %v5725_v2 }
0x1693   :  { %v2655_v36 = vpop.f32.mrb[30].mxu0 }
0x1694   :  { %v5292_v37 = vpop.f32.mrb[31].mxu0  ;;  %v2659_v38 = vsel %vm402_vm3, %v2655_v36, -inf }
0x1695   :  { %2660 = vmax.xlane.f32.xlu0 %v2659_v38  ;;  %v4765_v37 = vld [vmem:[%s6703_s0 + $0xd8] sm:$0xff] }
0x1722   :  { %v2661_v39 = vpop.xlane.xlu0 %2660 }
0x1723   :  { %v2662_v40 = vsub.f32 %v2655_v36, %v2661_v39  ;;  %v4764_v36 = vld [vmem:[%s6703_s0 + $0xd0] sm:$0xff]  ;;  %v4776_v39 = vld [vmem:[%s6677_s7 + $0xc0] sm:$0xff] }
0x1724   :  { %v5607_v38 = vpack.c.bf16 %v4765_v37, %v4764_v36  ;;  %v4797_v36 = vld [vmem:[%s6704_s23 + $0xf0] sm:$0xff]  ;;  %v4798_v37 = vld [vmem:[%s6704_s23 + $0xf8] sm:$0xff] }
0x1725   :  { %v2663_v41 = vmul.f32 1.442695, %v2662_v40  ;;  %v4777_v40 = vld [vmem:[%s6677_s7 + $0xc8] sm:$0xff] }
0x1727   :  { %5681 = vpow2.f32 %v2663_v41  ;;  %v5616_v41 = vpack.c.bf16 %v4777_v40, %v4776_v39  ;;  %v5631_v40 = vpack.c.bf16 %v4798_v37, %v4797_v36  ;;  %v4827_v36 = vld [vmem:[%s6685_s15 + $0x30] sm:$0xff]  ;;  %v4828_v37 = vld [vmem:[%s6685_s15 + $0x38] sm:$0xff] }
0x1731   :  { %v5682_v42 = vpop.eup %5681 }
0x1732   :  { %v2665_v43 = vsel %vm402_vm3, %v5682_v42, 0.0 }
0x1733   :  { %2666 = vadd.xlane.f32.xlu1 %v2665_v43  ;;  %v4779_v43 = vld [vmem:[%s6677_s7 + $0xd8] sm:$0xff] }
0x17c0   :  { %v2667_v45 = vpop.xlane.xlu1 %2666 }
0x17c1   :  { %5683 = vrcp.f32 %v2667_v45  ;;  %v4769_v45 = vld [vmem:[%s6704_s23 + $0xc0] sm:$0xff] }
0x17c2   :  { %v5610_v47 = vpack.c.bf16 %v4770_v46, %v4769_v45 }
0x17cb   :  { %v5684_v48 = vpop.eup %5683 }
0x17cc   :  { %v2669_v50 = vmul.f32 %v5684_v48, %v5682_v42  ;;  %v4778_v42 = vld [vmem:[%s6677_s7 + $0xd0] sm:$0xff] }
0x17cd   :  { %v5619_v44 = vpack.c.bf16 %v4779_v43, %v4778_v42  ;;  %v4771_v48 = vld [vmem:[%s6704_s23 + $0xd0] sm:$0xff] }
0x17ce   :  { %5296 = vmatmul.mubr.msk.f32.vlgmr.msra.gmra.mrb[32].mxu0 %vm402_vm3, %v2669_v50 }
0x17cf   :  { %5587 = vmatpush3.bf16.msra.mxu0 %v5586_v49  ;;  %5311 = vmatprep.mubr.msk.f32.mxu0 %vm5726_vm0, %v5727_v4  ;;  %v4772_v49 = vld [vmem:[%s6704_s23 + $0xd8] sm:$0xff] }
0x17d0   :  { %5588 = vmatprep.subr.bf16.mxu0 %v5725_v2  ;;  %v5613_v52 = vpack.c.bf16 %v4772_v49, %v4771_v48  ;;  %v4800_v48 = vld [vmem:[%s6676_s6 + $0x7] ss:$0 sm:$0xff] }
0x17d3   :  { %5590 = vmatpush3.bf16.msra.mxu0 %v5589_v53 }
0x17d4   :  { %5597 = vmatprep.subr.bf16.mxu0 %v5725_v2 }
0x17d6   :  { %5312 = vmatmul.mubr.msk.f32.vlgmr.msra.gmra.mrb[34].mxu0 %vm166_vm2, %v6286_v20 }
0x17d7   :  { %5599 = vmatpush3.bf16.msra.mxu0 %v5598_v56  ;;  %5333 = vmatprep.mubr.msk.f32.mxu0 %vm5726_vm0, %v5727_v4 }
0x17d8   :  { %5600 = vmatprep.subr.bf16.mxu0 %v5725_v2 }
0x17db   :  { %5602 = vmatpush3.bf16.msra.mxu0 %v5601_v59 }
0x17dc   :  { %5346 = vmatprep.subr.mxu0 %v5727_v4 }
0x17de   :  { %5334 = vmatmul.mubr.msk.f32.vlgmr.msra.gmra.mrb[36].mxu0 %vm166_vm2, %v6286_v20 }
0x17df   :  { %5348 = vmatprep.mubr.msk.f32.mxu0 %vm5726_vm0, %v5727_v4  ;;  %5347 = vmatpush3.msra.mxu0 %v4760_v29 }
0x17e0   :  { %5609 = vmatprep.subr.bf16.mxu0 %v5725_v2 }
0x18a1   :  { %v2739_v1 = vpop.f32.mrb[32].mxu0 }
0x18a2   :  { %v5297_v3 = vpop.f32.mrb[33].mxu0  ;;  %5301 = vmatmul.mubr.msk.f32.vlgmr.msra.gmra.mrb[30].mxu1 %vm402_vm3, %v2739_v1 }
0x18a3   :  { %5593 = vmatpush3.bf16.msra.mxu1 %v5592_v62  ;;  %5322 = vmatprep.mubr.msk.f32.mxu1 %vm5726_vm0, %v5727_v4  ;;  %v4774_v62 = vld [vmem:[%s6676_s6 + $0x6] ss:$0 sm:$0xff] }
0x18a4   :  { %5594 = vmatprep.subr.bf16.mxu1 %v5725_v2 }
0x18a7   :  { %5596 = vmatpush3.bf16.msra.mxu1 %v5595_v5  ;;  %v4781_v5 = vld [vmem:[%s6678_s8 + $0x6] ss:$0 sm:$0xff] }
0x18a8   :  { %5336 = vmatprep.subr.mxu1 %v5727_v4 }
0x18a9   :  { %v2898_v6 = vpop.f32.mrb[34].mxu0 }
0x18aa   :  { %v5313_v7 = vpop.f32.mrb[35].mxu0  ;;  %5323 = vmatmul.mubr.msk.f32.vlgmr.msra.gmra.mrb[32].mxu1 %vm166_vm2, %v6286_v20  ;;  %v2899_v18 = vadd.f32 %v4741_v14, %v2898_v6 }
0x18ab   :  { %5338 = vmatprep.mubr.msk.f32.mxu1 %vm5726_vm0, %v5727_v4 }
0x18b1   :  { %v3064_v8 = vpop.f32.mrb[36].mxu0 }
0x18b2   :  { %v5335_v9 = vpop.f32.mrb[37].mxu0  ;;  %v3065_v19 = vadd.f32 %v4755_v17, %v3064_v8 }
0x1975   :  { %v6389_v10 = vpop.f32.mrb[30].mxu1 }
0x1976   :  { %v5302_v11 = vpop.f32.mrb[31].mxu1  ;;  %v2818_v58 = vadd.f32 %v4709_v57, %v6389_v10 }
0x197d   :  { %v2981_v13 = vpop.f32.mrb[32].mxu1 }
0x197e   :  { %v2982_v15 = vadd.f32 %v4748_v12, %v2981_v13  ;;  %v5324_v16 = vpop.f32.mrb[33].mxu1 }
0x197f   :  { %v4786_v16 = vld [vmem:[%s6679_s9 + $0x30] sm:$0xff] }
0x1980   :  { %5337 = vmatpush3.xpose.msk.msra.mxu1 %vm402_vm3, %v2982_v15 }
0x1981   :  { %5341 = vmatprep.subr.mxu1 %v5727_v4 }
0x1983   :  { %5339 = vmatmul.mubr.msk.f32.vlgmr.msra.gmra.mrb[34].mxu1 %vm402_vm3, %v2899_v18  ;;  %v4788_v18 = vld [vmem:[%s6703_s0 + $0xe0] sm:$0xff] }
0x1984   :  { %5342 = vmatpush3.msra.mxu1 %v3065_v19  ;;  %5343 = vmatprep.mubr.msk.f32.mxu1 %vm5726_vm0, %v5727_v4  ;;  %v4789_v19 = vld [vmem:[%s6703_s0 + $0xe8] sm:$0xff] }
0x1985   :  { %5603 = vmatprep.subr.bf16.mxu1 %v5725_v2 }
0x1a56   :  { %v3140_v21 = vpop.f32.mrb[34].mxu1 }
0x1a57   :  { %v5340_v22 = vpop.f32.mrb[35].mxu1  ;;  %v3144_v24 = vsel %vm402_vm3, %v3140_v21, -inf }
0x1a58   :  { %3145 = vmax.xlane.f32.xlu0 %v3144_v24  ;;  %v5622_v22 = vpack.c.bf16 %v4789_v19, %v4788_v18  ;;  %v4818_v18 = vld [vmem:[%s6683_s13 + $0x20] sm:$0xff]  ;;  %v4819_v19 = vld [vmem:[%s6683_s13 + $0x28] sm:$0xff] }
0x1ae5   :  { %v3146_v25 = vpop.xlane.xlu0 %3145 }
0x1ae6   :  { %v3147_v23 = vsub.f32 %v3140_v21, %v3146_v25  ;;  %v4790_v25 = vld [vmem:[%s6703_s0 + $0xf0] sm:$0xff] }
0x1ae8   :  { %v3148_v26 = vmul.f32 1.442695, %v3147_v23  ;;  %v4791_v23 = vld [vmem:[%s6703_s0 + $0xf8] sm:$0xff] }
0x1aea   :  { %5685 = vpow2.f32 %v3148_v26  ;;  %v5625_v26 = vpack.c.bf16 %v4791_v23, %v4790_v25  ;;  %v4825_v25 = vld [vmem:[%s6685_s15 + $0x20] sm:$0xff]  ;;  %v4826_v23 = vld [vmem:[%s6685_s15 + $0x28] sm:$0xff] }
0x1af4   :  { %v5686_v27 = vpop.eup %5685 }
0x1af5   :  { %v3150_v28 = vsel %vm402_vm3, %v5686_v27, 0.0 }
0x1af6   :  { %3151 = vadd.xlane.f32.xlu1 %v3150_v28  ;;  %v4803_v28 = vld [vmem:[%s6677_s7 + $0xe8] sm:$0xff] }
0x1b83   :  { %v3152_v30 = vpop.xlane.xlu1 %3151 }
0x1b84   :  { %5687 = vrcp.f32 %v3152_v30  ;;  %v4804_v30 = vld [vmem:[%s6677_s7 + $0xf0] sm:$0xff] }
0x1b85   :  { %v5637_v32 = vpack.c.bf16 %v4805_v31, %v4804_v30  ;;  %v4816_v31 = vld [vmem:[%s6681_s11 + $0x1] ss:$0 sm:$0xff] }
0x1b8e   :  { %v5688_v33 = vpop.eup %5687 }
0x1b8f   :  { %v3154_v35 = vmul.f32 %v5688_v33, %v5686_v27  ;;  %v4802_v27 = vld [vmem:[%s6677_s7 + $0xe0] sm:$0xff] }
0x1b90   :  { %v5634_v29 = vpack.c.bf16 %v4803_v28, %v4802_v27  ;;  %v4795_v33 = vld [vmem:[%s6704_s23 + $0xe0] sm:$0xff] }
0x1b91   :  { %5344 = vmatmul.mubr.msk.f32.vlgmr.msra.gmra.mrb[36].mxu1 %vm402_vm3, %v3154_v35 }
0x1b92   :  { %5605 = vmatpush3.bf16.msra.mxu1 %v5604_v34  ;;  %5359 = vmatprep.mubr.msk.f32.mxu1 %vm5726_vm0, %v5727_v4  ;;  %v4796_v34 = vld [vmem:[%s6704_s23 + $0xe8] sm:$0xff] }
0x1b93   :  { %5606 = vmatprep.subr.bf16.mxu1 %v5725_v2  ;;  %v5628_v35 = vpack.c.bf16 %v4796_v34, %v4795_v33  ;;  %v4817_v33 = vld [vmem:[%s6682_s12 + $0x1] ss:$0 sm:$0xff] }
0x1b96   :  { %5608 = vmatpush3.bf16.msra.mxu1 %v5607_v38 }
0x1b97   :  { %5615 = vmatprep.subr.bf16.mxu1 %v5725_v2 }
0x1b99   :  { %5360 = vmatmul.mubr.msk.f32.vlgmr.msra.gmra.mrb[38].mxu1 %vm166_vm2, %v6286_v20 }
0x1b9a   :  { %5617 = vmatpush3.bf16.msra.mxu1 %v5616_v41  ;;  %5381 = vmatprep.mubr.msk.f32.mxu1 %vm5726_vm0, %v5727_v4 }
0x1b9b   :  { %5618 = vmatprep.subr.bf16.mxu1 %v5725_v2 }
0x1b9e   :  { %5620 = vmatpush3.bf16.msra.mxu1 %v5619_v44 }
0x1b9f   :  { %5394 = vmatprep.subr.mxu1 %v5727_v4 }
0x1ba1   :  { %5382 = vmatmul.mubr.msk.f32.vlgmr.msra.gmra.mrb[40].mxu1 %vm166_vm2, %v6286_v20 }
0x1ba2   :  { %5396 = vmatprep.mubr.msk.f32.mxu1 %vm5726_vm0, %v5727_v4  ;;  %5395 = vmatpush3.msra.mxu1 %v4786_v16 }
0x1ba3   :  { %5627 = vmatprep.subr.bf16.mxu1 %v5725_v2 }
0x1c64   :  { %v3224_v50 = vpop.f32.mrb[36].mxu1 }
0x1c65   :  { %v5345_v51 = vpop.f32.mrb[37].mxu1  ;;  %5349 = vmatmul.mubr.msk.f32.vlgmr.msra.gmra.mrb[38].mxu0 %vm402_vm3, %v3224_v50  ;;  %v4793_v50 = vld [vmem:[%s6707_s2 + $0x7] ss:$0 sm:$0xff] }
0x1c66   :  { %5611 = vmatpush3.bf16.msra.mxu0 %v5610_v47  ;;  %5370 = vmatprep.mubr.msk.f32.mxu0 %vm5726_vm0, %v5727_v4 }
0x1c67   :  { %5612 = vmatprep.subr.bf16.mxu0 %v5725_v2 }
0x1c6a   :  { %5614 = vmatpush3.bf16.msra.mxu0 %v5613_v52 }
0x1c6b   :  { %5384 = vmatprep.subr.mxu0 %v5727_v4 }
0x1c6c   :  { %v3383_v53 = vpop.f32.mrb[38].mxu1 }
0x1c6d   :  { %v5361_v54 = vpop.f32.mrb[39].mxu1  ;;  %5371 = vmatmul.mubr.msk.f32.vlgmr.msra.gmra.mrb[40].mxu0 %vm166_vm2, %v6286_v20  ;;  %v3384_v6 = vadd.f32 %v4767_v0, %v3383_v53  ;;  %v4807_v53 = vld [vmem:[%s6678_s8 + $0x7] ss:$0 sm:$0xff]  ;;  %v4812_v0 = vld [vmem:[%s6679_s9 + $0x38] sm:$0xff] }
0x1c6e   :  { %5386 = vmatprep.mubr.msk.f32.mxu0 %vm5726_vm0, %v5727_v4 }
0x1c74   :  { %v3549_v55 = vpop.f32.mrb[40].mxu1 }
0x1c75   :  { %v5383_v56 = vpop.f32.mrb[41].mxu1  ;;  %v3550_v7 = vadd.f32 %v4781_v5, %v3549_v55 }
0x1d38   :  { %v3299_v59 = vpop.f32.mrb[38].mxu0 }
0x1d39   :  { %v6476_v60 = vadd.f32 %v3299_v59, %v2818_v58  ;;  %v5350_v61 = vpop.f32.mrb[39].mxu0 }
0x1d40   :  { %v3466_v63 = vpop.f32.mrb[40].mxu0 }
0x1d41   :  { %v3467_v1 = vadd.f32 %v4774_v62, %v3466_v63  ;;  %v5372_v3 = vpop.f32.mrb[41].mxu0 }
0x1d43   :  { %5385 = vmatpush3.xpose.msk.msra.mxu0 %vm402_vm3, %v3467_v1 }
0x1d44   :  { %5389 = vmatprep.subr.mxu0 %v5727_v4 }
0x1d46   :  { %5387 = vmatmul.mubr.msk.f32.vlgmr.msra.gmra.mrb[42].mxu0 %vm402_vm3, %v3384_v6 }
0x1d47   :  { %5390 = vmatpush3.msra.mxu0 %v3550_v7  ;;  %5391 = vmatprep.mubr.msk.f32.mxu0 %vm5726_vm0, %v5727_v4 }
0x1d48   :  { %5621 = vmatprep.subr.bf16.mxu0 %v5725_v2 }
0x1e19   :  { %v3625_v8 = vpop.f32.mrb[42].mxu0 }
0x1e1a   :  { %v5388_v9 = vpop.f32.mrb[43].mxu0  ;;  %v3629_v10 = vsel %vm402_vm3, %v3625_v8, -inf }
0x1e1b   :  { %3630 = vmax.xlane.f32.xlu0 %v3629_v10 }
0x1ea8   :  { %v3631_v11 = vpop.xlane.xlu0 %3630 }
0x1ea9   :  { %v3632_v12 = vsub.f32 %v3625_v8, %v3631_v11 }
0x1eab   :  { %v3633_v13 = vmul.f32 1.442695, %v3632_v12 }
0x1ead   :  { %5689 = vpow2.f32 %v3633_v13 }
0x1eb7   :  { %v5690_v14 = vpop.eup %5689 }
0x1eb8   :  { %v3635_v15 = vsel %vm402_vm3, %v5690_v14, 0.0 }
0x1eb9   :  { %3636 = vadd.xlane.f32.xlu1 %v3635_v15 }
0x1f46   :  { %v3637_v17 = vpop.xlane.xlu1 %3636 }
0x1f47   :  { %5691 = vrcp.f32 %v3637_v17 }
0x1f51   :  { %v5692_v21 = vpop.eup %5691 }
0x1f52   :  { %v3639_v24 = vmul.f32 %v5692_v21, %v5690_v14  ;;  %v5640_v21 = vpack.c.bf16 %v4819_v19, %v4818_v18 }
0x1f54   :  { %5392 = vmatmul.mubr.msk.f32.vlgmr.msra.gmra.mrb[44].mxu0 %vm402_vm3, %v3639_v24 }
0x1f55   :  { %5623 = vmatpush3.bf16.msra.mxu0 %v5622_v22  ;;  %5407 = vmatprep.mubr.msk.f32.mxu0 %vm5726_vm0, %v5727_v4  ;;  %v4821_v22 = vld [vmem:[%s6683_s13 + $0x38] sm:$0xff] }
0x1f56   :  { %5624 = vmatprep.subr.bf16.mxu0 %v5725_v2 }
0x1f59   :  { %5626 = vmatpush3.bf16.msra.mxu0 %v5625_v26  ;;  %v5646_v26 = vpack.c.bf16 %v4826_v23, %v4825_v25 }
0x1f5a   :  { %5633 = vmatprep.subr.bf16.mxu0 %v5725_v2 }
0x1f5c   :  { %5408 = vmatmul.mubr.msk.f32.vlgmr.msra.gmra.mrb[46].mxu0 %vm166_vm2, %v6286_v20 }
0x1f5d   :  { %5635 = vmatpush3.bf16.msra.mxu0 %v5634_v29  ;;  %5429 = vmatprep.mubr.msk.f32.mxu0 %vm5726_vm0, %v5727_v4 }
0x1f5e   :  { %5636 = vmatprep.subr.bf16.mxu0 %v5725_v2 }
0x1f61   :  { %5638 = vmatpush3.bf16.msra.mxu0 %v5637_v32 }
0x1f62   :  { %5442 = vmatprep.subr.mxu0 %v5727_v4 }
0x1f64   :  { %5430 = vmatmul.mubr.msk.f32.vlgmr.msra.gmra.mrb[48].mxu0 %vm166_vm2, %v6286_v20 }
0x1f65   :  { %5444 = vmatprep.mubr.msk.f32.mxu0 %vm5726_vm0, %v5727_v4  ;;  %5443 = vmatpush3.msra.mxu0 %v4812_v0  ;;  %v4834_v0 = vld [vmem:[%s6687_s17 + $0x1] ss:$0 sm:$0xff] }
0x1f66   :  { %5645 = vmatprep.subr.bf16.mxu0 %v5725_v2 }
0x2027   :  { %v3709_v38 = vpop.f32.mrb[44].mxu0 }
0x2028   :  { %v5393_v39 = vpop.f32.mrb[45].mxu0  ;;  %5397 = vmatmul.mubr.msk.f32.vlgmr.msra.gmra.mrb[42].mxu1 %vm402_vm3, %v3709_v38  ;;  %v5649_v38 = vpack.c.bf16 %v4828_v37, %v4827_v36 }
0x2029   :  { %5629 = vmatpush3.bf16.msra.mxu1 %v5628_v35  ;;  %5418 = vmatprep.mubr.msk.f32.mxu1 %vm5726_vm0, %v5727_v4  ;;  %v4823_v39 = vld [vmem:[%s6684_s14 + $0x1] ss:$0 sm:$0xff] }
0x202a   :  { %5630 = vmatprep.subr.bf16.mxu1 %v5725_v2 }
0x202d   :  { %5632 = vmatpush3.bf16.msra.mxu1 %v5631_v40 }
0x202e   :  { %5432 = vmatprep.subr.mxu1 %v5727_v4 }
0x202f   :  { %v3868_v41 = vpop.f32.mrb[46].mxu0 }
0x2030   :  { %v5409_v42 = vpop.f32.mrb[47].mxu0  ;;  %5419 = vmatmul.mubr.msk.f32.vlgmr.msra.gmra.mrb[44].mxu1 %vm166_vm2, %v6286_v20  ;;  %v3869_v54 = vadd.f32 %v4793_v50, %v3868_v41 }
0x2031   :  { %5434 = vmatprep.mubr.msk.f32.mxu1 %vm5726_vm0, %v5727_v4 }
0x2037   :  { %v4034_v43 = vpop.f32.mrb[48].mxu0 }
0x2038   :  { %v5431_v44 = vpop.f32.mrb[49].mxu0  ;;  %v4035_v55 = vadd.f32 %v4807_v53, %v4034_v43 }
0x20fb   :  { %v3784_v45 = vpop.f32.mrb[42].mxu1 }
0x20fc   :  { %v3788_v46 = vadd.f32 %v3784_v45, %v6476_v60  ;;  %v5398_v47 = vpop.f32.mrb[43].mxu1 }
0x2103   :  { %v3951_v49 = vpop.f32.mrb[44].mxu1 }
0x2104   :  { %v3952_v51 = vadd.f32 %v4800_v48, %v3951_v49  ;;  %v5420_v52 = vpop.f32.mrb[45].mxu1 }
0x2106   :  { %5433 = vmatpush3.xpose.msk.msra.mxu1 %vm402_vm3, %v3952_v51 }
0x2107   :  { %5437 = vmatprep.subr.mxu1 %v5727_v4 }
0x2109   :  { %5435 = vmatmul.mubr.msk.f32.vlgmr.msra.gmra.mrb[46].mxu1 %vm402_vm3, %v3869_v54  ;;  %v4511_v54 = vld [vmem:[%s6689_s19] sm:$0xff] }
0x210a   :  { %5438 = vmatpush3.msra.mxu1 %v4035_v55  ;;  %5439 = vmatprep.mubr.msk.f32.mxu1 %vm5726_vm0, %v5727_v4  ;;  %v4512_v55 = vld [vmem:[%s6689_s19 + $0x8] sm:$0xff] }
0x210b   :  { %5639 = vmatprep.subr.bf16.mxu1 %v5725_v2 }
0x21dc   :  { %v4110_v56 = vpop.f32.mrb[46].mxu1 }
0x21dd   :  { %v5436_v57 = vpop.f32.mrb[47].mxu1  ;;  %v4114_v58 = vsel %vm402_vm3, %v4110_v56, -inf }
0x21de   :  { %4115 = vmax.xlane.f32.xlu0 %v4114_v58  ;;  %v4513_v57 = vld [vmem:[%s6689_s19 + $0x10] sm:$0xff]  ;;  %v4514_v58 = vld [vmem:[%s6689_s19 + $0x18] sm:$0xff] }
0x226b   :  { %v4116_v59 = vpop.xlane.xlu0 %4115 }
0x226c   :  { %v4117_v60 = vsub.f32 %v4110_v56, %v4116_v59  ;;  %v5652_v56 = vpack.c.bf16 %v4512_v55, %v4511_v54  ;;  %v5655_v59 = vpack.c.bf16 %v4514_v58, %v4513_v57 }
0x226e   :  { %v4118_v61 = vmul.f32 1.442695, %v4117_v60 }
0x2270   :  { %5693 = vpow2.f32 %v4118_v61 }
0x227a   :  { %v5694_v62 = vpop.eup %5693 }
0x227b   :  { %v4120_v63 = vsel %vm402_vm3, %v5694_v62, 0.0 }
0x227c   :  { %4121 = vadd.xlane.f32.xlu1 %v4120_v63 }
0x2309   :  { %v4122_v1 = vpop.xlane.xlu1 %4121 }
0x230a   :  { %5695 = vrcp.f32 %v4122_v1  ;;  %v4835_v1 = vld [vmem:[%s6688_s18 + $0x1] ss:$0 sm:$0xff] }
0x2314   :  { %v5696_v3 = vpop.eup %5695 }
0x2315   :  { %v4124_v5 = vmul.f32 %v5696_v3, %v5694_v62 }
0x2317   :  { %5440 = vmatmul.mubr.msk.f32.vlgmr.msra.gmra.mrb[48].mxu1 %vm402_vm3, %v4124_v5 }
0x2318   :  { %5455 = vmatprep.mubr.msk.f32.mxu1 %vm5726_vm0, %v5727_v4  ;;  %5641 = vmatpush3.bf16.msra.mxu1 %v5640_v21 }
0x2319   :  { %5642 = vmatprep.subr.bf16.mxu1 %v5725_v2 }
0x23ea   :  { %v4194_v6 = vpop.f32.mrb[48].mxu1 }
0x23eb   :  { %v5441_v7 = vpop.f32.mrb[49].mxu1  ;;  %5445 = vmatmul.mubr.msk.f32.vlgmr.msra.gmra.mrb[50].mxu0 %vm402_vm3, %v4194_v6  ;;  %v4836_v6 = vld [vmem:[%s6690_s20] ss:$0 sm:$0xff] }
0x23ec   :  { %5466 = vmatprep.mubr.msk.f32.mxu0 %vm5726_vm0, %v5727_v4  ;;  %5647 = vmatpush3.bf16.msra.mxu0 %v5646_v26 }
0x23ed   :  { %5648 = vmatprep.subr.bf16.mxu0 %v5725_v2 }
0x23f0   :  { %5650 = vmatpush3.bf16.msra.mxu0 %v5649_v38 }
0x24be   :  { %v4269_v8 = vpop.f32.mrb[50].mxu0 }
0x24bf   :  { %v4273_v9 = vadd.f32 %v4269_v8, %v3788_v46  ;;  %v5446_v10 = vpop.f32.mrb[51].mxu0 }
0x24c1   :  { %v4274_v11 = vadd.f32 %v4273_v9, %v6286_v20  ;;  %v4820_v20 = vld [vmem:[%s6683_s13 + $0x30] sm:$0xff]  ;;  %s4602_s13 = sshll.u32 %s5728_s30, 4  ;;  %s4603_s13 = int_to_ptr.vmem [resolvable:$true] %s4602_s13 }
0x24c2   :  { %v5643_v24 = vpack.c.bf16 %v4821_v22, %v4820_v20  ;;  %s5701_s17 = scalar_lea.vmem %s4603_s13, 128  ;;  %p5706_p1 = scmp.lt.s32.totalorder %s4603_s13, %s4603_s13 }
0x24c3   :  { %v4279_v12 = vsel %vm166_vm2, %v4274_v11, 0.0  ;;  %p5702_p0 = scmp.ne.s32.totalorder %s4603_s13, %s5701_s17  ;;  %p5707_p2 = scmp.lt.s32.totalorder %s5701_s17, %s5701_s17 }
0x24c4   :  { %4280 = vadd.xlane.f32.xlu0 %v4279_v12  ;;  %5644 = vmatpush3.bf16.msra.mxu1 %v5643_v24 }
0x24c5   :  { %5651 = vmatprep.subr.bf16.mxu1 %v5725_v2  ;;  %p5708_p3 = por %p5707_p2, %p5706_p1 }
0x24c7   :  { %p5709_p4 = pnand %p5708_p3, %p5702_p0 }
0x2551   :  { %v4281_v13 = vpop.xlane.xlu0 %4280 }
0x2552   :  { %v4282_v14 = vmul.f32 0.03125, %v4281_v13 }
0x2554   :  { %v4283_v15 = vsub.f32 %v4274_v11, %v4282_v14 }
0x2556   :  { %v4284_v16 = vmul.f32 %v4283_v15, %v4283_v15 }
0x2558   :  { %v4285_v17 = vsel %vm166_vm2, %v4284_v16, 0.0 }
0x2559   :  { %4286 = vadd.xlane.f32.xlu1 %v4285_v17 }
0x25e6   :  { %v4287_v27 = vpop.xlane.xlu1 %4286 }
0x25e7   :  { %v4288_v28 = vmul.f32 0.03125, %v4287_v27 }
0x25e9   :  { %v4289_v29 = vadd.f32 1e-05, %v4288_v28 }
0x25eb   :  { %5697 = vrsqrt.f32 %v4289_v29 }
0x25f5   :  { %v5698_v30 = vpop.eup %5697 }
0x25f6   :  { %v4291_v32 = vmul.f32 %v5698_v30, %v4283_v15 }
0x25f8   :  { %v4298_v34 = vmul.f32 %v4816_v31, %v4291_v32 }
0x25fa   :  { %v4305_v35 = vadd.f32 %v4817_v33, %v4298_v34 }
0x25fc   :  { %5456 = vmatmul.mubr.msk.f32.vlgmr.msra.gmra.mrb[50].mxu1 %vm166_vm2, %v4305_v35 }
0x25fd   :  { %5477 = vmatprep.mubr.msk.f32.mxu1 %vm5726_vm0, %v5727_v4  ;;  %v4830_v4 = vld [vmem:[%s6686_s16 + $0x1] ss:$0 sm:$0xff]  ;;  %5653 = vmatpush3.bf16.msra.mxu1 %v5652_v56 }
0x25fe   :  { %5654 = vmatprep.subr.bf16.mxu1 %v5725_v2 }
0x2601   :  { %5656 = vmatpush3.bf16.msra.mxu1 %v5655_v59 }
0x26cf   :  { %v4388_v40 = vpop.f32.mrb[50].mxu1 }
0x26d0   :  { %v4389_v41 = vadd.f32 %v4823_v39, %v4388_v40  ;;  %v5457_v42 = vpop.f32.mrb[51].mxu1 }
0x26d2   :  { %v4392_v43 = vmax.f32 %v4389_v41, 0.0 }
0x26d4   :  { %5467 = vmatmul.mubr.msk.f32.vlgmr.msra.gmra.mrb[52].mxu0 %vm166_vm2, %v4392_v43 }
0x27a7   :  { %v4475_v44 = vpop.f32.mrb[52].mxu0 }
0x27a8   :  { %v4476_v45 = vadd.f32 %v4830_v4, %v4475_v44  ;;  %v5468_v46 = vpop.f32.mrb[53].mxu0 }
0x27aa   :  { %v4479_v47 = vadd.f32 %v4476_v45, %v4305_v35 }
0x27ac   :  { %v4484_v48 = vsel %vm166_vm2, %v4479_v47, 0.0 }
0x27ad   :  { %4485 = vadd.xlane.f32.xlu0 %v4484_v48 }
0x283a   :  { %v4486_v49 = vpop.xlane.xlu0 %4485 }
0x283b   :  { %v4487_v50 = vmul.f32 0.03125, %v4486_v49 }
0x283d   :  { %v4488_v51 = vsub.f32 %v4479_v47, %v4487_v50 }
0x283f   :  { %v4489_v52 = vmul.f32 %v4488_v51, %v4488_v51 }
0x2841   :  { %v4490_v53 = vsel %vm166_vm2, %v4489_v52, 0.0 }
0x2842   :  { %4491 = vadd.xlane.f32.xlu1 %v4490_v53 }
0x28cf   :  { %v4492_v60 = vpop.xlane.xlu1 %4491 }
0x28d0   :  { %v4493_v61 = vmul.f32 0.03125, %v4492_v60 }
0x28d2   :  { %v4494_v62 = vadd.f32 1e-05, %v4493_v61 }
0x28d4   :  { %5699 = vrsqrt.f32 %v4494_v62 }
0x28de   :  { %v5700_v63 = vpop.eup %5699 }
0x28df   :  { %v4496_v2 = vmul.f32 %v5700_v63, %v4488_v51 }
0x28e1   :  { %v4503_v3 = vmul.f32 %v4834_v0, %v4496_v2 }
0x28e3   :  { %v4510_v5 = vadd.f32 %v4835_v1, %v4503_v3 }
0x28e5   :  { %5478 = vmatmul.mubr.msk.f32.vlgmr.msra.gmra.mrb[52].mxu1 %vm166_vm2, %v4510_v5 }
0x29b8   :  { %v4591_v7 = vpop.f32.mrb[52].mxu1 }
0x29b9   :  { %v4592_v8 = vadd.f32 %v4836_v6, %v4591_v7  ;;  %v5479_v9 = vpop.f32.mrb[53].mxu1 }
0x29bb   :  { %4595 = vst [vmem:[#allocation2] sm:$0xff] %v4592_v8 }
0x29bc   :  { %5712 = shalt.err (!%p5709_p4)
}
0x29bd   :  { %s5713_s5 = scalar_lea.hbm %s6691_s21, 128 }
0x29be   :  { %p5714_p5 = scmp.ne.s32.totalorder %s6691_s21, %s5713_s5  ;;  %p5717_p6 = scmp.lt.u32.totalorder %s5713_s5, %s6691_s21 }
0x29c0   :  { %p5719_p7 = pnand %p5717_p6, %p5714_p5 }
0x29c2   :  { %5722 = shalt.err (!%p5719_p7)
}
0x29c3   :  { %4605 = dma.vmem_to_hbm [thread:$0]  %s4603_s13, 128, %s6691_s21, [#allocation3]  }
0x29c4   :  { %5723 = dma.done.wait [#allocation3], 128  }
0x29c5   :  { %5724 = vsyncadd [#allocation3], 4294967168 }
0x29c6   :  { %4609 = vsyncpa [#allocation3], 1 }

</bundles_post_ra>
